<compile_context>
chip_gen: v7x
topology: tpu7x:2x2x1
jax: 0.10.0
libtpu: 0.0.40
codegen_flags: <defaults>
</compile_context>

<pallas_src>
import numpy as np
import jax
import jax.numpy as jnp
from jax import lax
from jax.experimental import pallas as pl
from jax.experimental.pallas import tpu as pltpu

KW = 4          # conv kernel size
PAD = 1         # conv padding
NEG_SLOPE = 0.2
BN_EPS = 1e-5


# ----------------------------------------------------------------------------
# One-time wrapper-side prep (spectral norm + operator packing)
# ----------------------------------------------------------------------------

def spectral_normalize(w_oihw, key, n_iter=1):
    """Standard spectral norm: W / sigma, sigma via power iteration on (Cout, -1)."""
    co = w_oihw.shape[0]
    w_mat = w_oihw.reshape(co, -1)
    u = jax.random.normal(key, (co,), jnp.float32)
    u = u / (jnp.linalg.norm(u) + 1e-12)
    v = None
    for _ in range(n_iter):
        v = w_mat.T @ u
        v = v / (jnp.linalg.norm(v) + 1e-12)
        u = w_mat @ v
        u = u / (jnp.linalg.norm(u) + 1e-12)
    sigma = u @ (w_mat @ v)
    return w_oihw / sigma


def _conv_out(n, stride):
    return (n + 2 * PAD - KW) // stride + 1


def _build_row_select(n_batch, h_in, h_out, stride):
    """L[kh]: (N*Ho, N*H) 0/1 operator picking input row stride*ho + kh - PAD.
    Out-of-range rows stay all-zero (encodes the H-direction zero padding)."""
    L = np.zeros((KW, n_batch * h_out, n_batch * h_in), np.float32)
    for kh in range(KW):
        for n in range(n_batch):
            for ho in range(h_out):
                h = stride * ho + kh - PAD
                if 0 <= h < h_in:
                    L[kh, n * h_out + ho, n * h_in + h] = 1.0
    return L


def _build_col_weight(w_sn, w_in, w_out, stride):
    """Om[kh]: (W_in*C_in, W_out*C_out) operator fusing the W-direction taps,
    the W-direction zero padding and the channel contraction for one kh tap."""
    cout, cin = w_sn.shape[0], w_sn.shape[1]
    wt = np.transpose(np.asarray(w_sn, np.float32), (2, 3, 1, 0))   # (kh,kw,ci,co)
    om = np.zeros((KW, w_in * cin, w_out * cout), np.float32)
    for kh in range(KW):
        for wo in range(w_out):
            for kw in range(KW):
                w = stride * wo + kw - PAD
                if 0 <= w < w_in:
                    om[kh, w * cin:(w + 1) * cin,
                           wo * cout:(wo + 1) * cout] = wt[kh, kw]
    return om


def _build_fold(w_out, c):
    """(Wo*C, C) 0/1 matrix summing the Wo column blocks per channel."""
    fold = np.zeros((w_out * c, c), np.float32)
    for b in range(w_out):
        fold[b * c:(b + 1) * c, :] = np.eye(c, dtype=np.float32)
    return fold


# ----------------------------------------------------------------------------
# Parameter init mirroring the PyTorch __init__ structure
# ----------------------------------------------------------------------------

def init_params(key, input_nc=3, ndf=16, n_layers=3):
    params = []
    keys = jax.random.split(key, 16)
    ki = iter(range(16))

    def conv_w(k, cout, cin):
        return 0.02 * jax.random.normal(k, (cout, cin, 4, 4), jnp.float32)

    # layer 0: conv(input_nc -> ndf, s=2) + bias, LeakyReLU (no norm)
    w = conv_w(keys[next(ki)], ndf, input_nc)
    b = 0.01 * jax.random.normal(keys[next(ki)], (ndf,), jnp.float32)
    params.append(dict(w=w, b=b, stride=2, bn=False, gamma=None, beta=None,
                       lrelu=True, sn_key=keys[next(ki)]))

    nf_mult = 1
    for n in range(1, n_layers):
        nf_mult_prev, nf_mult = nf_mult, min(2 ** n, 8)
        w = conv_w(keys[next(ki)], ndf * nf_mult, ndf * nf_mult_prev)
        params.append(dict(w=w, b=None, stride=2, bn=True,
                           gamma=jnp.ones((ndf * nf_mult,), jnp.float32),
                           beta=jnp.zeros((ndf * nf_mult,), jnp.float32),
                           lrelu=True, sn_key=keys[next(ki)]))

    nf_mult_prev, nf_mult = nf_mult, min(2 ** n_layers, 8)
    w = conv_w(keys[next(ki)], ndf * nf_mult, ndf * nf_mult_prev)
    params.append(dict(w=w, b=None, stride=1, bn=True,
                       gamma=jnp.ones((ndf * nf_mult,), jnp.float32),
                       beta=jnp.zeros((ndf * nf_mult,), jnp.float32),
                       lrelu=True, sn_key=keys[next(ki)]))

    # final: conv(ndf*nf_mult -> 1, s=1) + bias, no norm, no activation
    w = conv_w(keys[next(ki)], 1, ndf * nf_mult)
    b = 0.01 * jax.random.normal(keys[next(ki)], (1,), jnp.float32)
    params.append(dict(w=w, b=b, stride=1, bn=False, gamma=None, beta=None,
                       lrelu=False, sn_key=keys[next(ki)]))
    return params


# ----------------------------------------------------------------------------
# Fully fused forward: the whole discriminator in ONE pallas_call
# ----------------------------------------------------------------------------

def make_forward(params, input_shape):
    """Precompute the per-layer selection / weight operators ONCE and return a
    jitted forward pass that runs the whole stack in a single Pallas kernel."""
    N, C0, H0, W0 = input_shape

    metas, operands, ref_layers = [], [], []
    h, w = H0, W0
    for p in params:
        w_sn = spectral_normalize(p["w"], p["sn_key"])        # (Cout, Cin, 4, 4)
        cout = int(w_sn.shape[0])
        s = p["stride"]
        ho, wo = _conv_out(h, s), _conv_out(w, s)

        L = jnp.asarray(_build_row_select(N, h, ho, s), jnp.bfloat16)
        Om = jnp.asarray(_build_col_weight(np.asarray(w_sn), w, wo, s),
                         jnp.bfloat16)

        metas.append(dict(bn=p["bn"], lrelu=p["lrelu"], cout=cout, wo=wo,
                          rows=N * ho, cols=wo * cout, m_cnt=N * ho * wo))
        ops = [L, Om]
        if p["bn"]:
            fold = _build_fold(wo, cout)
            ops += [p["gamma"].reshape(1, cout).astype(jnp.float32),
                    p["beta"].reshape(1, cout).astype(jnp.float32),
                    jnp.asarray(fold, jnp.float32),
                    jnp.asarray(fold.T.copy(), jnp.float32)]
        else:
            b = p["b"] if p["b"] is not None else jnp.zeros((cout,), jnp.float32)
            bias_t = jnp.tile(b.reshape(1, 1, cout), (1, wo, 1)).reshape(1, wo * cout)
            ops += [bias_t.astype(jnp.float32)]
        operands.extend(ops)

        ref_layers.append(dict(w=w_sn.astype(jnp.float32), bias=p["b"],
                               gamma=p["gamma"], beta=p["beta"],
                               stride=s, bn=p["bn"], lrelu=p["lrelu"]))
        h, w = ho, wo

    out_rows, out_cols = metas[-1]["rows"], metas[-1]["cols"]
    ho_last, wo_last, c_last = out_rows // N, metas[-1]["wo"], metas[-1]["cout"]

    def kernel(*refs):
        out_ref = refs[-1]
        it = iter(refs[:-1])
        y = next(it)[...]                                    # (N*H0, W0*C0) bf16
        v = None
        n_layers = len(metas)
        for li, m in enumerate(metas):
            l_ref = next(it)
            om_ref = next(it)
            acc = None
            for kh in range(KW):                             # 4 shifted matmuls
                t = jnp.dot(l_ref[kh], y, preferred_element_type=jnp.float32)
                c = jnp.dot(t.astype(jnp.bfloat16), om_ref[kh],
                            preferred_element_type=jnp.float32)
                acc = c if acc is None else acc + c
            if m["bn"]:
                gamma = next(it)[...]
                beta = next(it)[...]
                fold = next(it)[...]                         # (Wo*C, C) f32
                tile = next(it)[...]                         # (C, Wo*C) f32
                inv_m = 1.0 / float(m["m_cnt"])
                ones = jnp.ones((1, m["rows"]), jnp.float32)
                mean_c = jnp.dot(jnp.dot(ones, acc), fold) * inv_m        # (1, C)
                cen = acc - jnp.dot(mean_c, tile)
                var_c = jnp.dot(jnp.dot(ones, cen * cen), fold) * inv_m
                inv_std = lax.rsqrt(jnp.maximum(var_c, 0.0) + BN_EPS)
                scale_c = gamma * inv_std
                shift_c = beta - mean_c * scale_c
                v = acc * jnp.dot(scale_c, tile) + jnp.dot(shift_c, tile)
                v = jnp.where(v > 0.0, v, NEG_SLOPE * v)
            else:
                bias = next(it)[...]                         # (1, Wo*C) f32
                v = acc + bias
                if m["lrelu"]:
                    v = jnp.where(v > 0.0, v, NEG_SLOPE * v)
            if li + 1 < n_layers:
                y = v.astype(jnp.bfloat16)                   # bf16 between layers
        out_ref[...] = v                                     # (N*Ho4, Wo4) f32

    fused = pl.pallas_call(
        kernel,
        out_shape=jax.ShapeDtypeStruct((out_rows, out_cols), jnp.float32),
        compiler_params=pltpu.CompilerParams(
            vmem_limit_bytes=32 * 1024 * 1024),
    )

    def forward(x_nchw):
        x = jnp.transpose(x_nchw, (0, 2, 3, 1)).astype(jnp.bfloat16)  # NCHW->NHWC
        x0 = x.reshape(N * H0, W0 * C0)                               # rows=(n,h)
        out2d = fused(x0, *operands)
        out = out2d.reshape(N, ho_last, wo_last, c_last)
        return jnp.transpose(out, (0, 3, 1, 2))                       # NHWC->NCHW

    return jax.jit(forward), ref_layers


# ----------------------------------------------------------------------------
# Pure-JAX f32 reference (for a tolerance check)
# ----------------------------------------------------------------------------

def reference_forward(x_nchw, ref_layers):
    y = x_nchw.astype(jnp.float32)
    for lr in ref_layers:
        y = lax.conv_general_dilated(
            y, lr["w"], window_strides=(lr["stride"], lr["stride"]),
            padding=((PAD, PAD), (PAD, PAD)),
            dimension_numbers=("NCHW", "OIHW", "NCHW"))
        if lr["bias"] is not None:
            y = y + lr["bias"][None, :, None, None]
        if lr["bn"]:
            mean = jnp.mean(y, axis=(0, 2, 3), keepdims=True)
            var = jnp.mean((y - mean) ** 2, axis=(0, 2, 3), keepdims=True)
            y = (y - mean) * lax.rsqrt(var + BN_EPS)
            y = y * lr["gamma"][None, :, None, None] + lr["beta"][None, :, None, None]
        if lr["lrelu"]:
            y = jnp.where(y > 0.0, y, NEG_SLOPE * y)
    return y


# ----------------------------------------------------------------------------

if __name__ == "__main__":
    key = jax.random.PRNGKey(0)
    k_x, k_p = jax.random.split(key)

    # input_nc=3, ndf=16, n_layers=3; spatial 32 so the PatchGAN stack
    # (three stride-2 convs + two stride-1 convs, k=4, p=1) stays non-degenerate:
    # 32 -> 16 -> 8 -> 4 -> 3 -> 2, output (2, 1, 2, 2).
    x = jax.random.normal(k_x, (2, 3, 32, 32), jnp.float32)

    params = init_params(k_p, input_nc=3, ndf=16, n_layers=3)
    fwd, ref_layers = make_forward(params, input_shape=x.shape)

    out = jax.block_until_ready(fwd(x))
    assert out.shape == (2, 1, 2, 2), out.shape
    assert bool(jnp.all(jnp.isfinite(out)))

    ref = reference_forward(x, ref_layers)
    rel_err = float(jnp.linalg.norm(out - ref) / (jnp.linalg.norm(ref) + 1e-12))
    assert rel_err < 5e-2, f"relative L2 error vs f32 reference: {rel_err}"

    print("KERNEL_OK")
</pallas_src>

<mosaic_0001>
module attributes {stable_mosaic.version = 11 : i64} {
  func.func @kernel(%arg0: memref<64x96xbf16, #tpu.memory_space<vmem>>, %arg1: memref<4x32x64xbf16, #tpu.memory_space<vmem>>, %arg2: memref<4x96x256xbf16, #tpu.memory_space<vmem>>, %arg3: memref<1x256xf32, #tpu.memory_space<vmem>>, %arg4: memref<4x16x32xbf16, #tpu.memory_space<vmem>>, %arg5: memref<4x256x256xbf16, #tpu.memory_space<vmem>>, %arg6: memref<1x32xf32, #tpu.memory_space<vmem>>, %arg7: memref<1x32xf32, #tpu.memory_space<vmem>>, %arg8: memref<256x32xf32, #tpu.memory_space<vmem>>, %arg9: memref<32x256xf32, #tpu.memory_space<vmem>>, %arg10: memref<4x8x16xbf16, #tpu.memory_space<vmem>>, %arg11: memref<4x256x256xbf16, #tpu.memory_space<vmem>>, %arg12: memref<1x64xf32, #tpu.memory_space<vmem>>, %arg13: memref<1x64xf32, #tpu.memory_space<vmem>>, %arg14: memref<256x64xf32, #tpu.memory_space<vmem>>, %arg15: memref<64x256xf32, #tpu.memory_space<vmem>>, %arg16: memref<4x6x8xbf16, #tpu.memory_space<vmem>>, %arg17: memref<4x256x384xbf16, #tpu.memory_space<vmem>>, %arg18: memref<1x128xf32, #tpu.memory_space<vmem>>, %arg19: memref<1x128xf32, #tpu.memory_space<vmem>>, %arg20: memref<384x128xf32, #tpu.memory_space<vmem>>, %arg21: memref<128x384xf32, #tpu.memory_space<vmem>>, %arg22: memref<4x4x6xbf16, #tpu.memory_space<vmem>>, %arg23: memref<4x384x2xbf16, #tpu.memory_space<vmem>>, %arg24: memref<1x2xf32, #tpu.memory_space<vmem>>, %arg25: memref<4x2xf32, #tpu.memory_space<vmem>>) attributes {dimension_semantics = [], scalar_prefetch = 0 : i64, scratch_operands = 0 : i64, tpu.core_type = #tpu.core_type<tc>} {
    %c0 = arith.constant 0 : index
    %c0_0 = arith.constant 0 : index
    %0 = vector.load %arg0[%c0, %c0_0] : memref<64x96xbf16, #tpu.memory_space<vmem>>, vector<64x96xbf16>
    %c0_1 = arith.constant 0 : index
    %c0_2 = arith.constant 0 : index
    %c0_3 = arith.constant 0 : index
    %1 = vector.load %arg1[%c0_1, %c0_2, %c0_3] : memref<4x32x64xbf16, #tpu.memory_space<vmem>>, vector<1x32x64xbf16>
    %2 = vector.shape_cast %1 : vector<1x32x64xbf16> to vector<32x64xbf16>
    %cst = arith.constant dense<0.000000e+00> : vector<32x96xf32>
    %3 = tpu.matmul %2, %0, %cst {dimension_numbers = #tpu.dot_dimension_numbers<[1], [0], [0], [1], [0, 0, 1, 1], [], []>} : vector<32x64xbf16>, vector<64x96xbf16>, vector<32x96xf32> -> vector<32x96xf32>
    %4 = arith.truncf %3 : vector<32x96xf32> to vector<32x96xbf16>
    %c0_4 = arith.constant 0 : index
    %c0_5 = arith.constant 0 : index
    %c0_6 = arith.constant 0 : index
    %5 = vector.load %arg2[%c0_4, %c0_5, %c0_6] : memref<4x96x256xbf16, #tpu.memory_space<vmem>>, vector<1x96x256xbf16>
    %6 = vector.shape_cast %5 : vector<1x96x256xbf16> to vector<96x256xbf16>
    %cst_7 = arith.constant dense<0.000000e+00> : vector<32x256xf32>
    %7 = tpu.matmul %4, %6, %cst_7 {dimension_numbers = #tpu.dot_dimension_numbers<[1], [0], [0], [1], [0, 0, 1, 1], [], []>} : vector<32x96xbf16>, vector<96x256xbf16>, vector<32x256xf32> -> vector<32x256xf32>
    %c1 = arith.constant 1 : index
    %c0_8 = arith.constant 0 : index
    %c0_9 = arith.constant 0 : index
    %8 = vector.load %arg1[%c1, %c0_8, %c0_9] : memref<4x32x64xbf16, #tpu.memory_space<vmem>>, vector<1x32x64xbf16>
    %9 = vector.shape_cast %8 : vector<1x32x64xbf16> to vector<32x64xbf16>
    %cst_10 = arith.constant dense<0.000000e+00> : vector<32x96xf32>
    %10 = tpu.matmul %9, %0, %cst_10 {dimension_numbers = #tpu.dot_dimension_numbers<[1], [0], [0], [1], [0, 0, 1, 1], [], []>} : vector<32x64xbf16>, vector<64x96xbf16>, vector<32x96xf32> -> vector<32x96xf32>
    %11 = arith.truncf %10 : vector<32x96xf32> to vector<32x96xbf16>
    %c1_11 = arith.constant 1 : index
    %c0_12 = arith.constant 0 : index
    %c0_13 = arith.constant 0 : index
    %12 = vector.load %arg2[%c1_11, %c0_12, %c0_13] : memref<4x96x256xbf16, #tpu.memory_space<vmem>>, vector<1x96x256xbf16>
    %13 = vector.shape_cast %12 : vector<1x96x256xbf16> to vector<96x256xbf16>
    %cst_14 = arith.constant dense<0.000000e+00> : vector<32x256xf32>
    %14 = tpu.matmul %11, %13, %cst_14 {dimension_numbers = #tpu.dot_dimension_numbers<[1], [0], [0], [1], [0, 0, 1, 1], [], []>} : vector<32x96xbf16>, vector<96x256xbf16>, vector<32x256xf32> -> vector<32x256xf32>
    %15 = arith.addf %7, %14 : vector<32x256xf32>
    %c2 = arith.constant 2 : index
    %c0_15 = arith.constant 0 : index
    %c0_16 = arith.constant 0 : index
    %16 = vector.load %arg1[%c2, %c0_15, %c0_16] : memref<4x32x64xbf16, #tpu.memory_space<vmem>>, vector<1x32x64xbf16>
    %17 = vector.shape_cast %16 : vector<1x32x64xbf16> to vector<32x64xbf16>
    %cst_17 = arith.constant dense<0.000000e+00> : vector<32x96xf32>
    %18 = tpu.matmul %17, %0, %cst_17 {dimension_numbers = #tpu.dot_dimension_numbers<[1], [0], [0], [1], [0, 0, 1, 1], [], []>} : vector<32x64xbf16>, vector<64x96xbf16>, vector<32x96xf32> -> vector<32x96xf32>
    %19 = arith.truncf %18 : vector<32x96xf32> to vector<32x96xbf16>
    %c2_18 = arith.constant 2 : index
    %c0_19 = arith.constant 0 : index
    %c0_20 = arith.constant 0 : index
    %20 = vector.load %arg2[%c2_18, %c0_19, %c0_20] : memref<4x96x256xbf16, #tpu.memory_space<vmem>>, vector<1x96x256xbf16>
    %21 = vector.shape_cast %20 : vector<1x96x256xbf16> to vector<96x256xbf16>
    %cst_21 = arith.constant dense<0.000000e+00> : vector<32x256xf32>
    %22 = tpu.matmul %19, %21, %cst_21 {dimension_numbers = #tpu.dot_dimension_numbers<[1], [0], [0], [1], [0, 0, 1, 1], [], []>} : vector<32x96xbf16>, vector<96x256xbf16>, vector<32x256xf32> -> vector<32x256xf32>
    %23 = arith.addf %15, %22 : vector<32x256xf32>
    %c3 = arith.constant 3 : index
    %c0_22 = arith.constant 0 : index
    %c0_23 = arith.constant 0 : index
    %24 = vector.load %arg1[%c3, %c0_22, %c0_23] : memref<4x32x64xbf16, #tpu.memory_space<vmem>>, vector<1x32x64xbf16>
    %25 = vector.shape_cast %24 : vector<1x32x64xbf16> to vector<32x64xbf16>
    %cst_24 = arith.constant dense<0.000000e+00> : vector<32x96xf32>
    %26 = tpu.matmul %25, %0, %cst_24 {dimension_numbers = #tpu.dot_dimension_numbers<[1], [0], [0], [1], [0, 0, 1, 1], [], []>} : vector<32x64xbf16>, vector<64x96xbf16>, vector<32x96xf32> -> vector<32x96xf32>
    %27 = arith.truncf %26 : vector<32x96xf32> to vector<32x96xbf16>
    %c3_25 = arith.constant 3 : index
    %c0_26 = arith.constant 0 : index
    %c0_27 = arith.constant 0 : index
    %28 = vector.load %arg2[%c3_25, %c0_26, %c0_27] : memref<4x96x256xbf16, #tpu.memory_space<vmem>>, vector<1x96x256xbf16>
    %29 = vector.shape_cast %28 : vector<1x96x256xbf16> to vector<96x256xbf16>
    %cst_28 = arith.constant dense<0.000000e+00> : vector<32x256xf32>
    %30 = tpu.matmul %27, %29, %cst_28 {dimension_numbers = #tpu.dot_dimension_numbers<[1], [0], [0], [1], [0, 0, 1, 1], [], []>} : vector<32x96xbf16>, vector<96x256xbf16>, vector<32x256xf32> -> vector<32x256xf32>
    %31 = arith.addf %23, %30 : vector<32x256xf32>
    %c0_29 = arith.constant 0 : index
    %c0_30 = arith.constant 0 : index
    %32 = vector.load %arg3[%c0_29, %c0_30] : memref<1x256xf32, #tpu.memory_space<vmem>>, vector<1x256xf32>
    %33 = vector.broadcast %32 : vector<1x256xf32> to vector<32x256xf32>
    %34 = arith.addf %31, %33 : vector<32x256xf32>
    %cst_31 = arith.constant 0.000000e+00 : f32
    %35 = vector.broadcast %cst_31 : f32 to vector<32x256xf32>
    %36 = arith.cmpf ogt, %34, %35 : vector<32x256xf32>
    %cst_32 = arith.constant 2.000000e-01 : f32
    %37 = vector.broadcast %cst_32 : f32 to vector<32x256xf32>
    %38 = arith.mulf %37, %34 : vector<32x256xf32>
    %39 = arith.select %36, %34, %38 : vector<32x256xi1>, vector<32x256xf32>
    %40 = arith.truncf %39 : vector<32x256xf32> to vector<32x256xbf16>
    %c0_33 = arith.constant 0 : index
    %c0_34 = arith.constant 0 : index
    %c0_35 = arith.constant 0 : index
    %41 = vector.load %arg4[%c0_33, %c0_34, %c0_35] : memref<4x16x32xbf16, #tpu.memory_space<vmem>>, vector<1x16x32xbf16>
    %42 = vector.shape_cast %41 : vector<1x16x32xbf16> to vector<16x32xbf16>
    %cst_36 = arith.constant dense<0.000000e+00> : vector<16x256xf32>
    %43 = tpu.matmul %42, %40, %cst_36 {dimension_numbers = #tpu.dot_dimension_numbers<[1], [0], [0], [1], [0, 0, 1, 1], [], []>} : vector<16x32xbf16>, vector<32x256xbf16>, vector<16x256xf32> -> vector<16x256xf32>
    %44 = arith.truncf %43 : vector<16x256xf32> to vector<16x256xbf16>
    %c0_37 = arith.constant 0 : index
    %c0_38 = arith.constant 0 : index
    %c0_39 = arith.constant 0 : index
    %45 = vector.load %arg5[%c0_37, %c0_38, %c0_39] : memref<4x256x256xbf16, #tpu.memory_space<vmem>>, vector<1x256x256xbf16>
    %46 = vector.shape_cast %45 : vector<1x256x256xbf16> to vector<256x256xbf16>
    %cst_40 = arith.constant dense<0.000000e+00> : vector<16x256xf32>
    %47 = tpu.matmul %44, %46, %cst_40 {dimension_numbers = #tpu.dot_dimension_numbers<[1], [0], [0], [1], [0, 0, 1, 1], [], []>} : vector<16x256xbf16>, vector<256x256xbf16>, vector<16x256xf32> -> vector<16x256xf32>
    %c1_41 = arith.constant 1 : index
    %c0_42 = arith.constant 0 : index
    %c0_43 = arith.constant 0 : index
    %48 = vector.load %arg4[%c1_41, %c0_42, %c0_43] : memref<4x16x32xbf16, #tpu.memory_space<vmem>>, vector<1x16x32xbf16>
    %49 = vector.shape_cast %48 : vector<1x16x32xbf16> to vector<16x32xbf16>
    %cst_44 = arith.constant dense<0.000000e+00> : vector<16x256xf32>
    %50 = tpu.matmul %49, %40, %cst_44 {dimension_numbers = #tpu.dot_dimension_numbers<[1], [0], [0], [1], [0, 0, 1, 1], [], []>} : vector<16x32xbf16>, vector<32x256xbf16>, vector<16x256xf32> -> vector<16x256xf32>
    %51 = arith.truncf %50 : vector<16x256xf32> to vector<16x256xbf16>
    %c1_45 = arith.constant 1 : index
    %c0_46 = arith.constant 0 : index
    %c0_47 = arith.constant 0 : index
    %52 = vector.load %arg5[%c1_45, %c0_46, %c0_47] : memref<4x256x256xbf16, #tpu.memory_space<vmem>>, vector<1x256x256xbf16>
    %53 = vector.shape_cast %52 : vector<1x256x256xbf16> to vector<256x256xbf16>
    %cst_48 = arith.constant dense<0.000000e+00> : vector<16x256xf32>
    %54 = tpu.matmul %51, %53, %cst_48 {dimension_numbers = #tpu.dot_dimension_numbers<[1], [0], [0], [1], [0, 0, 1, 1], [], []>} : vector<16x256xbf16>, vector<256x256xbf16>, vector<16x256xf32> -> vector<16x256xf32>
    %55 = arith.addf %47, %54 : vector<16x256xf32>
    %c2_49 = arith.constant 2 : index
    %c0_50 = arith.constant 0 : index
    %c0_51 = arith.constant 0 : index
    %56 = vector.load %arg4[%c2_49, %c0_50, %c0_51] : memref<4x16x32xbf16, #tpu.memory_space<vmem>>, vector<1x16x32xbf16>
    %57 = vector.shape_cast %56 : vector<1x16x32xbf16> to vector<16x32xbf16>
    %cst_52 = arith.constant dense<0.000000e+00> : vector<16x256xf32>
    %58 = tpu.matmul %57, %40, %cst_52 {dimension_numbers = #tpu.dot_dimension_numbers<[1], [0], [0], [1], [0, 0, 1, 1], [], []>} : vector<16x32xbf16>, vector<32x256xbf16>, vector<16x256xf32> -> vector<16x256xf32>
    %59 = arith.truncf %58 : vector<16x256xf32> to vector<16x256xbf16>
    %c2_53 = arith.constant 2 : index
    %c0_54 = arith.constant 0 : index
    %c0_55 = arith.constant 0 : index
    %60 = vector.load %arg5[%c2_53, %c0_54, %c0_55] : memref<4x256x256xbf16, #tpu.memory_space<vmem>>, vector<1x256x256xbf16>
    %61 = vector.shape_cast %60 : vector<1x256x256xbf16> to vector<256x256xbf16>
    %cst_56 = arith.constant dense<0.000000e+00> : vector<16x256xf32>
    %62 = tpu.matmul %59, %61, %cst_56 {dimension_numbers = #tpu.dot_dimension_numbers<[1], [0], [0], [1], [0, 0, 1, 1], [], []>} : vector<16x256xbf16>, vector<256x256xbf16>, vector<16x256xf32> -> vector<16x256xf32>
    %63 = arith.addf %55, %62 : vector<16x256xf32>
    %c3_57 = arith.constant 3 : index
    %c0_58 = arith.constant 0 : index
    %c0_59 = arith.constant 0 : index
    %64 = vector.load %arg4[%c3_57, %c0_58, %c0_59] : memref<4x16x32xbf16, #tpu.memory_space<vmem>>, vector<1x16x32xbf16>
    %65 = vector.shape_cast %64 : vector<1x16x32xbf16> to vector<16x32xbf16>
    %cst_60 = arith.constant dense<0.000000e+00> : vector<16x256xf32>
    %66 = tpu.matmul %65, %40, %cst_60 {dimension_numbers = #tpu.dot_dimension_numbers<[1], [0], [0], [1], [0, 0, 1, 1], [], []>} : vector<16x32xbf16>, vector<32x256xbf16>, vector<16x256xf32> -> vector<16x256xf32>
    %67 = arith.truncf %66 : vector<16x256xf32> to vector<16x256xbf16>
    %c3_61 = arith.constant 3 : index
    %c0_62 = arith.constant 0 : index
    %c0_63 = arith.constant 0 : index
    %68 = vector.load %arg5[%c3_61, %c0_62, %c0_63] : memref<4x256x256xbf16, #tpu.memory_space<vmem>>, vector<1x256x256xbf16>
    %69 = vector.shape_cast %68 : vector<1x256x256xbf16> to vector<256x256xbf16>
    %cst_64 = arith.constant dense<0.000000e+00> : vector<16x256xf32>
    %70 = tpu.matmul %67, %69, %cst_64 {dimension_numbers = #tpu.dot_dimension_numbers<[1], [0], [0], [1], [0, 0, 1, 1], [], []>} : vector<16x256xbf16>, vector<256x256xbf16>, vector<16x256xf32> -> vector<16x256xf32>
    %71 = arith.addf %63, %70 : vector<16x256xf32>
    %c0_65 = arith.constant 0 : index
    %c0_66 = arith.constant 0 : index
    %72 = vector.load %arg6[%c0_65, %c0_66] : memref<1x32xf32, #tpu.memory_space<vmem>>, vector<1x32xf32>
    %c0_67 = arith.constant 0 : index
    %c0_68 = arith.constant 0 : index
    %73 = vector.load %arg7[%c0_67, %c0_68] : memref<1x32xf32, #tpu.memory_space<vmem>>, vector<1x32xf32>
    %c0_69 = arith.constant 0 : index
    %c0_70 = arith.constant 0 : index
    %74 = vector.load %arg8[%c0_69, %c0_70] : memref<256x32xf32, #tpu.memory_space<vmem>>, vector<256x32xf32>
    %c0_71 = arith.constant 0 : index
    %c0_72 = arith.constant 0 : index
    %75 = vector.load %arg9[%c0_71, %c0_72] : memref<32x256xf32, #tpu.memory_space<vmem>>, vector<32x256xf32>
    %cst_73 = arith.constant 1.000000e+00 : f32
    %76 = vector.broadcast %cst_73 : f32 to vector<1x16xf32>
    %cst_74 = arith.constant dense<0.000000e+00> : vector<1x256xf32>
    %77 = tpu.matmul %76, %71, %cst_74 {dimension_numbers = #tpu.dot_dimension_numbers<[1], [0], [0], [1], [0, 0, 1, 1], [], []>} : vector<1x16xf32>, vector<16x256xf32>, vector<1x256xf32> -> vector<1x256xf32>
    %cst_75 = arith.constant dense<0.000000e+00> : vector<1x32xf32>
    %78 = tpu.matmul %77, %74, %cst_75 {dimension_numbers = #tpu.dot_dimension_numbers<[1], [0], [0], [1], [0, 0, 1, 1], [], []>} : vector<1x256xf32>, vector<256x32xf32>, vector<1x32xf32> -> vector<1x32xf32>
    %cst_76 = arith.constant 7.812500e-03 : f32
    %79 = vector.broadcast %cst_76 : f32 to vector<1x32xf32>
    %80 = arith.mulf %78, %79 : vector<1x32xf32>
    %cst_77 = arith.constant dense<0.000000e+00> : vector<1x256xf32>
    %81 = tpu.matmul %80, %75, %cst_77 {dimension_numbers = #tpu.dot_dimension_numbers<[1], [0], [0], [1], [0, 0, 1, 1], [], []>} : vector<1x32xf32>, vector<32x256xf32>, vector<1x256xf32> -> vector<1x256xf32>
    %82 = vector.broadcast %81 : vector<1x256xf32> to vector<16x256xf32>
    %83 = arith.subf %71, %82 : vector<16x256xf32>
    %84 = arith.mulf %83, %83 : vector<16x256xf32>
    %cst_78 = arith.constant dense<0.000000e+00> : vector<1x256xf32>
    %85 = tpu.matmul %76, %84, %cst_78 {dimension_numbers = #tpu.dot_dimension_numbers<[1], [0], [0], [1], [0, 0, 1, 1], [], []>} : vector<1x16xf32>, vector<16x256xf32>, vector<1x256xf32> -> vector<1x256xf32>
    %cst_79 = arith.constant dense<0.000000e+00> : vector<1x32xf32>
    %86 = tpu.matmul %85, %74, %cst_79 {dimension_numbers = #tpu.dot_dimension_numbers<[1], [0], [0], [1], [0, 0, 1, 1], [], []>} : vector<1x256xf32>, vector<256x32xf32>, vector<1x32xf32> -> vector<1x32xf32>
    %cst_80 = arith.constant 7.812500e-03 : f32
    %87 = vector.broadcast %cst_80 : f32 to vector<1x32xf32>
    %88 = arith.mulf %86, %87 : vector<1x32xf32>
    %cst_81 = arith.constant 0.000000e+00 : f32
    %89 = vector.broadcast %cst_81 : f32 to vector<1x32xf32>
    %90 = arith.maximumf %88, %89 : vector<1x32xf32>
    %cst_82 = arith.constant 9.99999974E-6 : f32
    %91 = vector.broadcast %cst_82 : f32 to vector<1x32xf32>
    %92 = arith.addf %90, %91 : vector<1x32xf32>
    %93 = math.rsqrt %92 : vector<1x32xf32>
    %94 = arith.mulf %72, %93 : vector<1x32xf32>
    %95 = arith.mulf %80, %94 : vector<1x32xf32>
    %96 = arith.subf %73, %95 : vector<1x32xf32>
    %cst_83 = arith.constant dense<0.000000e+00> : vector<1x256xf32>
    %97 = tpu.matmul %94, %75, %cst_83 {dimension_numbers = #tpu.dot_dimension_numbers<[1], [0], [0], [1], [0, 0, 1, 1], [], []>} : vector<1x32xf32>, vector<32x256xf32>, vector<1x256xf32> -> vector<1x256xf32>
    %98 = vector.broadcast %97 : vector<1x256xf32> to vector<16x256xf32>
    %99 = arith.mulf %71, %98 : vector<16x256xf32>
    %cst_84 = arith.constant dense<0.000000e+00> : vector<1x256xf32>
    %100 = tpu.matmul %96, %75, %cst_84 {dimension_numbers = #tpu.dot_dimension_numbers<[1], [0], [0], [1], [0, 0, 1, 1], [], []>} : vector<1x32xf32>, vector<32x256xf32>, vector<1x256xf32> -> vector<1x256xf32>
    %101 = vector.broadcast %100 : vector<1x256xf32> to vector<16x256xf32>
    %102 = arith.addf %99, %101 : vector<16x256xf32>
    %cst_85 = arith.constant 0.000000e+00 : f32
    %103 = vector.broadcast %cst_85 : f32 to vector<16x256xf32>
    %104 = arith.cmpf ogt, %102, %103 : vector<16x256xf32>
    %cst_86 = arith.constant 2.000000e-01 : f32
    %105 = vector.broadcast %cst_86 : f32 to vector<16x256xf32>
    %106 = arith.mulf %105, %102 : vector<16x256xf32>
    %107 = arith.select %104, %102, %106 : vector<16x256xi1>, vector<16x256xf32>
    %108 = arith.truncf %107 : vector<16x256xf32> to vector<16x256xbf16>
    %c0_87 = arith.constant 0 : index
    %c0_88 = arith.constant 0 : index
    %c0_89 = arith.constant 0 : index
    %109 = vector.load %arg10[%c0_87, %c0_88, %c0_89] : memref<4x8x16xbf16, #tpu.memory_space<vmem>>, vector<1x8x16xbf16>
    %110 = vector.shape_cast %109 : vector<1x8x16xbf16> to vector<8x16xbf16>
    %cst_90 = arith.constant dense<0.000000e+00> : vector<8x256xf32>
    %111 = tpu.matmul %110, %108, %cst_90 {dimension_numbers = #tpu.dot_dimension_numbers<[1], [0], [0], [1], [0, 0, 1, 1], [], []>} : vector<8x16xbf16>, vector<16x256xbf16>, vector<8x256xf32> -> vector<8x256xf32>
    %112 = arith.truncf %111 : vector<8x256xf32> to vector<8x256xbf16>
    %c0_91 = arith.constant 0 : index
    %c0_92 = arith.constant 0 : index
    %c0_93 = arith.constant 0 : index
    %113 = vector.load %arg11[%c0_91, %c0_92, %c0_93] : memref<4x256x256xbf16, #tpu.memory_space<vmem>>, vector<1x256x256xbf16>
    %114 = vector.shape_cast %113 : vector<1x256x256xbf16> to vector<256x256xbf16>
    %cst_94 = arith.constant dense<0.000000e+00> : vector<8x256xf32>
    %115 = tpu.matmul %112, %114, %cst_94 {dimension_numbers = #tpu.dot_dimension_numbers<[1], [0], [0], [1], [0, 0, 1, 1], [], []>} : vector<8x256xbf16>, vector<256x256xbf16>, vector<8x256xf32> -> vector<8x256xf32>
    %c1_95 = arith.constant 1 : index
    %c0_96 = arith.constant 0 : index
    %c0_97 = arith.constant 0 : index
    %116 = vector.load %arg10[%c1_95, %c0_96, %c0_97] : memref<4x8x16xbf16, #tpu.memory_space<vmem>>, vector<1x8x16xbf16>
    %117 = vector.shape_cast %116 : vector<1x8x16xbf16> to vector<8x16xbf16>
    %cst_98 = arith.constant dense<0.000000e+00> : vector<8x256xf32>
    %118 = tpu.matmul %117, %108, %cst_98 {dimension_numbers = #tpu.dot_dimension_numbers<[1], [0], [0], [1], [0, 0, 1, 1], [], []>} : vector<8x16xbf16>, vector<16x256xbf16>, vector<8x256xf32> -> vector<8x256xf32>
    %119 = arith.truncf %118 : vector<8x256xf32> to vector<8x256xbf16>
    %c1_99 = arith.constant 1 : index
    %c0_100 = arith.constant 0 : index
    %c0_101 = arith.constant 0 : index
    %120 = vector.load %arg11[%c1_99, %c0_100, %c0_101] : memref<4x256x256xbf16, #tpu.memory_space<vmem>>, vector<1x256x256xbf16>
    %121 = vector.shape_cast %120 : vector<1x256x256xbf16> to vector<256x256xbf16>
    %cst_102 = arith.constant dense<0.000000e+00> : vector<8x256xf32>
    %122 = tpu.matmul %119, %121, %cst_102 {dimension_numbers = #tpu.dot_dimension_numbers<[1], [0], [0], [1], [0, 0, 1, 1], [], []>} : vector<8x256xbf16>, vector<256x256xbf16>, vector<8x256xf32> -> vector<8x256xf32>
    %123 = arith.addf %115, %122 : vector<8x256xf32>
    %c2_103 = arith.constant 2 : index
    %c0_104 = arith.constant 0 : index
    %c0_105 = arith.constant 0 : index
    %124 = vector.load %arg10[%c2_103, %c0_104, %c0_105] : memref<4x8x16xbf16, #tpu.memory_space<vmem>>, vector<1x8x16xbf16>
    %125 = vector.shape_cast %124 : vector<1x8x16xbf16> to vector<8x16xbf16>
    %cst_106 = arith.constant dense<0.000000e+00> : vector<8x256xf32>
    %126 = tpu.matmul %125, %108, %cst_106 {dimension_numbers = #tpu.dot_dimension_numbers<[1], [0], [0], [1], [0, 0, 1, 1], [], []>} : vector<8x16xbf16>, vector<16x256xbf16>, vector<8x256xf32> -> vector<8x256xf32>
    %127 = arith.truncf %126 : vector<8x256xf32> to vector<8x256xbf16>
    %c2_107 = arith.constant 2 : index
    %c0_108 = arith.constant 0 : index
    %c0_109 = arith.constant 0 : index
    %128 = vector.load %arg11[%c2_107, %c0_108, %c0_109] : memref<4x256x256xbf16, #tpu.memory_space<vmem>>, vector<1x256x256xbf16>
    %129 = vector.shape_cast %128 : vector<1x256x256xbf16> to vector<256x256xbf16>
    %cst_110 = arith.constant dense<0.000000e+00> : vector<8x256xf32>
    %130 = tpu.matmul %127, %129, %cst_110 {dimension_numbers = #tpu.dot_dimension_numbers<[1], [0], [0], [1], [0, 0, 1, 1], [], []>} : vector<8x256xbf16>, vector<256x256xbf16>, vector<8x256xf32> -> vector<8x256xf32>
    %131 = arith.addf %123, %130 : vector<8x256xf32>
    %c3_111 = arith.constant 3 : index
    %c0_112 = arith.constant 0 : index
    %c0_113 = arith.constant 0 : index
    %132 = vector.load %arg10[%c3_111, %c0_112, %c0_113] : memref<4x8x16xbf16, #tpu.memory_space<vmem>>, vector<1x8x16xbf16>
    %133 = vector.shape_cast %132 : vector<1x8x16xbf16> to vector<8x16xbf16>
    %cst_114 = arith.constant dense<0.000000e+00> : vector<8x256xf32>
    %134 = tpu.matmul %133, %108, %cst_114 {dimension_numbers = #tpu.dot_dimension_numbers<[1], [0], [0], [1], [0, 0, 1, 1], [], []>} : vector<8x16xbf16>, vector<16x256xbf16>, vector<8x256xf32> -> vector<8x256xf32>
    %135 = arith.truncf %134 : vector<8x256xf32> to vector<8x256xbf16>
    %c3_115 = arith.constant 3 : index
    %c0_116 = arith.constant 0 : index
    %c0_117 = arith.constant 0 : index
    %136 = vector.load %arg11[%c3_115, %c0_116, %c0_117] : memref<4x256x256xbf16, #tpu.memory_space<vmem>>, vector<1x256x256xbf16>
    %137 = vector.shape_cast %136 : vector<1x256x256xbf16> to vector<256x256xbf16>
    %cst_118 = arith.constant dense<0.000000e+00> : vector<8x256xf32>
    %138 = tpu.matmul %135, %137, %cst_118 {dimension_numbers = #tpu.dot_dimension_numbers<[1], [0], [0], [1], [0, 0, 1, 1], [], []>} : vector<8x256xbf16>, vector<256x256xbf16>, vector<8x256xf32> -> vector<8x256xf32>
    %139 = arith.addf %131, %138 : vector<8x256xf32>
    %c0_119 = arith.constant 0 : index
    %c0_120 = arith.constant 0 : index
    %140 = vector.load %arg12[%c0_119, %c0_120] : memref<1x64xf32, #tpu.memory_space<vmem>>, vector<1x64xf32>
    %c0_121 = arith.constant 0 : index
    %c0_122 = arith.constant 0 : index
    %141 = vector.load %arg13[%c0_121, %c0_122] : memref<1x64xf32, #tpu.memory_space<vmem>>, vector<1x64xf32>
    %c0_123 = arith.constant 0 : index
    %c0_124 = arith.constant 0 : index
    %142 = vector.load %arg14[%c0_123, %c0_124] : memref<256x64xf32, #tpu.memory_space<vmem>>, vector<256x64xf32>
    %c0_125 = arith.constant 0 : index
    %c0_126 = arith.constant 0 : index
    %143 = vector.load %arg15[%c0_125, %c0_126] : memref<64x256xf32, #tpu.memory_space<vmem>>, vector<64x256xf32>
    %cst_127 = arith.constant 1.000000e+00 : f32
    %144 = vector.broadcast %cst_127 : f32 to vector<1x8xf32>
    %cst_128 = arith.constant dense<0.000000e+00> : vector<1x256xf32>
    %145 = tpu.matmul %144, %139, %cst_128 {dimension_numbers = #tpu.dot_dimension_numbers<[1], [0], [0], [1], [0, 0, 1, 1], [], []>} : vector<1x8xf32>, vector<8x256xf32>, vector<1x256xf32> -> vector<1x256xf32>
    %cst_129 = arith.constant dense<0.000000e+00> : vector<1x64xf32>
    %146 = tpu.matmul %145, %142, %cst_129 {dimension_numbers = #tpu.dot_dimension_numbers<[1], [0], [0], [1], [0, 0, 1, 1], [], []>} : vector<1x256xf32>, vector<256x64xf32>, vector<1x64xf32> -> vector<1x64xf32>
    %cst_130 = arith.constant 3.125000e-02 : f32
    %147 = vector.broadcast %cst_130 : f32 to vector<1x64xf32>
    %148 = arith.mulf %146, %147 : vector<1x64xf32>
    %cst_131 = arith.constant dense<0.000000e+00> : vector<1x256xf32>
    %149 = tpu.matmul %148, %143, %cst_131 {dimension_numbers = #tpu.dot_dimension_numbers<[1], [0], [0], [1], [0, 0, 1, 1], [], []>} : vector<1x64xf32>, vector<64x256xf32>, vector<1x256xf32> -> vector<1x256xf32>
    %150 = vector.broadcast %149 : vector<1x256xf32> to vector<8x256xf32>
    %151 = arith.subf %139, %150 : vector<8x256xf32>
    %152 = arith.mulf %151, %151 : vector<8x256xf32>
    %cst_132 = arith.constant dense<0.000000e+00> : vector<1x256xf32>
    %153 = tpu.matmul %144, %152, %cst_132 {dimension_numbers = #tpu.dot_dimension_numbers<[1], [0], [0], [1], [0, 0, 1, 1], [], []>} : vector<1x8xf32>, vector<8x256xf32>, vector<1x256xf32> -> vector<1x256xf32>
    %cst_133 = arith.constant dense<0.000000e+00> : vector<1x64xf32>
    %154 = tpu.matmul %153, %142, %cst_133 {dimension_numbers = #tpu.dot_dimension_numbers<[1], [0], [0], [1], [0, 0, 1, 1], [], []>} : vector<1x256xf32>, vector<256x64xf32>, vector<1x64xf32> -> vector<1x64xf32>
    %cst_134 = arith.constant 3.125000e-02 : f32
    %155 = vector.broadcast %cst_134 : f32 to vector<1x64xf32>
    %156 = arith.mulf %154, %155 : vector<1x64xf32>
    %cst_135 = arith.constant 0.000000e+00 : f32
    %157 = vector.broadcast %cst_135 : f32 to vector<1x64xf32>
    %158 = arith.maximumf %156, %157 : vector<1x64xf32>
    %cst_136 = arith.constant 9.99999974E-6 : f32
    %159 = vector.broadcast %cst_136 : f32 to vector<1x64xf32>
    %160 = arith.addf %158, %159 : vector<1x64xf32>
    %161 = math.rsqrt %160 : vector<1x64xf32>
    %162 = arith.mulf %140, %161 : vector<1x64xf32>
    %163 = arith.mulf %148, %162 : vector<1x64xf32>
    %164 = arith.subf %141, %163 : vector<1x64xf32>
    %cst_137 = arith.constant dense<0.000000e+00> : vector<1x256xf32>
    %165 = tpu.matmul %162, %143, %cst_137 {dimension_numbers = #tpu.dot_dimension_numbers<[1], [0], [0], [1], [0, 0, 1, 1], [], []>} : vector<1x64xf32>, vector<64x256xf32>, vector<1x256xf32> -> vector<1x256xf32>
    %166 = vector.broadcast %165 : vector<1x256xf32> to vector<8x256xf32>
    %167 = arith.mulf %139, %166 : vector<8x256xf32>
    %cst_138 = arith.constant dense<0.000000e+00> : vector<1x256xf32>
    %168 = tpu.matmul %164, %143, %cst_138 {dimension_numbers = #tpu.dot_dimension_numbers<[1], [0], [0], [1], [0, 0, 1, 1], [], []>} : vector<1x64xf32>, vector<64x256xf32>, vector<1x256xf32> -> vector<1x256xf32>
    %169 = vector.broadcast %168 : vector<1x256xf32> to vector<8x256xf32>
    %170 = arith.addf %167, %169 : vector<8x256xf32>
    %cst_139 = arith.constant 0.000000e+00 : f32
    %171 = vector.broadcast %cst_139 : f32 to vector<8x256xf32>
    %172 = arith.cmpf ogt, %170, %171 : vector<8x256xf32>
    %cst_140 = arith.constant 2.000000e-01 : f32
    %173 = vector.broadcast %cst_140 : f32 to vector<8x256xf32>
    %174 = arith.mulf %173, %170 : vector<8x256xf32>
    %175 = arith.select %172, %170, %174 : vector<8x256xi1>, vector<8x256xf32>
    %176 = arith.truncf %175 : vector<8x256xf32> to vector<8x256xbf16>
    %c0_141 = arith.constant 0 : index
    %c0_142 = arith.constant 0 : index
    %c0_143 = arith.constant 0 : index
    %177 = vector.load %arg16[%c0_141, %c0_142, %c0_143] : memref<4x6x8xbf16, #tpu.memory_space<vmem>>, vector<1x6x8xbf16>
    %178 = vector.shape_cast %177 : vector<1x6x8xbf16> to vector<6x8xbf16>
    %cst_144 = arith.constant dense<0.000000e+00> : vector<6x256xf32>
    %179 = tpu.matmul %178, %176, %cst_144 {dimension_numbers = #tpu.dot_dimension_numbers<[1], [0], [0], [1], [0, 0, 1, 1], [], []>} : vector<6x8xbf16>, vector<8x256xbf16>, vector<6x256xf32> -> vector<6x256xf32>
    %180 = arith.truncf %179 : vector<6x256xf32> to vector<6x256xbf16>
    %c0_145 = arith.constant 0 : index
    %c0_146 = arith.constant 0 : index
    %c0_147 = arith.constant 0 : index
    %181 = vector.load %arg17[%c0_145, %c0_146, %c0_147] : memref<4x256x384xbf16, #tpu.memory_space<vmem>>, vector<1x256x384xbf16>
    %182 = vector.shape_cast %181 : vector<1x256x384xbf16> to vector<256x384xbf16>
    %cst_148 = arith.constant dense<0.000000e+00> : vector<6x384xf32>
    %183 = tpu.matmul %180, %182, %cst_148 {dimension_numbers = #tpu.dot_dimension_numbers<[1], [0], [0], [1], [0, 0, 1, 1], [], []>} : vector<6x256xbf16>, vector<256x384xbf16>, vector<6x384xf32> -> vector<6x384xf32>
    %c1_149 = arith.constant 1 : index
    %c0_150 = arith.constant 0 : index
    %c0_151 = arith.constant 0 : index
    %184 = vector.load %arg16[%c1_149, %c0_150, %c0_151] : memref<4x6x8xbf16, #tpu.memory_space<vmem>>, vector<1x6x8xbf16>
    %185 = vector.shape_cast %184 : vector<1x6x8xbf16> to vector<6x8xbf16>
    %cst_152 = arith.constant dense<0.000000e+00> : vector<6x256xf32>
    %186 = tpu.matmul %185, %176, %cst_152 {dimension_numbers = #tpu.dot_dimension_numbers<[1], [0], [0], [1], [0, 0, 1, 1], [], []>} : vector<6x8xbf16>, vector<8x256xbf16>, vector<6x256xf32> -> vector<6x256xf32>
    %187 = arith.truncf %186 : vector<6x256xf32> to vector<6x256xbf16>
    %c1_153 = arith.constant 1 : index
    %c0_154 = arith.constant 0 : index
    %c0_155 = arith.constant 0 : index
    %188 = vector.load %arg17[%c1_153, %c0_154, %c0_155] : memref<4x256x384xbf16, #tpu.memory_space<vmem>>, vector<1x256x384xbf16>
    %189 = vector.shape_cast %188 : vector<1x256x384xbf16> to vector<256x384xbf16>
    %cst_156 = arith.constant dense<0.000000e+00> : vector<6x384xf32>
    %190 = tpu.matmul %187, %189, %cst_156 {dimension_numbers = #tpu.dot_dimension_numbers<[1], [0], [0], [1], [0, 0, 1, 1], [], []>} : vector<6x256xbf16>, vector<256x384xbf16>, vector<6x384xf32> -> vector<6x384xf32>
    %191 = arith.addf %183, %190 : vector<6x384xf32>
    %c2_157 = arith.constant 2 : index
    %c0_158 = arith.constant 0 : index
    %c0_159 = arith.constant 0 : index
    %192 = vector.load %arg16[%c2_157, %c0_158, %c0_159] : memref<4x6x8xbf16, #tpu.memory_space<vmem>>, vector<1x6x8xbf16>
    %193 = vector.shape_cast %192 : vector<1x6x8xbf16> to vector<6x8xbf16>
    %cst_160 = arith.constant dense<0.000000e+00> : vector<6x256xf32>
    %194 = tpu.matmul %193, %176, %cst_160 {dimension_numbers = #tpu.dot_dimension_numbers<[1], [0], [0], [1], [0, 0, 1, 1], [], []>} : vector<6x8xbf16>, vector<8x256xbf16>, vector<6x256xf32> -> vector<6x256xf32>
    %195 = arith.truncf %194 : vector<6x256xf32> to vector<6x256xbf16>
    %c2_161 = arith.constant 2 : index
    %c0_162 = arith.constant 0 : index
    %c0_163 = arith.constant 0 : index
    %196 = vector.load %arg17[%c2_161, %c0_162, %c0_163] : memref<4x256x384xbf16, #tpu.memory_space<vmem>>, vector<1x256x384xbf16>
    %197 = vector.shape_cast %196 : vector<1x256x384xbf16> to vector<256x384xbf16>
    %cst_164 = arith.constant dense<0.000000e+00> : vector<6x384xf32>
    %198 = tpu.matmul %195, %197, %cst_164 {dimension_numbers = #tpu.dot_dimension_numbers<[1], [0], [0], [1], [0, 0, 1, 1], [], []>} : vector<6x256xbf16>, vector<256x384xbf16>, vector<6x384xf32> -> vector<6x384xf32>
    %199 = arith.addf %191, %198 : vector<6x384xf32>
    %c3_165 = arith.constant 3 : index
    %c0_166 = arith.constant 0 : index
    %c0_167 = arith.constant 0 : index
    %200 = vector.load %arg16[%c3_165, %c0_166, %c0_167] : memref<4x6x8xbf16, #tpu.memory_space<vmem>>, vector<1x6x8xbf16>
    %201 = vector.shape_cast %200 : vector<1x6x8xbf16> to vector<6x8xbf16>
    %cst_168 = arith.constant dense<0.000000e+00> : vector<6x256xf32>
    %202 = tpu.matmul %201, %176, %cst_168 {dimension_numbers = #tpu.dot_dimension_numbers<[1], [0], [0], [1], [0, 0, 1, 1], [], []>} : vector<6x8xbf16>, vector<8x256xbf16>, vector<6x256xf32> -> vector<6x256xf32>
    %203 = arith.truncf %202 : vector<6x256xf32> to vector<6x256xbf16>
    %c3_169 = arith.constant 3 : index
    %c0_170 = arith.constant 0 : index
    %c0_171 = arith.constant 0 : index
    %204 = vector.load %arg17[%c3_169, %c0_170, %c0_171] : memref<4x256x384xbf16, #tpu.memory_space<vmem>>, vector<1x256x384xbf16>
    %205 = vector.shape_cast %204 : vector<1x256x384xbf16> to vector<256x384xbf16>
    %cst_172 = arith.constant dense<0.000000e+00> : vector<6x384xf32>
    %206 = tpu.matmul %203, %205, %cst_172 {dimension_numbers = #tpu.dot_dimension_numbers<[1], [0], [0], [1], [0, 0, 1, 1], [], []>} : vector<6x256xbf16>, vector<256x384xbf16>, vector<6x384xf32> -> vector<6x384xf32>
    %207 = arith.addf %199, %206 : vector<6x384xf32>
    %c0_173 = arith.constant 0 : index
    %c0_174 = arith.constant 0 : index
    %208 = vector.load %arg18[%c0_173, %c0_174] : memref<1x128xf32, #tpu.memory_space<vmem>>, vector<1x128xf32>
    %c0_175 = arith.constant 0 : index
    %c0_176 = arith.constant 0 : index
    %209 = vector.load %arg19[%c0_175, %c0_176] : memref<1x128xf32, #tpu.memory_space<vmem>>, vector<1x128xf32>
    %c0_177 = arith.constant 0 : index
    %c0_178 = arith.constant 0 : index
    %210 = vector.load %arg20[%c0_177, %c0_178] : memref<384x128xf32, #tpu.memory_space<vmem>>, vector<384x128xf32>
    %c0_179 = arith.constant 0 : index
    %c0_180 = arith.constant 0 : index
    %211 = vector.load %arg21[%c0_179, %c0_180] : memref<128x384xf32, #tpu.memory_space<vmem>>, vector<128x384xf32>
    %cst_181 = arith.constant 1.000000e+00 : f32
    %212 = vector.broadcast %cst_181 : f32 to vector<1x6xf32>
    %cst_182 = arith.constant dense<0.000000e+00> : vector<1x384xf32>
    %213 = tpu.matmul %212, %207, %cst_182 {dimension_numbers = #tpu.dot_dimension_numbers<[1], [0], [0], [1], [0, 0, 1, 1], [], []>} : vector<1x6xf32>, vector<6x384xf32>, vector<1x384xf32> -> vector<1x384xf32>
    %cst_183 = arith.constant dense<0.000000e+00> : vector<1x128xf32>
    %214 = tpu.matmul %213, %210, %cst_183 {dimension_numbers = #tpu.dot_dimension_numbers<[1], [0], [0], [1], [0, 0, 1, 1], [], []>} : vector<1x384xf32>, vector<384x128xf32>, vector<1x128xf32> -> vector<1x128xf32>
    %cst_184 = arith.constant 0.055555556 : f32
    %215 = vector.broadcast %cst_184 : f32 to vector<1x128xf32>
    %216 = arith.mulf %214, %215 : vector<1x128xf32>
    %cst_185 = arith.constant dense<0.000000e+00> : vector<1x384xf32>
    %217 = tpu.matmul %216, %211, %cst_185 {dimension_numbers = #tpu.dot_dimension_numbers<[1], [0], [0], [1], [0, 0, 1, 1], [], []>} : vector<1x128xf32>, vector<128x384xf32>, vector<1x384xf32> -> vector<1x384xf32>
    %218 = vector.broadcast %217 : vector<1x384xf32> to vector<6x384xf32>
    %219 = arith.subf %207, %218 : vector<6x384xf32>
    %220 = arith.mulf %219, %219 : vector<6x384xf32>
    %cst_186 = arith.constant dense<0.000000e+00> : vector<1x384xf32>
    %221 = tpu.matmul %212, %220, %cst_186 {dimension_numbers = #tpu.dot_dimension_numbers<[1], [0], [0], [1], [0, 0, 1, 1], [], []>} : vector<1x6xf32>, vector<6x384xf32>, vector<1x384xf32> -> vector<1x384xf32>
    %cst_187 = arith.constant dense<0.000000e+00> : vector<1x128xf32>
    %222 = tpu.matmul %221, %210, %cst_187 {dimension_numbers = #tpu.dot_dimension_numbers<[1], [0], [0], [1], [0, 0, 1, 1], [], []>} : vector<1x384xf32>, vector<384x128xf32>, vector<1x128xf32> -> vector<1x128xf32>
    %cst_188 = arith.constant 0.055555556 : f32
    %223 = vector.broadcast %cst_188 : f32 to vector<1x128xf32>
    %224 = arith.mulf %222, %223 : vector<1x128xf32>
    %cst_189 = arith.constant 0.000000e+00 : f32
    %225 = vector.broadcast %cst_189 : f32 to vector<1x128xf32>
    %226 = arith.maximumf %224, %225 : vector<1x128xf32>
    %cst_190 = arith.constant 9.99999974E-6 : f32
    %227 = vector.broadcast %cst_190 : f32 to vector<1x128xf32>
    %228 = arith.addf %226, %227 : vector<1x128xf32>
    %229 = math.rsqrt %228 : vector<1x128xf32>
    %230 = arith.mulf %208, %229 : vector<1x128xf32>
    %231 = arith.mulf %216, %230 : vector<1x128xf32>
    %232 = arith.subf %209, %231 : vector<1x128xf32>
    %cst_191 = arith.constant dense<0.000000e+00> : vector<1x384xf32>
    %233 = tpu.matmul %230, %211, %cst_191 {dimension_numbers = #tpu.dot_dimension_numbers<[1], [0], [0], [1], [0, 0, 1, 1], [], []>} : vector<1x128xf32>, vector<128x384xf32>, vector<1x384xf32> -> vector<1x384xf32>
    %234 = vector.broadcast %233 : vector<1x384xf32> to vector<6x384xf32>
    %235 = arith.mulf %207, %234 : vector<6x384xf32>
    %cst_192 = arith.constant dense<0.000000e+00> : vector<1x384xf32>
    %236 = tpu.matmul %232, %211, %cst_192 {dimension_numbers = #tpu.dot_dimension_numbers<[1], [0], [0], [1], [0, 0, 1, 1], [], []>} : vector<1x128xf32>, vector<128x384xf32>, vector<1x384xf32> -> vector<1x384xf32>
    %237 = vector.broadcast %236 : vector<1x384xf32> to vector<6x384xf32>
    %238 = arith.addf %235, %237 : vector<6x384xf32>
    %cst_193 = arith.constant 0.000000e+00 : f32
    %239 = vector.broadcast %cst_193 : f32 to vector<6x384xf32>
    %240 = arith.cmpf ogt, %238, %239 : vector<6x384xf32>
    %cst_194 = arith.constant 2.000000e-01 : f32
    %241 = vector.broadcast %cst_194 : f32 to vector<6x384xf32>
    %242 = arith.mulf %241, %238 : vector<6x384xf32>
    %243 = arith.select %240, %238, %242 : vector<6x384xi1>, vector<6x384xf32>
    %244 = arith.truncf %243 : vector<6x384xf32> to vector<6x384xbf16>
    %c0_195 = arith.constant 0 : index
    %c0_196 = arith.constant 0 : index
    %c0_197 = arith.constant 0 : index
    %245 = vector.load %arg22[%c0_195, %c0_196, %c0_197] : memref<4x4x6xbf16, #tpu.memory_space<vmem>>, vector<1x4x6xbf16>
    %246 = vector.shape_cast %245 : vector<1x4x6xbf16> to vector<4x6xbf16>
    %cst_198 = arith.constant dense<0.000000e+00> : vector<4x384xf32>
    %247 = tpu.matmul %246, %244, %cst_198 {dimension_numbers = #tpu.dot_dimension_numbers<[1], [0], [0], [1], [0, 0, 1, 1], [], []>} : vector<4x6xbf16>, vector<6x384xbf16>, vector<4x384xf32> -> vector<4x384xf32>
    %248 = arith.truncf %247 : vector<4x384xf32> to vector<4x384xbf16>
    %c0_199 = arith.constant 0 : index
    %c0_200 = arith.constant 0 : index
    %c0_201 = arith.constant 0 : index
    %249 = vector.load %arg23[%c0_199, %c0_200, %c0_201] : memref<4x384x2xbf16, #tpu.memory_space<vmem>>, vector<1x384x2xbf16>
    %250 = vector.shape_cast %249 : vector<1x384x2xbf16> to vector<384x2xbf16>
    %cst_202 = arith.constant dense<0.000000e+00> : vector<4x2xf32>
    %251 = tpu.matmul %248, %250, %cst_202 {dimension_numbers = #tpu.dot_dimension_numbers<[1], [0], [0], [1], [0, 0, 1, 1], [], []>} : vector<4x384xbf16>, vector<384x2xbf16>, vector<4x2xf32> -> vector<4x2xf32>
    %c1_203 = arith.constant 1 : index
    %c0_204 = arith.constant 0 : index
    %c0_205 = arith.constant 0 : index
    %252 = vector.load %arg22[%c1_203, %c0_204, %c0_205] : memref<4x4x6xbf16, #tpu.memory_space<vmem>>, vector<1x4x6xbf16>
    %253 = vector.shape_cast %252 : vector<1x4x6xbf16> to vector<4x6xbf16>
    %cst_206 = arith.constant dense<0.000000e+00> : vector<4x384xf32>
    %254 = tpu.matmul %253, %244, %cst_206 {dimension_numbers = #tpu.dot_dimension_numbers<[1], [0], [0], [1], [0, 0, 1, 1], [], []>} : vector<4x6xbf16>, vector<6x384xbf16>, vector<4x384xf32> -> vector<4x384xf32>
    %255 = arith.truncf %254 : vector<4x384xf32> to vector<4x384xbf16>
    %c1_207 = arith.constant 1 : index
    %c0_208 = arith.constant 0 : index
    %c0_209 = arith.constant 0 : index
    %256 = vector.load %arg23[%c1_207, %c0_208, %c0_209] : memref<4x384x2xbf16, #tpu.memory_space<vmem>>, vector<1x384x2xbf16>
    %257 = vector.shape_cast %256 : vector<1x384x2xbf16> to vector<384x2xbf16>
    %cst_210 = arith.constant dense<0.000000e+00> : vector<4x2xf32>
    %258 = tpu.matmul %255, %257, %cst_210 {dimension_numbers = #tpu.dot_dimension_numbers<[1], [0], [0], [1], [0, 0, 1, 1], [], []>} : vector<4x384xbf16>, vector<384x2xbf16>, vector<4x2xf32> -> vector<4x2xf32>
    %259 = arith.addf %251, %258 : vector<4x2xf32>
    %c2_211 = arith.constant 2 : index
    %c0_212 = arith.constant 0 : index
    %c0_213 = arith.constant 0 : index
    %260 = vector.load %arg22[%c2_211, %c0_212, %c0_213] : memref<4x4x6xbf16, #tpu.memory_space<vmem>>, vector<1x4x6xbf16>
    %261 = vector.shape_cast %260 : vector<1x4x6xbf16> to vector<4x6xbf16>
    %cst_214 = arith.constant dense<0.000000e+00> : vector<4x384xf32>
    %262 = tpu.matmul %261, %244, %cst_214 {dimension_numbers = #tpu.dot_dimension_numbers<[1], [0], [0], [1], [0, 0, 1, 1], [], []>} : vector<4x6xbf16>, vector<6x384xbf16>, vector<4x384xf32> -> vector<4x384xf32>
    %263 = arith.truncf %262 : vector<4x384xf32> to vector<4x384xbf16>
    %c2_215 = arith.constant 2 : index
    %c0_216 = arith.constant 0 : index
    %c0_217 = arith.constant 0 : index
    %264 = vector.load %arg23[%c2_215, %c0_216, %c0_217] : memref<4x384x2xbf16, #tpu.memory_space<vmem>>, vector<1x384x2xbf16>
    %265 = vector.shape_cast %264 : vector<1x384x2xbf16> to vector<384x2xbf16>
    %cst_218 = arith.constant dense<0.000000e+00> : vector<4x2xf32>
    %266 = tpu.matmul %263, %265, %cst_218 {dimension_numbers = #tpu.dot_dimension_numbers<[1], [0], [0], [1], [0, 0, 1, 1], [], []>} : vector<4x384xbf16>, vector<384x2xbf16>, vector<4x2xf32> -> vector<4x2xf32>
    %267 = arith.addf %259, %266 : vector<4x2xf32>
    %c3_219 = arith.constant 3 : index
    %c0_220 = arith.constant 0 : index
    %c0_221 = arith.constant 0 : index
    %268 = vector.load %arg22[%c3_219, %c0_220, %c0_221] : memref<4x4x6xbf16, #tpu.memory_space<vmem>>, vector<1x4x6xbf16>
    %269 = vector.shape_cast %268 : vector<1x4x6xbf16> to vector<4x6xbf16>
    %cst_222 = arith.constant dense<0.000000e+00> : vector<4x384xf32>
    %270 = tpu.matmul %269, %244, %cst_222 {dimension_numbers = #tpu.dot_dimension_numbers<[1], [0], [0], [1], [0, 0, 1, 1], [], []>} : vector<4x6xbf16>, vector<6x384xbf16>, vector<4x384xf32> -> vector<4x384xf32>
    %271 = arith.truncf %270 : vector<4x384xf32> to vector<4x384xbf16>
    %c3_223 = arith.constant 3 : index
    %c0_224 = arith.constant 0 : index
    %c0_225 = arith.constant 0 : index
    %272 = vector.load %arg23[%c3_223, %c0_224, %c0_225] : memref<4x384x2xbf16, #tpu.memory_space<vmem>>, vector<1x384x2xbf16>
    %273 = vector.shape_cast %272 : vector<1x384x2xbf16> to vector<384x2xbf16>
    %cst_226 = arith.constant dense<0.000000e+00> : vector<4x2xf32>
    %274 = tpu.matmul %271, %273, %cst_226 {dimension_numbers = #tpu.dot_dimension_numbers<[1], [0], [0], [1], [0, 0, 1, 1], [], []>} : vector<4x384xbf16>, vector<384x2xbf16>, vector<4x2xf32> -> vector<4x2xf32>
    %275 = arith.addf %267, %274 : vector<4x2xf32>
    %c0_227 = arith.constant 0 : index
    %c0_228 = arith.constant 0 : index
    %276 = vector.load %arg24[%c0_227, %c0_228] : memref<1x2xf32, #tpu.memory_space<vmem>>, vector<1x2xf32>
    %277 = vector.broadcast %276 : vector<1x2xf32> to vector<4x2xf32>
    %278 = arith.addf %275, %277 : vector<4x2xf32>
    %c0_229 = arith.constant 0 : index
    %c0_230 = arith.constant 0 : index
    %279 = vector.load %arg25[%c0_229, %c0_230] : memref<4x2xf32, #tpu.memory_space<vmem>>, vector<4x2xf32>
    tpu.vector_store %arg25[%c0_229, %c0_230], %278 {strides = array<i32>} : memref<4x2xf32, #tpu.memory_space<vmem>>, vector<4x2xf32>,
    return
  }
}

</mosaic_0001>

<bundles_post_ra>
// kernel: forward.1
= control target key start
LH: loop header
LB: loop body
LE: loop exit
PB: predicated region body
PF: predicated region fallthrough
CT: control target
= control target key end

     0   :  { %s15947_s0 = inlined_call_operand.vmem [shape: bf16[64,96], index: 0, kind: input, shape index: {}]   ;;  %s15948_s1 = inlined_call_operand.vmem [shape: bf16[4,32,64], index: 1, kind: input, shape index: {}]   ;;  %s15949_s2 = inlined_call_operand.vmem [shape: bf16[4,96,256], index: 2, kind: input, shape index: {}]   ;;  %s15950_s3 = inlined_call_operand.vmem [shape: f32[1,256], index: 3, kind: input, shape index: {}]   ;;  %s15951_s4 = inlined_call_operand.vmem [shape: bf16[4,16,32], index: 4, kind: input, shape index: {}]   ;;  %s15952_s5 = inlined_call_operand.vmem [shape: bf16[4,256,256], index: 5, kind: input, shape index: {}]   ;;  %s15953_s6 = inlined_call_operand.vmem [shape: f32[1,32], index: 6, kind: input, shape index: {}]   ;;  %s15954_s7 = inlined_call_operand.vmem [shape: f32[1,32], index: 7, kind: input, shape index: {}]   ;;  %s15955_s8 = inlined_call_operand.vmem [shape: f32[256,32], index: 8, kind: input, shape index: {}]   ;;  %s15956_s9 = inlined_call_operand.vmem [shape: f32[32,256], index: 9, kind: input, shape index: {}]   ;;  %s15957_s10 = inlined_call_operand.vmem [shape: bf16[4,8,16], index: 10, kind: input, shape index: {}]   ;;  %s15958_s11 = inlined_call_operand.vmem [shape: bf16[4,256,256], index: 11, kind: input, shape index: {}]   ;;  %s15959_s12 = inlined_call_operand.vmem [shape: f32[1,64], index: 12, kind: input, shape index: {}]   ;;  %s15960_s13 = inlined_call_operand.vmem [shape: f32[1,64], index: 13, kind: input, shape index: {}]   ;;  %s15961_s14 = inlined_call_operand.vmem [shape: f32[256,64], index: 14, kind: input, shape index: {}]   ;;  %s15962_s15 = inlined_call_operand.vmem [shape: f32[64,256], index: 15, kind: input, shape index: {}]   ;;  %s15963_s16 = inlined_call_operand.vmem [shape: bf16[4,6,8], index: 16, kind: input, shape index: {}]   ;;  %s15964_s17 = inlined_call_operand.vmem [shape: bf16[4,256,384], index: 17, kind: input, shape index: {}]   ;;  %s15965_s18 = inlined_call_operand.vmem [shape: f32[1,128], index: 18, kind: input, shape index: {}]   ;;  %s15966_s19 = inlined_call_operand.vmem [shape: f32[1,128], index: 19, kind: input, shape index: {}]   ;;  %s15967_s20 = inlined_call_operand.vmem [shape: f32[384,128], index: 20, kind: input, shape index: {}]   ;;  %s15968_s21 = inlined_call_operand.vmem [shape: f32[128,384], index: 21, kind: input, shape index: {}]   ;;  %s15969_s22 = inlined_call_operand.vmem [shape: bf16[4,4,6], index: 22, kind: input, shape index: {}]   ;;  %s15970_s23 = inlined_call_operand.vmem [shape: bf16[4,384,2], index: 23, kind: input, shape index: {}]   ;;  %s15971_s24 = inlined_call_operand.vmem [shape: f32[1,2], index: 24, kind: input, shape index: {}]   ;;  %s15972_s25 = inlined_call_operand.hbm [shape: f32[4,2], index: 25, kind: output, shape index: {}]  }
   0x1   :  { %15982 = sst [smem:[#allocation5_spill]] %s15947_s0 }
   0x2   :  { %15983 = sst [smem:[#allocation6_spill]] %s15948_s1 }
   0x3   :  { %15984 = sst [smem:[#allocation7_spill]] %s15949_s2 }
   0x4   :  { %15985 = sst [smem:[#allocation8_spill]] %s15950_s3 }
   0x5   :  { %15986 = sst [smem:[#allocation9_spill]] %s15951_s4 }
   0x6   :  { %15987 = sst [smem:[#allocation10_spill]] %s15952_s5 }
   0x7   :  { %15988 = sst [smem:[#allocation11_spill]] %s15953_s6 }
   0x8   :  { %15989 = sst [smem:[#allocation12_spill]] %s15954_s7 }
   0x9   :  { %15990 = sst [smem:[#allocation13_spill]] %s15955_s8 }
   0xa   :  { %15991 = sst [smem:[#allocation14_spill]] %s15956_s9 }
   0xb   :  { %s15992_s6 = sld [smem:[#allocation5_spill]]  ;;  %vm128_vm0 = vcmask 523264   ;;  %s15993_s27 = sld [smem:[#allocation6_spill]]  ;;  %v15980_v25 = vmov 0   ;;  %vm343_vm1 = vcmask 785408  }
   0xc   :  { %s15994_s2 = sld [smem:[#allocation7_spill]] }
  0x11   :  { %v11680_v0 = vld [vmem:[%s15992_s6] sm:$0xff]   ;;  %v12676_v1 = vld [vmem:[%s15992_s6 + $0x8] sm:$0xff]   ;;  %v11682_v2 = vld [vmem:[%s15992_s6 + $0x10] sm:$0xff]  }
  0x12   :  { %10801 = vmatprep.subr.bf16.mxu1 %v11680_v0  ;;  %10789 = vmatprep.subr.bf16.mxu0 %v11680_v0  ;;  %v11684_v3 = vld [vmem:[%s15993_s27 + $0x10] sm:$0xff]   ;;  %v11686_v4 = vld [vmem:[%s15993_s27] sm:$0xff]   ;;  %v11683_v5 = vld [vmem:[%s15992_s6 + $0x18] sm:$0xff]  }
  0x13   :  { %10802 = vmatpush3.bf16.msra.mxu1 %v11680_v0  ;;  %10790 = vmatpush3.bf16.msra.mxu0 %v11680_v0  ;;  %v11694_v6 = vld [vmem:[%s15994_s2 + $0x64] ss:$8 sps:$4 sm:$0xff]   ;;  %v11685_v7 = vld [vmem:[%s15993_s27 + $0x18] sm:$0xff]   ;;  %v11692_v10 = vld [vmem:[%s15994_s2 + $0x60] ss:$8 sps:$4 sm:$0xff]  }
  0x14   :  { %10803 = vmatprep.subr.bf16.mxu1 %v12676_v1  ;;  %10791 = vmatprep.subr.bf16.mxu0 %v12676_v1  ;;  %v11687_v8 = vld [vmem:[%s15993_s27 + $0x8] sm:$0xff]   ;;  %v11688_v9 = vld [vmem:[%s15993_s27 + $0x20] sm:$0xff]   ;;  %v11697_v11 = vld [vmem:[%s15994_s2 + $0x74] ss:$8 sps:$4 sm:$0xff]  }
  0x15   :  { %10809 = vmatprep.mubr.msk.bf16.mxu1 %vm128_vm0, %v11684_v3  ;;  %10797 = vmatprep.mubr.msk.bf16.mxu0 %vm128_vm0, %v11686_v4  ;;  %v11695_v12 = vld [vmem:[%s15994_s2 + $0x70] ss:$8 sps:$4 sm:$0xff]   ;;  %v11700_v13 = vld [vmem:[%s15994_s2 + $0x84] ss:$8 sps:$4 sm:$0xff]   ;;  %v11698_v14 = vld [vmem:[%s15994_s2 + $0x80] ss:$8 sps:$4 sm:$0xff]  }
  0x16   :  { %v11703_v15 = vld [vmem:[%s15994_s2 + $0x94] ss:$8 sps:$4 sm:$0xff]   ;;  %v11701_v16 = vld [vmem:[%s15994_s2 + $0x90] ss:$8 sps:$4 sm:$0xff]   ;;  %v11706_v17 = vld [vmem:[%s15994_s2 + $0xa4] ss:$8 sps:$4 sm:$0xff]  }
  0x17   :  { %10804 = vmatpush3.bf16.msra.mxu1 %v12676_v1  ;;  %10792 = vmatpush3.bf16.msra.mxu0 %v12676_v1  ;;  %v11689_v18 = vld [vmem:[%s15993_s27 + $0x28] sm:$0xff]   ;;  %v11690_v19 = vld [vmem:[%s15993_s27 + $0x30] sm:$0xff]   ;;  %v11691_v21 = vld [vmem:[%s15993_s27 + $0x38] sm:$0xff]  }
  0x18   :  { %10805 = vmatprep.subr.bf16.mxu1 %v11682_v2  ;;  %10793 = vmatprep.subr.bf16.mxu0 %v11682_v2  ;;  %v11704_v20 = vld [vmem:[%s15994_s2 + $0xa0] ss:$8 sps:$4 sm:$0xff]   ;;  %v11709_v22 = vld [vmem:[%s15994_s2 + $0xb4] ss:$8 sps:$4 sm:$0xff]   ;;  %v11707_v23 = vld [vmem:[%s15994_s2 + $0xb0] ss:$8 sps:$4 sm:$0xff]  }
  0x19   :  { %v11712_v24 = vld [vmem:[%s15994_s2 + $0x4] ss:$8 sps:$4 sm:$0xff]   ;;  %v11710_v29 = vld [vmem:[%s15994_s2] ss:$8 sps:$4 sm:$0xff]   ;;  %v11715_v32 = vld [vmem:[%s15994_s2 + $0x14] ss:$8 sps:$4 sm:$0xff]  }
  0x1a   :  { %v11713_v40 = vld [vmem:[%s15994_s2 + $0x10] ss:$8 sps:$4 sm:$0xff]   ;;  %v11718_v41 = vld [vmem:[%s15994_s2 + $0x24] ss:$8 sps:$4 sm:$0xff]   ;;  %v11716_v42 = vld [vmem:[%s15994_s2 + $0x20] ss:$8 sps:$4 sm:$0xff]  }
  0x1b   :  { %10806 = vmatpush3.bf16.msra.mxu1 %v11682_v2  ;;  %10794 = vmatpush3.bf16.msra.mxu0 %v11682_v2  ;;  %v11721_v43 = vld [vmem:[%s15994_s2 + $0x34] ss:$8 sps:$4 sm:$0xff]   ;;  %v11719_v44 = vld [vmem:[%s15994_s2 + $0x30] ss:$8 sps:$4 sm:$0xff]   ;;  %v11724_v45 = vld [vmem:[%s15994_s2 + $0x44] ss:$8 sps:$4 sm:$0xff]  }
  0x1c   :  { %10807 = vmatprep.subr.bf16.mxu1 %v11683_v5  ;;  %10795 = vmatprep.subr.bf16.mxu0 %v11683_v5  ;;  %v11722_v47 = vld [vmem:[%s15994_s2 + $0x40] ss:$8 sps:$4 sm:$0xff]   ;;  %v11727_v49 = vld [vmem:[%s15994_s2 + $0x54] ss:$8 sps:$4 sm:$0xff]   ;;  %v11725_v54 = vld [vmem:[%s15994_s2 + $0x50] ss:$8 sps:$4 sm:$0xff]  }
  0x1d   :  { %v11730_v55 = vld [vmem:[%s15994_s2 + $0xc4] ss:$8 sps:$4 sm:$0xff]   ;;  %v11728_v56 = vld [vmem:[%s15994_s2 + $0xc0] ss:$8 sps:$4 sm:$0xff]   ;;  %v11733_v57 = vld [vmem:[%s15994_s2 + $0xd4] ss:$8 sps:$4 sm:$0xff]  }
  0x1e   :  { %v11731_v58 = vld [vmem:[%s15994_s2 + $0xd0] ss:$8 sps:$4 sm:$0xff]   ;;  %v11736_v59 = vld [vmem:[%s15994_s2 + $0xe4] ss:$8 sps:$4 sm:$0xff]   ;;  %v11734_v61 = vld [vmem:[%s15994_s2 + $0xe0] ss:$8 sps:$4 sm:$0xff]  }
  0x1f   :  { %10808 = vmatpush3.bf16.msra.mxu1 %v11683_v5  ;;  %10796 = vmatpush3.bf16.msra.mxu0 %v11683_v5  ;;  %v11739_v63 = vld [vmem:[%s15994_s2 + $0xf4] ss:$8 sps:$4 sm:$0xff]   ;;  %v11737_v4 = vld [vmem:[%s15994_s2 + $0xf0] ss:$8 sps:$4 sm:$0xff]  }
  0x20   :  { %10813 = vmatprep.subr.bf16.mxu1 %v11680_v0  ;;  %350 = vmatprep.subr.bf16.mxu0 %v11694_v6  ;;  %v11740_v6 = vld [vmem:[%s15994_s2 + $0x100] ss:$8 sps:$4 sm:$0xff]  }
  0x22   :  { %10810 = vmatmul.mubr.msk.bf16.vlgmr.msra.gmra.mrb[0].mxu1 %vm128_vm0, %v11685_v7  ;;  %10798 = vmatmul.mubr.msk.bf16.vlgmr.msra.gmra.mrb[0].mxu0 %vm128_vm0, %v11687_v8  ;;  %v11745_v7 = vld [vmem:[%s15994_s2 + $0x114] ss:$8 sps:$4 sm:$0xff]   ;;  %v11743_v8 = vld [vmem:[%s15994_s2 + $0x110] ss:$8 sps:$4 sm:$0xff]  }
  0x23   :  { %10814 = vmatpush3.bf16.msra.mxu1 %v11680_v0  ;;  %10821 = vmatprep.mubr.msk.bf16.mxu1 %vm128_vm0, %v11688_v9  ;;  %v11748_v9 = vld [vmem:[%s15994_s2 + $0x124] ss:$8 sps:$4 sm:$0xff]  }
  0x24   :  { %10815 = vmatprep.subr.bf16.mxu1 %v12676_v1  ;;  %351 = vmatpush1.bf16.msra.mxu0 %v11692_v10  ;;  %v11746_v10 = vld [vmem:[%s15994_s2 + $0x120] ss:$8 sps:$4 sm:$0xff]  }
  0x25   :  { %352 = vmatprep.subr.bf16.mxu0 %v11697_v11  ;;  %382 = vmatprep.mubr.bf16.mxu0 %v15980_v25  ;;  %v11751_v11 = vld [vmem:[%s15994_s2 + $0x134] ss:$8 sps:$4 sm:$0xff]  }
  0x27   :  { %10816 = vmatpush3.bf16.msra.mxu1 %v12676_v1 }
  0x28   :  { %10817 = vmatprep.subr.bf16.mxu1 %v11682_v2  ;;  %353 = vmatpush1.bf16.msra.mxu0 %v11695_v12  ;;  %v11749_v12 = vld [vmem:[%s15994_s2 + $0x130] ss:$8 sps:$4 sm:$0xff]  }
  0x29   :  { %354 = vmatprep.subr.bf16.mxu0 %v11700_v13  ;;  %v11754_v13 = vld [vmem:[%s15994_s2 + $0x144] ss:$8 sps:$4 sm:$0xff]  }
  0x2b   :  { %10818 = vmatpush3.bf16.msra.mxu1 %v11682_v2 }
  0x2c   :  { %10819 = vmatprep.subr.bf16.mxu1 %v11683_v5  ;;  %355 = vmatpush1.bf16.msra.mxu0 %v11698_v14 }
  0x2d   :  { %356 = vmatprep.subr.bf16.mxu0 %v11703_v15 }
  0x2f   :  { %10820 = vmatpush3.bf16.msra.mxu1 %v11683_v5 }
  0x30   :  { %10825 = vmatprep.subr.bf16.mxu1 %v11680_v0  ;;  %357 = vmatpush1.bf16.msra.mxu0 %v11701_v16 }
  0x31   :  { %358 = vmatprep.subr.bf16.mxu0 %v11706_v17 }
  0x32   :  { %10822 = vmatmul.mubr.msk.bf16.vlgmr.msra.gmra.mrb[4].mxu1 %vm128_vm0, %v11689_v18 }
  0x33   :  { %10826 = vmatpush3.bf16.msra.mxu1 %v11680_v0  ;;  %10833 = vmatprep.mubr.msk.bf16.mxu1 %vm128_vm0, %v11690_v19 }
  0x34   :  { %10827 = vmatprep.subr.bf16.mxu1 %v12676_v1  ;;  %359 = vmatpush1.bf16.msra.mxu0 %v11704_v20 }
  0x35   :  { %360 = vmatprep.subr.bf16.mxu0 %v11709_v22 }
  0x37   :  { %10828 = vmatpush3.bf16.msra.mxu1 %v12676_v1 }
  0x38   :  { %10829 = vmatprep.subr.bf16.mxu1 %v11682_v2  ;;  %361 = vmatpush1.bf16.msra.mxu0 %v11707_v23 }
  0x39   :  { %469 = vmatprep.subr.bf16.mxu0 %v11712_v24 }
  0x3b   :  { %10830 = vmatpush3.bf16.msra.mxu1 %v11682_v2 }
  0x3c   :  { %10831 = vmatprep.subr.bf16.mxu1 %v11683_v5 }
  0x3f   :  { %10832 = vmatpush3.bf16.msra.mxu1 %v11683_v5  ;;  %v11742_v5 = vld [vmem:[%s15994_s2 + $0x104] ss:$8 sps:$4 sm:$0xff]  }
  0x42   :  { %10834 = vmatmul.mubr.msk.bf16.vlgmr.msra.gmra.mrb[8].mxu1 %vm128_vm0, %v11691_v21 }
  0x43   :  { %1037 = vmatprep.mubr.bf16.mxu1 %v15980_v25 }
  0xf5   :  { %v10811_v26 = vpop.f32.mrb[0].mxu1  ;;  %v12765_v27 = vpop.f32.mrb[0].mxu0 }
  0xf6   :  { %v253_v28 = vpop.f32.mrb[1].mxu1  ;;  %v169_v30 = vpop.f32.mrb[1].mxu0 }
  0xf7   :  { %v10812_v31 = vpop.f32.mrb[2].mxu1  ;;  %v10800_v33 = vpop.f32.mrb[2].mxu0 }
  0xf8   :  { %v269_v34 = vpack.c.bf16 %v10812_v31, %v10811_v26  ;;  %v256_v35 = vpop.f32.mrb[3].mxu1  ;;  %v185_v36 = vpack.c.bf16 %v10800_v33, %v12765_v27  ;;  %v172_v37 = vpop.f32.mrb[3].mxu0 }
  0xf9   :  { %v268_v38 = vpack.c.bf16 %v256_v35, %v253_v28  ;;  %v184_v39 = vpack.c.bf16 %v172_v37, %v169_v30 }
  0xfb   :  { %9022 = vmatmul.mubr.msk.bf16.vlgmr.msra.gmra.mrb[4].mxu0 %vm343_vm1, %v268_v38 }
  0xfc   :  { %470 = vmatpush1.bf16.msra.mxu0 %v11710_v29  ;;  %392 = vmatprep.mubr.bf16.mxu0 %v15980_v25 }
  0xfd   :  { %471 = vmatprep.subr.bf16.mxu0 %v11715_v32 }
 0x100   :  { %472 = vmatpush1.bf16.msra.mxu0 %v11713_v40 }
 0x101   :  { %473 = vmatprep.subr.bf16.mxu0 %v11718_v41 }
 0x103   :  { %9023 = vmatmul.mubr.msk.bf16.gmra.mrb[8].mxu0 %vm343_vm1, %v269_v34 }
 0x104   :  { %474 = vmatpush1.bf16.msra.mxu0 %v11716_v42  ;;  %501 = vmatprep.mubr.bf16.mxu0 %v15980_v25 }
 0x105   :  { %475 = vmatprep.subr.bf16.mxu0 %v11721_v43  ;;  %v12796_v46 = vpop.f32.mrb[4].mxu1 }
 0x106   :  { %v577_v48 = vpop.f32.mrb[5].mxu1 }
 0x107   :  { %v10824_v50 = vpop.f32.mrb[6].mxu1 }
 0x108   :  { %476 = vmatpush1.bf16.msra.mxu0 %v11719_v44  ;;  %v593_v51 = vpack.c.bf16 %v10824_v50, %v12796_v46  ;;  %v580_v52 = vpop.f32.mrb[7].mxu1 }
 0x109   :  { %477 = vmatprep.subr.bf16.mxu0 %v11724_v45  ;;  %v592_v53 = vpack.c.bf16 %v580_v52, %v577_v48 }
 0x10c   :  { %478 = vmatpush1.bf16.msra.mxu0 %v11722_v47 }
 0x10d   :  { %479 = vmatprep.subr.bf16.mxu0 %v11727_v49 }
 0x110   :  { %480 = vmatpush1.bf16.msra.mxu0 %v11725_v54 }
 0x111   :  { %673 = vmatprep.subr.bf16.mxu0 %v11730_v55 }
 0x113   :  { %9036 = vmatmul.mubr.msk.bf16.vlgmr.msra.gmra.mrb[4].mxu0 %vm343_vm1, %v184_v39 }
 0x114   :  { %674 = vmatpush1.bf16.msra.mxu0 %v11728_v56  ;;  %511 = vmatprep.mubr.bf16.mxu0 %v15980_v25 }
 0x115   :  { %675 = vmatprep.subr.bf16.mxu0 %v11733_v57  ;;  %v10835_v60 = vpop.f32.mrb[8].mxu1 }
 0x116   :  { %v789_v62 = vpop.f32.mrb[9].mxu1 }
 0x117   :  { %v10836_v0 = vpop.f32.mrb[10].mxu1 }
 0x118   :  { %676 = vmatpush1.bf16.msra.mxu0 %v11731_v58  ;;  %v805_v1 = vpack.c.bf16 %v10836_v0, %v10835_v60  ;;  %v792_v2 = vpop.f32.mrb[11].mxu1 }
 0x119   :  { %677 = vmatprep.subr.bf16.mxu0 %v11736_v59  ;;  %v804_v3 = vpack.c.bf16 %v792_v2, %v789_v62 }
 0x11b   :  { %9037 = vmatmul.mubr.msk.bf16.gmra.mrb[8].mxu0 %vm343_vm1, %v185_v36 }
 0x11c   :  { %678 = vmatpush1.bf16.msra.mxu0 %v11734_v61  ;;  %705 = vmatprep.mubr.bf16.mxu0 %v15980_v25 }
 0x11d   :  { %679 = vmatprep.subr.bf16.mxu0 %v11739_v63 }
 0x120   :  { %680 = vmatpush1.bf16.msra.mxu0 %v11737_v4 }
 0x121   :  { %681 = vmatprep.subr.bf16.mxu0 %v11742_v5 }
 0x124   :  { %682 = vmatpush1.bf16.msra.mxu0 %v11740_v6 }
 0x125   :  { %683 = vmatprep.subr.bf16.mxu0 %v11745_v7 }
 0x128   :  { %684 = vmatpush1.bf16.msra.mxu0 %v11743_v8 }
 0x129   :  { %885 = vmatprep.subr.bf16.mxu0 %v11748_v9 }
 0x12b   :  { %9070 = vmatmul.mubr.msk.bf16.vlgmr.msra.gmra.mrb[4].mxu0 %vm343_vm1, %v592_v53 }
 0x12c   :  { %886 = vmatpush1.bf16.msra.mxu0 %v11746_v10  ;;  %715 = vmatprep.mubr.bf16.mxu0 %v15980_v25 }
 0x12d   :  { %887 = vmatprep.subr.bf16.mxu0 %v11751_v11 }
 0x12e   :  { %30 = vsyncpa [#allocation3], 0  ;;  %v11752_v14 = vld [vmem:[%s15994_s2 + $0x140] ss:$8 sps:$4 sm:$0xff]   ;;  %v11757_v15 = vld [vmem:[%s15994_s2 + $0x154] ss:$8 sps:$4 sm:$0xff]   ;;  %v948_v21 = vlaneseq }
 0x12f   :  { %v11755_v16 = vld [vmem:[%s15994_s2 + $0x150] ss:$8 sps:$4 sm:$0xff]   ;;  %v11760_v17 = vld [vmem:[%s15994_s2 + $0x164] ss:$8 sps:$4 sm:$0xff]   ;;  %v11758_v18 = vld [vmem:[%s15994_s2 + $0x160] ss:$8 sps:$4 sm:$0xff]  }
 0x130   :  { %888 = vmatpush1.bf16.msra.mxu0 %v11749_v12  ;;  %v11763_v19 = vld [vmem:[%s15994_s2 + $0x174] ss:$8 sps:$4 sm:$0xff]   ;;  %v11761_v20 = vld [vmem:[%s15994_s2 + $0x170] ss:$8 sps:$4 sm:$0xff]   ;;  %v949_v22 = vshrl.u32 %v948_v21, 7  ;;  %s15995_s0 = sld [smem:[#allocation8_spill]] }
 0x131   :  { %889 = vmatprep.subr.bf16.mxu0 %v11754_v13  ;;  %s15996_s30 = sld [smem:[#allocation9_spill]]  ;;  %vm1001_vm10 = vcmask 261120   ;;  %s15997_s1 = sld [smem:[#allocation10_spill]]  ;;  %vm2211_vm11 = vcmask 130048  }
 0x132   :  { %v12892_v23 = vsub.s32 0, %v949_v22  ;;  %v954_v26 = vsub.s32 1, %v949_v22  ;;  %s15998_s29 = sld [smem:[#allocation13_spill]]  ;;  %s15999_s28 = sld [smem:[#allocation14_spill]] }
 0x133   :  { %9071 = vmatmul.mubr.msk.bf16.gmra.mrb[8].mxu0 %vm343_vm1, %v593_v51  ;;  %s16000_s27 = sld [smem:[#allocation11_spill]]  ;;  %s16001_s2 = sld [smem:[#allocation12_spill]] }
 0x134   :  { %890 = vmatpush1.bf16.msra.mxu0 %v11752_v14  ;;  %917 = vmatprep.mubr.bf16.mxu0 %v15980_v25 }
 0x135   :  { %891 = vmatprep.subr.bf16.mxu0 %v11757_v15 }
 0x136   :  { %v946_v24 = vld [vmem:[%s15995_s0] sm:$0x3] }
 0x137   :  { %v951_v27 = vrot.slane %v946_v24, %v12892_v23  ;;  %v955_v28 = vrot.slane %v946_v24, %v954_v26  ;;  %v11765_v2 = vld [vmem:[%s15996_s30 + $0x10] sm:$0xff]   ;;  %v11766_v4 = vld [vmem:[%s15996_s30 + $0x8] sm:$0xff]   ;;  %v11794_v5 = vld [vmem:[%s15996_s30 + $0x18] sm:$0xff]  }
 0x138   :  { %892 = vmatpush1.bf16.msra.mxu0 %v11755_v16  ;;  %v11767_v6 = vld [vmem:[%s15997_s1 + $0x100] ss:$8 sps:$4 sm:$0xff]   ;;  %v11772_v7 = vld [vmem:[%s15997_s1 + $0x114] ss:$8 sps:$4 sm:$0xff]   ;;  %v11770_v8 = vld [vmem:[%s15997_s1 + $0x110] ss:$8 sps:$4 sm:$0xff]  }
 0x139   :  { %893 = vmatprep.subr.bf16.mxu0 %v11760_v17  ;;  %v11775_v9 = vld [vmem:[%s15997_s1 + $0x124] ss:$8 sps:$4 sm:$0xff]   ;;  %v11773_v10 = vld [vmem:[%s15997_s1 + $0x120] ss:$8 sps:$4 sm:$0xff]   ;;  %v11778_v11 = vld [vmem:[%s15997_s1 + $0x134] ss:$8 sps:$4 sm:$0xff]  }
 0x13a   :  { %v11776_v12 = vld [vmem:[%s15997_s1 + $0x130] ss:$8 sps:$4 sm:$0xff]   ;;  %v11781_v13 = vld [vmem:[%s15997_s1 + $0x144] ss:$8 sps:$4 sm:$0xff]   ;;  %v11779_v14 = vld [vmem:[%s15997_s1 + $0x140] ss:$8 sps:$4 sm:$0xff]  }
 0x13b   :  { %v11784_v15 = vld [vmem:[%s15997_s1 + $0x154] ss:$8 sps:$4 sm:$0xff]   ;;  %v11782_v16 = vld [vmem:[%s15997_s1 + $0x150] ss:$8 sps:$4 sm:$0xff]   ;;  %v11787_v17 = vld [vmem:[%s15997_s1 + $0x164] ss:$8 sps:$4 sm:$0xff]  }
 0x13c   :  { %894 = vmatpush1.bf16.msra.mxu0 %v11758_v18  ;;  %v11785_v18 = vld [vmem:[%s15997_s1 + $0x160] ss:$8 sps:$4 sm:$0xff]   ;;  %v11793_v21 = vld [vmem:[%s15997_s1 + $0x184] ss:$8 sps:$4 sm:$0xff]   ;;  %v11797_v24 = vld [vmem:[%s15997_s1 + $0x194] ss:$8 sps:$4 sm:$0xff]  }
 0x13d   :  { %895 = vmatprep.subr.bf16.mxu0 %v11763_v19  ;;  %v11790_v19 = vld [vmem:[%s15997_s1 + $0x174] ss:$8 sps:$4 sm:$0xff]   ;;  %v11791_v22 = vld [vmem:[%s15997_s1 + $0x180] ss:$8 sps:$4 sm:$0xff]   ;;  %v11795_v26 = vld [vmem:[%s15997_s1 + $0x190] ss:$8 sps:$4 sm:$0xff]  }
 0x140   :  { %896 = vmatpush1.bf16.msra.mxu0 %v11761_v20  ;;  %v11788_v20 = vld [vmem:[%s15997_s1 + $0x170] ss:$8 sps:$4 sm:$0xff]  }
 0x143   :  { %9104 = vmatmul.mubr.msk.bf16.vlgmr.msra.gmra.mrb[4].mxu0 %vm343_vm1, %v804_v3  ;;  %v11769_v3 = vld [vmem:[%s15997_s1 + $0x104] ss:$8 sps:$4 sm:$0xff]  }
 0x144   :  { %927 = vmatprep.mubr.bf16.mxu0 %v15980_v25 }
 0x14b   :  { %9105 = vmatmul.mubr.msk.bf16.gmra.mrb[8].mxu0 %vm343_vm1, %v805_v1  ;;  %v11764_v1 = vld [vmem:[%s15996_s30] sm:$0xff]   ;;  %vm3961_vm1 = vcmask 64512   ;;  %s12539_s30 = smov [#allocation2]  }
 0x14c   :  { %1620 = vmatprep.mubr.bf16.mxu0 %v15980_v25  ;;  %s8974_s3 = sshll.u32 %s12539_s30, 4  ;;  %s8975_s3 = int_to_ptr.vmem [resolvable:$true] %s8974_s3 }
 0x14d   :  { %s12510_s26 = scalar_lea.vmem %s8975_s3, 64  ;;  %p12515_p1 = scmp.lt.s32.totalorder %s8975_s3, %s8975_s3 }
 0x14e   :  { %p12511_p0 = scmp.ne.s32.totalorder %s8975_s3, %s12510_s26  ;;  %p12516_p2 = scmp.lt.s32.totalorder %s12510_s26, %s12510_s26 }
 0x150   :  { %p12517_p3 = por %p12516_p2, %p12515_p1 }
 0x152   :  { %p12518_p4 = pnand %p12517_p3, %p12511_p0 }
 0x216   :  { %v919_v29 = vpop.f32.mrb[4].mxu0 }
 0x217   :  { %v958_v30 = vadd.f32 %v951_v27, %v919_v29  ;;  %v921_v31 = vpop.f32.mrb[5].mxu0  ;;  %v11803_v29 = vld [vmem:[%s15997_s1 + $0x1b4] ss:$8 sps:$4 sm:$0xff]  }
 0x218   :  { %v959_v32 = vadd.f32 %v955_v28, %v921_v31  ;;  %v923_v33 = vpop.f32.mrb[6].mxu0  ;;  %v11806_v31 = vld [vmem:[%s15997_s1 + $0x1c4] ss:$8 sps:$4 sm:$0xff]  }
 0x219   :  { %v974_v34 = vmul.f32 0.2, %v958_v30  ;;  %v960_v35 = vadd.f32 %v951_v27, %v923_v33  ;;  %v925_v36 = vpop.f32.mrb[7].mxu0  ;;  %vm966_vm2 = vcmp.gt.f32.partialorder %v958_v30, 0.0  ;;  %v11809_v33 = vld [vmem:[%s15997_s1 + $0x1d4] ss:$8 sps:$4 sm:$0xff]  }
 0x21a   :  { %v975_v37 = vmul.f32 0.2, %v959_v32  ;;  %v961_v38 = vadd.f32 %v955_v28, %v925_v36  ;;  %vm967_vm3 = vcmp.gt.f32.partialorder %v959_v32, 0.0  ;;  %v11812_v36 = vld [vmem:[%s15997_s1 + $0x1e4] ss:$8 sps:$4 sm:$0xff]  }
 0x21b   :  { %vm968_vm4 = vcmp.gt.f32.partialorder %v960_v35, 0.0  ;;  %v976_v39 = vmul.f32 0.2, %v960_v35  ;;  %v982_v41 = vsel %vm966_vm2, %v958_v30, %v974_v34  ;;  %v11801_v30 = vld [vmem:[%s15997_s1 + $0x1b0] ss:$8 sps:$4 sm:$0xff]  }
 0x21c   :  { %vm969_vm5 = vcmp.gt.f32.partialorder %v961_v38, 0.0  ;;  %v977_v40 = vmul.f32 0.2, %v961_v38  ;;  %v983_v43 = vsel %vm967_vm3, %v959_v32, %v975_v37  ;;  %v11804_v32 = vld [vmem:[%s15997_s1 + $0x1c0] ss:$8 sps:$4 sm:$0xff]   ;;  %vm4520_vm3 = vcmask 1043456  }
 0x21d   :  { %v984_v42 = vsel %vm968_vm4, %v960_v35, %v976_v39  ;;  %v11807_v34 = vld [vmem:[%s15997_s1 + $0x1d0] ss:$8 sps:$4 sm:$0xff]   ;;  %v11810_v35 = vld [vmem:[%s15997_s1 + $0x1e0] ss:$8 sps:$4 sm:$0xff]   ;;  %v11815_v37 = vld [vmem:[%s15997_s1 + $0x1f4] ss:$8 sps:$4 sm:$0xff]  }
 0x21e   :  { %v990_v44 = vpack.c.bf16 %v984_v42, %v982_v41  ;;  %v985_v45 = vsel %vm969_vm5, %v961_v38, %v977_v40  ;;  %v929_v46 = vpop.f32.mrb[8].mxu0  ;;  %v11813_v38 = vld [vmem:[%s15997_s1 + $0x1f0] ss:$8 sps:$4 sm:$0xff]   ;;  %v11818_v39 = vld [vmem:[%s15997_s1 + $0x4] ss:$8 sps:$4 sm:$0xff]   ;;  %vm12537_vm4 = vmmov 0  }
 0x21f   :  { %v991_v47 = vpack.c.bf16 %v985_v45, %v983_v43  ;;  %v962_v48 = vadd.f32 %v951_v27, %v929_v46  ;;  %v931_v49 = vpop.f32.mrb[9].mxu0  ;;  %vm6428_vm5 = vcmask 1045504  }
 0x220   :  { %v963_v50 = vadd.f32 %v955_v28, %v931_v49  ;;  %v933_v51 = vpop.f32.mrb[10].mxu0 }
 0x221   :  { %v978_v52 = vmul.f32 0.2, %v962_v48  ;;  %v964_v53 = vadd.f32 %v951_v27, %v933_v51  ;;  %v935_v54 = vpop.f32.mrb[11].mxu0  ;;  %1005 = vmatprep.subr.bf16.mxu1 %v991_v47  ;;  %1588 = vmatprep.subr.bf16.mxu0 %v991_v47  ;;  %vm970_vm6 = vcmp.gt.f32.partialorder %v962_v48, 0.0  ;;  %v11800_v27 = vld [vmem:[%s15997_s1 + $0x1a4] ss:$8 sps:$4 sm:$0xff]  }
 0x222   :  { %v979_v55 = vmul.f32 0.2, %v963_v50  ;;  %v965_v56 = vadd.f32 %v955_v28, %v935_v54  ;;  %1006 = vmatpush1.bf16.msra.mxu1 %v990_v44  ;;  %1589 = vmatpush1.bf16.msra.mxu0 %v990_v44  ;;  %vm971_vm7 = vcmp.gt.f32.partialorder %v963_v50, 0.0  ;;  %v11798_v28 = vld [vmem:[%s15997_s1 + $0x1a0] ss:$8 sps:$4 sm:$0xff]  }
 0x223   :  { %vm972_vm8 = vcmp.gt.f32.partialorder %v964_v53, 0.0  ;;  %v980_v57 = vmul.f32 0.2, %v964_v53  ;;  %v986_v59 = vsel %vm970_vm6, %v962_v48, %v978_v52  ;;  %vm6425_vm6 = vcmask 48128  }
 0x224   :  { %vm973_vm9 = vcmp.gt.f32.partialorder %v965_v56, 0.0  ;;  %v981_v58 = vmul.f32 0.2, %v965_v56  ;;  %v987_v61 = vsel %vm971_vm7, %v963_v50, %v979_v55 }
 0x225   :  { %v988_v60 = vsel %vm972_vm8, %v964_v53, %v980_v57 }
 0x226   :  { %v992_v62 = vpack.c.bf16 %v988_v60, %v986_v59  ;;  %v989_v63 = vsel %vm973_vm9, %v965_v56, %v981_v58  ;;  %v11816_v58 = vld [vmem:[%s15997_s1] ss:$8 sps:$4 sm:$0xff]   ;;  %v11821_v59 = vld [vmem:[%s15997_s1 + $0x14] ss:$8 sps:$4 sm:$0xff]   ;;  %v11819_v60 = vld [vmem:[%s15997_s1 + $0x10] ss:$8 sps:$4 sm:$0xff]  }
 0x227   :  { %v993_v0 = vpack.c.bf16 %v989_v63, %v987_v61  ;;  %v11824_v61 = vld [vmem:[%s15997_s1 + $0x24] ss:$8 sps:$4 sm:$0xff]   ;;  %v11827_v63 = vld [vmem:[%s15997_s1 + $0x34] ss:$8 sps:$4 sm:$0xff]  }
 0x229   :  { %1007 = vmatprep.subr.bf16.mxu1 %v993_v0  ;;  %1590 = vmatprep.subr.bf16.mxu0 %v993_v0 }
 0x22a   :  { %1008 = vmatpush1.bf16.msra.mxu1 %v992_v62  ;;  %1591 = vmatpush1.bf16.msra.mxu0 %v992_v62 }
 0x22b   :  { %1093 = vmatprep.subr.bf16.mxu1 %v991_v47  ;;  %1884 = vmatprep.subr.bf16.mxu0 %v991_v47 }
 0x22d   :  { %9107 = vmatmul.mubr.msk.bf16.vlgmr.msra.gmra.mrb[12].mxu1 %vm1001_vm10, %v11764_v1  ;;  %9211 = vmatmul.mubr.msk.bf16.vlgmr.msra.gmra.mrb[12].mxu0 %vm1001_vm10, %v11765_v2  ;;  %v11830_v1 = vld [vmem:[%s15997_s1 + $0x44] ss:$8 sps:$4 sm:$0xff]   ;;  %v11828_v2 = vld [vmem:[%s15997_s1 + $0x40] ss:$8 sps:$4 sm:$0xff]  }
 0x22e   :  { %1094 = vmatpush1.bf16.msra.mxu1 %v990_v44  ;;  %1885 = vmatpush1.bf16.msra.mxu0 %v990_v44 }
 0x22f   :  { %1095 = vmatprep.subr.bf16.mxu1 %v993_v0  ;;  %1886 = vmatprep.subr.bf16.mxu0 %v993_v0  ;;  %v11825_v0 = vld [vmem:[%s15997_s1 + $0x30] ss:$8 sps:$4 sm:$0xff]  }
 0x230   :  { %1125 = vmatprep.mubr.bf16.mxu1 %v15980_v25  ;;  %1916 = vmatprep.mubr.bf16.mxu0 %v15980_v25 }
 0x232   :  { %1096 = vmatpush1.bf16.msra.mxu1 %v992_v62  ;;  %1887 = vmatpush1.bf16.msra.mxu0 %v992_v62  ;;  %v11822_v62 = vld [vmem:[%s15997_s1 + $0x20] ss:$8 sps:$4 sm:$0xff]  }
 0x233   :  { %1331 = vmatprep.subr.bf16.mxu1 %v11769_v3  ;;  %v11833_v3 = vld [vmem:[%s15997_s1 + $0x54] ss:$8 sps:$4 sm:$0xff]  }
 0x235   :  { %9111 = vmatmul.mubr.msk.bf16.vlgmr.msra.gmra.mrb[16].mxu1 %vm1001_vm10, %v11766_v4  ;;  %9279 = vmatmul.mubr.msk.bf16.vlgmr.msra.gmra.mrb[16].mxu0 %vm1001_vm10, %v11794_v5  ;;  %v11831_v4 = vld [vmem:[%s15997_s1 + $0x50] ss:$8 sps:$4 sm:$0xff]   ;;  %v11836_v5 = vld [vmem:[%s15997_s1 + $0x64] ss:$8 sps:$4 sm:$0xff]  }
 0x236   :  { %1332 = vmatpush1.bf16.msra.mxu1 %v11767_v6  ;;  %v11834_v6 = vld [vmem:[%s15997_s1 + $0x60] ss:$8 sps:$4 sm:$0xff]  }
 0x237   :  { %1333 = vmatprep.subr.bf16.mxu1 %v11772_v7  ;;  %v11839_v7 = vld [vmem:[%s15997_s1 + $0x74] ss:$8 sps:$4 sm:$0xff]  }
 0x23a   :  { %1334 = vmatpush1.bf16.msra.mxu1 %v11770_v8  ;;  %v11837_v8 = vld [vmem:[%s15997_s1 + $0x70] ss:$8 sps:$4 sm:$0xff]  }
 0x23b   :  { %1335 = vmatprep.subr.bf16.mxu1 %v11775_v9  ;;  %v11842_v9 = vld [vmem:[%s15997_s1 + $0x84] ss:$8 sps:$4 sm:$0xff]  }
 0x23e   :  { %1336 = vmatpush1.bf16.msra.mxu1 %v11773_v10  ;;  %v11840_v10 = vld [vmem:[%s15997_s1 + $0x80] ss:$8 sps:$4 sm:$0xff]  }
 0x23f   :  { %1337 = vmatprep.subr.bf16.mxu1 %v11778_v11  ;;  %v11845_v11 = vld [vmem:[%s15997_s1 + $0x94] ss:$8 sps:$4 sm:$0xff]  }
 0x242   :  { %1338 = vmatpush1.bf16.msra.mxu1 %v11776_v12  ;;  %v11843_v12 = vld [vmem:[%s15997_s1 + $0x90] ss:$8 sps:$4 sm:$0xff]  }
 0x243   :  { %1339 = vmatprep.subr.bf16.mxu1 %v11781_v13  ;;  %v11848_v13 = vld [vmem:[%s15997_s1 + $0xa4] ss:$8 sps:$4 sm:$0xff]  }
 0x246   :  { %1340 = vmatpush1.bf16.msra.mxu1 %v11779_v14  ;;  %v11846_v14 = vld [vmem:[%s15997_s1 + $0xa0] ss:$8 sps:$4 sm:$0xff]  }
 0x247   :  { %1341 = vmatprep.subr.bf16.mxu1 %v11784_v15  ;;  %v11851_v15 = vld [vmem:[%s15997_s1 + $0xb4] ss:$8 sps:$4 sm:$0xff]  }
 0x24a   :  { %1342 = vmatpush1.bf16.msra.mxu1 %v11782_v16  ;;  %v11849_v16 = vld [vmem:[%s15997_s1 + $0xb0] ss:$8 sps:$4 sm:$0xff]  }
 0x24b   :  { %1343 = vmatprep.subr.bf16.mxu1 %v11787_v17  ;;  %v11854_v17 = vld [vmem:[%s15997_s1 + $0xc4] ss:$8 sps:$4 sm:$0xff]  }
 0x24e   :  { %1344 = vmatpush1.bf16.msra.mxu1 %v11785_v18  ;;  %v11852_v18 = vld [vmem:[%s15997_s1 + $0xc0] ss:$8 sps:$4 sm:$0xff]  }
 0x24f   :  { %1345 = vmatprep.subr.bf16.mxu1 %v11790_v19  ;;  %v11857_v19 = vld [vmem:[%s15997_s1 + $0xd4] ss:$8 sps:$4 sm:$0xff]  }
 0x252   :  { %1346 = vmatpush1.bf16.msra.mxu1 %v11788_v20  ;;  %v11855_v20 = vld [vmem:[%s15997_s1 + $0xd0] ss:$8 sps:$4 sm:$0xff]  }
 0x253   :  { %1347 = vmatprep.subr.bf16.mxu1 %v11793_v21  ;;  %v11860_v21 = vld [vmem:[%s15997_s1 + $0xe4] ss:$8 sps:$4 sm:$0xff]  }
 0x256   :  { %1348 = vmatpush1.bf16.msra.mxu1 %v11791_v22  ;;  %v11858_v22 = vld [vmem:[%s15997_s1 + $0xe0] ss:$8 sps:$4 sm:$0xff]  }
 0x257   :  { %1349 = vmatprep.subr.bf16.mxu1 %v11797_v24 }
 0x25a   :  { %1350 = vmatpush1.bf16.msra.mxu1 %v11795_v26  ;;  %v11863_v26 = vld [vmem:[%s15997_s1 + $0xf4] ss:$8 sps:$4 sm:$0xff]  }
 0x25b   :  { %1351 = vmatprep.subr.bf16.mxu1 %v11800_v27 }
 0x25e   :  { %1352 = vmatpush1.bf16.msra.mxu1 %v11798_v28 }
 0x25f   :  { %1353 = vmatprep.subr.bf16.mxu1 %v11803_v29 }
 0x262   :  { %1354 = vmatpush1.bf16.msra.mxu1 %v11801_v30 }
 0x263   :  { %1355 = vmatprep.subr.bf16.mxu1 %v11806_v31  ;;  %v11861_v31 = vld [vmem:[%s15997_s1 + $0xf0] ss:$8 sps:$4 sm:$0xff]  }
 0x266   :  { %1356 = vmatpush1.bf16.msra.mxu1 %v11804_v32 }
 0x267   :  { %1357 = vmatprep.subr.bf16.mxu1 %v11809_v33  ;;  %v11866_v33 = vld [vmem:[%s15997_s1 + $0x204] ss:$8 sps:$4 sm:$0xff]  }
 0x26a   :  { %1358 = vmatpush1.bf16.msra.mxu1 %v11807_v34  ;;  %v11864_v34 = vld [vmem:[%s15997_s1 + $0x200] ss:$8 sps:$4 sm:$0xff]  }
 0x26b   :  { %1359 = vmatprep.subr.bf16.mxu1 %v11812_v36  ;;  %v11867_v36 = vld [vmem:[%s15997_s1 + $0x210] ss:$8 sps:$4 sm:$0xff]  }
 0x26e   :  { %1360 = vmatpush1.bf16.msra.mxu1 %v11810_v35  ;;  %v11869_v35 = vld [vmem:[%s15997_s1 + $0x214] ss:$8 sps:$4 sm:$0xff]  }
 0x26f   :  { %1361 = vmatprep.subr.bf16.mxu1 %v11815_v37  ;;  %v11872_v37 = vld [vmem:[%s15997_s1 + $0x224] ss:$8 sps:$4 sm:$0xff]  }
 0x272   :  { %1362 = vmatpush1.bf16.msra.mxu1 %v11813_v38  ;;  %v11870_v38 = vld [vmem:[%s15997_s1 + $0x220] ss:$8 sps:$4 sm:$0xff]  }
 0x273   :  { %1534 = vmatprep.subr.bf16.mxu1 %v11818_v39  ;;  %v11875_v39 = vld [vmem:[%s15997_s1 + $0x234] ss:$8 sps:$4 sm:$0xff]  }
 0x300   :  { %v13015_v40 = vpop.f32.mrb[12].mxu1  ;;  %v13021_v46 = vpop.f32.mrb[12].mxu0 }
 0x301   :  { %v1041_v41 = vpop.f32.mrb[13].mxu1  ;;  %v13023_v47 = vpop.f32.mrb[13].mxu0 }
 0x302   :  { %v13017_v42 = vpop.f32.mrb[14].mxu1  ;;  %v13025_v48 = vpop.f32.mrb[14].mxu0 }
 0x303   :  { %v1048_v43 = vpack.c.bf16 %v13017_v42, %v13015_v40  ;;  %v1045_v44 = vpop.f32.mrb[15].mxu1  ;;  %v1631_v49 = vpack.c.bf16 %v13025_v48, %v13021_v46  ;;  %v13029_v51 = vpop.f32.mrb[15].mxu0  ;;  %v11873_v40 = vld [vmem:[%s15997_s1 + $0x230] ss:$8 sps:$4 sm:$0xff]   ;;  %v11876_v42 = vld [vmem:[%s15997_s1 + $0x240] ss:$8 sps:$4 sm:$0xff]  }
 0x304   :  { %v1049_v45 = vpack.c.bf16 %v1045_v44, %v1041_v41  ;;  %v1632_v53 = vpack.c.bf16 %v13029_v51, %v13023_v47  ;;  %v11878_v41 = vld [vmem:[%s15997_s1 + $0x244] ss:$8 sps:$4 sm:$0xff]   ;;  %v11879_v44 = vld [vmem:[%s15997_s1 + $0x250] ss:$8 sps:$4 sm:$0xff]   ;;  %v11882_v47 = vld [vmem:[%s15997_s1 + $0x260] ss:$8 sps:$4 sm:$0xff]  }
 0x305   :  { %v11885_v51 = vld [vmem:[%s15997_s1 + $0x270] ss:$8 sps:$4 sm:$0xff]   ;;  %v11918_v46 = vld [vmem:[%s15997_s1 + $0x320] ss:$8 sps:$4 sm:$0xff]   ;;  %v11923_v48 = vld [vmem:[%s15997_s1 + $0x334] ss:$8 sps:$4 sm:$0xff]  }
 0x308   :  { %v1127_v50 = vpop.f32.mrb[16].mxu1  ;;  %v13120_v24 = vpop.f32.mrb[16].mxu0 }
 0x309   :  { %v1129_v52 = vpop.f32.mrb[17].mxu1  ;;  %v13125_v27 = vpop.f32.mrb[17].mxu0 }
 0x30a   :  { %v1131_v54 = vpop.f32.mrb[18].mxu1  ;;  %v13127_v28 = vpop.f32.mrb[18].mxu0 }
 0x30b   :  { %v1136_v55 = vpack.c.bf16 %v1131_v54, %v1127_v50  ;;  %v1133_v56 = vpop.f32.mrb[19].mxu1  ;;  %v1927_v29 = vpack.c.bf16 %v13127_v28, %v13120_v24  ;;  %v13131_v30 = vpop.f32.mrb[19].mxu0  ;;  %v11887_v50 = vld [vmem:[%s15997_s1 + $0x274] ss:$8 sps:$4 sm:$0xff]  }
 0x30c   :  { %v1137_v57 = vpack.c.bf16 %v1133_v56, %v1129_v52  ;;  %v1928_v32 = vpack.c.bf16 %v13131_v30, %v13125_v27  ;;  %v11890_v52 = vld [vmem:[%s15997_s1 + $0x284] ss:$8 sps:$4 sm:$0xff]   ;;  %v11893_v54 = vld [vmem:[%s15997_s1 + $0x294] ss:$8 sps:$4 sm:$0xff]   ;;  %v11945_v27 = vld [vmem:[%s15997_s1 + $0x3b0] ss:$8 sps:$4 sm:$0xff]  }
 0x30d   :  { %v11896_v56 = vld [vmem:[%s15997_s1 + $0x2a4] ss:$8 sps:$4 sm:$0xff]  }
 0x30e   :  { %1363 = vmatprep.mubr.bf16.mxu1 %v1137_v57  ;;  %v11894_v57 = vld [vmem:[%s15997_s1 + $0x2a0] ss:$8 sps:$4 sm:$0xff]   ;;  %v11950_v30 = vld [vmem:[%s15997_s1 + $0x3c4] ss:$8 sps:$4 sm:$0xff]  }
 0x30f   :  { %1364 = vmatmul.mubr.bf16.vlgmr.msra.gmra.mrb[20].mxu1 %v1136_v55  ;;  %v11891_v55 = vld [vmem:[%s15997_s1 + $0x290] ss:$8 sps:$4 sm:$0xff]  }
 0x310   :  { %1535 = vmatpush1.bf16.msra.mxu1 %v11816_v58  ;;  %1566 = vmatprep.mubr.bf16.mxu1 %v1049_v45  ;;  %v11884_v45 = vld [vmem:[%s15997_s1 + $0x264] ss:$8 sps:$4 sm:$0xff]   ;;  %v11899_v58 = vld [vmem:[%s15997_s1 + $0x2b4] ss:$8 sps:$4 sm:$0xff]  }
 0x311   :  { %1536 = vmatprep.subr.bf16.mxu1 %v11821_v59  ;;  %v11897_v59 = vld [vmem:[%s15997_s1 + $0x2b0] ss:$8 sps:$4 sm:$0xff]  }
 0x314   :  { %1537 = vmatpush1.bf16.msra.mxu1 %v11819_v60  ;;  %v11902_v60 = vld [vmem:[%s15997_s1 + $0x2c4] ss:$8 sps:$4 sm:$0xff]  }
 0x315   :  { %1538 = vmatprep.subr.bf16.mxu1 %v11824_v61  ;;  %v11900_v61 = vld [vmem:[%s15997_s1 + $0x2c0] ss:$8 sps:$4 sm:$0xff]  }
 0x318   :  { %1539 = vmatpush1.bf16.msra.mxu1 %v11822_v62  ;;  %v11905_v62 = vld [vmem:[%s15997_s1 + $0x2d4] ss:$8 sps:$4 sm:$0xff]  }
 0x319   :  { %1540 = vmatprep.subr.bf16.mxu1 %v11827_v63  ;;  %v11903_v63 = vld [vmem:[%s15997_s1 + $0x2d0] ss:$8 sps:$4 sm:$0xff]  }
 0x31c   :  { %1541 = vmatpush1.bf16.msra.mxu1 %v11825_v0  ;;  %v11908_v0 = vld [vmem:[%s15997_s1 + $0x2e4] ss:$8 sps:$4 sm:$0xff]  }
 0x31d   :  { %1542 = vmatprep.subr.bf16.mxu1 %v11830_v1  ;;  %v11906_v1 = vld [vmem:[%s15997_s1 + $0x2e0] ss:$8 sps:$4 sm:$0xff]  }
 0x320   :  { %1543 = vmatpush1.bf16.msra.mxu1 %v11828_v2  ;;  %v11911_v2 = vld [vmem:[%s15997_s1 + $0x2f4] ss:$8 sps:$4 sm:$0xff]  }
 0x321   :  { %1544 = vmatprep.subr.bf16.mxu1 %v11833_v3  ;;  %v11909_v3 = vld [vmem:[%s15997_s1 + $0x2f0] ss:$8 sps:$4 sm:$0xff]  }
 0x324   :  { %1545 = vmatpush1.bf16.msra.mxu1 %v11831_v4  ;;  %v11914_v4 = vld [vmem:[%s15997_s1 + $0x304] ss:$8 sps:$4 sm:$0xff]  }
 0x325   :  { %1546 = vmatprep.subr.bf16.mxu1 %v11836_v5  ;;  %v11912_v5 = vld [vmem:[%s15997_s1 + $0x300] ss:$8 sps:$4 sm:$0xff]  }
 0x328   :  { %1547 = vmatpush1.bf16.msra.mxu1 %v11834_v6  ;;  %v11917_v6 = vld [vmem:[%s15997_s1 + $0x314] ss:$8 sps:$4 sm:$0xff]  }
 0x329   :  { %1548 = vmatprep.subr.bf16.mxu1 %v11839_v7  ;;  %v11915_v7 = vld [vmem:[%s15997_s1 + $0x310] ss:$8 sps:$4 sm:$0xff]  }
 0x32c   :  { %1549 = vmatpush1.bf16.msra.mxu1 %v11837_v8  ;;  %v11920_v8 = vld [vmem:[%s15997_s1 + $0x324] ss:$8 sps:$4 sm:$0xff]  }
 0x32d   :  { %1550 = vmatprep.subr.bf16.mxu1 %v11842_v9  ;;  %v11926_v9 = vld [vmem:[%s15997_s1 + $0x344] ss:$8 sps:$4 sm:$0xff]  }
 0x330   :  { %1551 = vmatpush1.bf16.msra.mxu1 %v11840_v10  ;;  %v11924_v10 = vld [vmem:[%s15997_s1 + $0x340] ss:$8 sps:$4 sm:$0xff]  }
 0x331   :  { %1552 = vmatprep.subr.bf16.mxu1 %v11845_v11  ;;  %v11929_v11 = vld [vmem:[%s15997_s1 + $0x354] ss:$8 sps:$4 sm:$0xff]  }
 0x334   :  { %1553 = vmatpush1.bf16.msra.mxu1 %v11843_v12  ;;  %v11927_v12 = vld [vmem:[%s15997_s1 + $0x350] ss:$8 sps:$4 sm:$0xff]  }
 0x335   :  { %1554 = vmatprep.subr.bf16.mxu1 %v11848_v13  ;;  %v11932_v13 = vld [vmem:[%s15997_s1 + $0x364] ss:$8 sps:$4 sm:$0xff]  }
 0x338   :  { %1555 = vmatpush1.bf16.msra.mxu1 %v11846_v14  ;;  %v11930_v14 = vld [vmem:[%s15997_s1 + $0x360] ss:$8 sps:$4 sm:$0xff]  }
 0x339   :  { %1556 = vmatprep.subr.bf16.mxu1 %v11851_v15  ;;  %v11935_v15 = vld [vmem:[%s15997_s1 + $0x374] ss:$8 sps:$4 sm:$0xff]  }
 0x33c   :  { %1557 = vmatpush1.bf16.msra.mxu1 %v11849_v16  ;;  %v11933_v16 = vld [vmem:[%s15997_s1 + $0x370] ss:$8 sps:$4 sm:$0xff]  }
 0x33d   :  { %1558 = vmatprep.subr.bf16.mxu1 %v11854_v17  ;;  %v11938_v17 = vld [vmem:[%s15997_s1 + $0x384] ss:$8 sps:$4 sm:$0xff]  }
 0x340   :  { %1559 = vmatpush1.bf16.msra.mxu1 %v11852_v18  ;;  %v11936_v18 = vld [vmem:[%s15997_s1 + $0x380] ss:$8 sps:$4 sm:$0xff]  }
 0x341   :  { %1560 = vmatprep.subr.bf16.mxu1 %v11857_v19  ;;  %v11941_v19 = vld [vmem:[%s15997_s1 + $0x394] ss:$8 sps:$4 sm:$0xff]  }
 0x344   :  { %1561 = vmatpush1.bf16.msra.mxu1 %v11855_v20  ;;  %v11939_v20 = vld [vmem:[%s15997_s1 + $0x390] ss:$8 sps:$4 sm:$0xff]  }
 0x345   :  { %1562 = vmatprep.subr.bf16.mxu1 %v11860_v21  ;;  %v11944_v21 = vld [vmem:[%s15997_s1 + $0x3a4] ss:$8 sps:$4 sm:$0xff]  }
 0x348   :  { %1563 = vmatpush1.bf16.msra.mxu1 %v11858_v22  ;;  %v11942_v22 = vld [vmem:[%s15997_s1 + $0x3a0] ss:$8 sps:$4 sm:$0xff]  }
 0x349   :  { %1564 = vmatprep.subr.bf16.mxu1 %v11863_v26  ;;  %v11947_v26 = vld [vmem:[%s15997_s1 + $0x3b4] ss:$8 sps:$4 sm:$0xff]  }
 0x34c   :  { %1565 = vmatpush1.bf16.msra.mxu1 %v11861_v31  ;;  %v11948_v31 = vld [vmem:[%s15997_s1 + $0x3c0] ss:$8 sps:$4 sm:$0xff]  }
 0x34d   :  { %1826 = vmatprep.subr.bf16.mxu1 %v11866_v33  ;;  %v11951_v33 = vld [vmem:[%s15997_s1 + $0x3d0] ss:$8 sps:$4 sm:$0xff]  }
 0x34f   :  { %1567 = vmatmul.mubr.bf16.vlgmr.msra.gmra.mrb[20].mxu1 %v1048_v43  ;;  %v11881_v43 = vld [vmem:[%s15997_s1 + $0x254] ss:$8 sps:$4 sm:$0xff]  }
 0x350   :  { %1827 = vmatpush1.bf16.msra.mxu1 %v11864_v34  ;;  %1858 = vmatprep.mubr.bf16.mxu1 %v1632_v53  ;;  %v11888_v53 = vld [vmem:[%s15997_s1 + $0x280] ss:$8 sps:$4 sm:$0xff]   ;;  %v11956_v34 = vld [vmem:[%s15997_s1 + $0x3e4] ss:$8 sps:$4 sm:$0xff]  }
 0x351   :  { %1828 = vmatprep.subr.bf16.mxu1 %v11869_v35  ;;  %v11954_v35 = vld [vmem:[%s15997_s1 + $0x3e0] ss:$8 sps:$4 sm:$0xff]  }
 0x354   :  { %1829 = vmatpush1.bf16.msra.mxu1 %v11867_v36  ;;  %v11959_v36 = vld [vmem:[%s15997_s1 + $0x3f4] ss:$8 sps:$4 sm:$0xff]  }
 0x355   :  { %1830 = vmatprep.subr.bf16.mxu1 %v11872_v37  ;;  %v11957_v37 = vld [vmem:[%s15997_s1 + $0x3f0] ss:$8 sps:$4 sm:$0xff]  }
 0x358   :  { %1831 = vmatpush1.bf16.msra.mxu1 %v11870_v38  ;;  %v12535_v38 = vmov 0.0  }
 0x359   :  { %1832 = vmatprep.subr.bf16.mxu1 %v11875_v39  ;;  %2279 = vmatprep.mubr.f32.mxu0 %v12535_v38 }
 0x35c   :  { %1833 = vmatpush1.bf16.msra.mxu1 %v11873_v40 }
 0x35d   :  { %1834 = vmatprep.subr.bf16.mxu1 %v11878_v41  ;;  %v2187_v41 = vld [vmem:[%s15998_s29 + $0x80] sm:$0xff] }
 0x360   :  { %1835 = vmatpush1.bf16.msra.mxu1 %v11876_v42  ;;  %v2188_v42 = vld [vmem:[%s15998_s29 + $0x88] sm:$0xff] }
 0x361   :  { %1836 = vmatprep.subr.bf16.mxu1 %v11881_v43 }
 0x364   :  { %1837 = vmatpush1.bf16.msra.mxu1 %v11879_v44  ;;  %v13365_v44 = vpack.c.bf16 %v2188_v42, %v2187_v41 }
 0x365   :  { %1838 = vmatprep.subr.bf16.mxu1 %v11884_v45  ;;  %v2171_v45 = vld [vmem:[%s15998_s29] sm:$0xff] }
 0x368   :  { %1839 = vmatpush1.bf16.msra.mxu1 %v11882_v47  ;;  %v2172_v47 = vld [vmem:[%s15998_s29 + $0x8] sm:$0xff] }
 0x369   :  { %1840 = vmatprep.subr.bf16.mxu1 %v11887_v50  ;;  %v2189_v50 = vld [vmem:[%s15998_s29 + $0x90] sm:$0xff] }
 0x36c   :  { %1841 = vmatpush1.bf16.msra.mxu1 %v11885_v51  ;;  %v2190_v51 = vld [vmem:[%s15998_s29 + $0x98] sm:$0xff] }
 0x36d   :  { %1842 = vmatprep.subr.bf16.mxu1 %v11890_v52  ;;  %v13379_v52 = vpack.c.bf16 %v2172_v47, %v2171_v45  ;;  %v2207_v47 = vld [vmem:[%s15999_s28 + $0x20] sm:$0xff] }
 0x370   :  { %1843 = vmatpush1.bf16.msra.mxu1 %v11888_v53  ;;  %v13382_v53 = vpack.c.bf16 %v2190_v51, %v2189_v50  ;;  %v2209_v50 = vld [vmem:[%s15999_s28 + $0x30] sm:$0xff] }
 0x371   :  { %1844 = vmatprep.subr.bf16.mxu1 %v11893_v54  ;;  %v2173_v54 = vld [vmem:[%s15998_s29 + $0x10] sm:$0xff]  ;;  %v13535_v51 = vpack.c.bf16 %v2209_v50, %v2207_v47  ;;  %v2781_v50 = vld [vmem:[%s15957_s10] sm:$0xf] }
 0x374   :  { %1845 = vmatpush1.bf16.msra.mxu1 %v11891_v55  ;;  %v2174_v55 = vld [vmem:[%s15998_s29 + $0x18] sm:$0xff] }
 0x375   :  { %1846 = vmatprep.subr.bf16.mxu1 %v11896_v56  ;;  %v2191_v56 = vld [vmem:[%s15998_s29 + $0xa0] sm:$0xff] }
 0x378   :  { %1847 = vmatpush1.bf16.msra.mxu1 %v11894_v57  ;;  %v2192_v57 = vld [vmem:[%s15998_s29 + $0xa8] sm:$0xff] }
 0x379   :  { %1848 = vmatprep.subr.bf16.mxu1 %v11899_v58  ;;  %v12536_v58 = vmov 1.0  }
 0x37c   :  { %1849 = vmatpush1.bf16.msra.mxu1 %v11897_v59  ;;  %v13399_v59 = vpack.c.bf16 %v2174_v55, %v2173_v54 }
 0x37d   :  { %1850 = vmatprep.subr.bf16.mxu1 %v11902_v60  ;;  %v13402_v60 = vpack.c.bf16 %v2192_v57, %v2191_v56 }
 0x380   :  { %1851 = vmatpush1.bf16.msra.mxu1 %v11900_v61  ;;  %v2175_v61 = vld [vmem:[%s15998_s29 + $0x20] sm:$0xff] }
 0x381   :  { %1852 = vmatprep.subr.bf16.mxu1 %v11905_v62  ;;  %v2176_v62 = vld [vmem:[%s15998_s29 + $0x28] sm:$0xff] }
 0x384   :  { %1853 = vmatpush1.bf16.msra.mxu1 %v11903_v63  ;;  %v2193_v63 = vld [vmem:[%s15998_s29 + $0xb0] sm:$0xff] }
 0x385   :  { %1854 = vmatprep.subr.bf16.mxu1 %v11908_v0  ;;  %v2194_v0 = vld [vmem:[%s15998_s29 + $0xb8] sm:$0xff] }
 0x388   :  { %1855 = vmatpush1.bf16.msra.mxu1 %v11906_v1  ;;  %v13417_v1 = vpack.c.bf16 %v2176_v62, %v2175_v61 }
 0x389   :  { %1856 = vmatprep.subr.bf16.mxu1 %v11911_v2  ;;  %v13420_v2 = vpack.c.bf16 %v2194_v0, %v2193_v63 }
 0x38c   :  { %1857 = vmatpush1.bf16.msra.mxu1 %v11909_v3  ;;  %v2177_v3 = vld [vmem:[%s15998_s29 + $0x30] sm:$0xff] }
 0x38d   :  { %2122 = vmatprep.subr.bf16.mxu1 %v11914_v4  ;;  %v2178_v4 = vld [vmem:[%s15998_s29 + $0x38] sm:$0xff] }
 0x38f   :  { %1859 = vmatmul.mubr.bf16.vlgmr.msra.gmra.mrb[20].mxu1 %v1631_v49  ;;  %v11921_v49 = vld [vmem:[%s15997_s1 + $0x330] ss:$8 sps:$4 sm:$0xff]  }
 0x390   :  { %2123 = vmatpush1.bf16.msra.mxu1 %v11912_v5  ;;  %2154 = vmatprep.mubr.bf16.mxu1 %v1928_v32  ;;  %v11953_v32 = vld [vmem:[%s15997_s1 + $0x3d4] ss:$8 sps:$4 sm:$0xff]   ;;  %v2195_v5 = vld [vmem:[%s15998_s29 + $0xc0] sm:$0xff] }
 0x391   :  { %2124 = vmatprep.subr.bf16.mxu1 %v11917_v6  ;;  %v2196_v6 = vld [vmem:[%s15998_s29 + $0xc8] sm:$0xff] }
 0x394   :  { %2125 = vmatpush1.bf16.msra.mxu1 %v11915_v7  ;;  %v13435_v7 = vpack.c.bf16 %v2178_v4, %v2177_v3 }
 0x395   :  { %2126 = vmatprep.subr.bf16.mxu1 %v11920_v8  ;;  %v13438_v8 = vpack.c.bf16 %v2196_v6, %v2195_v5 }
 0x398   :  { %2127 = vmatpush1.bf16.msra.mxu1 %v11918_v46  ;;  %v2179_v46 = vld [vmem:[%s15998_s29 + $0x40] sm:$0xff] }
 0x399   :  { %2128 = vmatprep.subr.bf16.mxu1 %v11923_v48  ;;  %v2180_v48 = vld [vmem:[%s15998_s29 + $0x48] sm:$0xff] }
 0x39c   :  { %2129 = vmatpush1.bf16.msra.mxu1 %v11921_v49  ;;  %v2197_v49 = vld [vmem:[%s15998_s29 + $0xd0] sm:$0xff] }
 0x39d   :  { %2130 = vmatprep.subr.bf16.mxu1 %v11926_v9  ;;  %v2198_v9 = vld [vmem:[%s15998_s29 + $0xd8] sm:$0xff] }
 0x3a0   :  { %2131 = vmatpush1.bf16.msra.mxu1 %v11924_v10  ;;  %v13453_v10 = vpack.c.bf16 %v2180_v48, %v2179_v46 }
 0x3a1   :  { %2132 = vmatprep.subr.bf16.mxu1 %v11929_v11  ;;  %v13456_v11 = vpack.c.bf16 %v2198_v9, %v2197_v49 }
 0x3a4   :  { %2133 = vmatpush1.bf16.msra.mxu1 %v11927_v12  ;;  %v2181_v12 = vld [vmem:[%s15998_s29 + $0x50] sm:$0xff] }
 0x3a5   :  { %2134 = vmatprep.subr.bf16.mxu1 %v11932_v13  ;;  %v2182_v13 = vld [vmem:[%s15998_s29 + $0x58] sm:$0xff] }
 0x3a8   :  { %2135 = vmatpush1.bf16.msra.mxu1 %v11930_v14  ;;  %v2199_v14 = vld [vmem:[%s15998_s29 + $0xe0] sm:$0xff] }
 0x3a9   :  { %2136 = vmatprep.subr.bf16.mxu1 %v11935_v15  ;;  %v2200_v15 = vld [vmem:[%s15998_s29 + $0xe8] sm:$0xff] }
 0x3ac   :  { %2137 = vmatpush1.bf16.msra.mxu1 %v11933_v16  ;;  %v13471_v16 = vpack.c.bf16 %v2182_v13, %v2181_v12 }
 0x3ad   :  { %2138 = vmatprep.subr.bf16.mxu1 %v11938_v17  ;;  %v13474_v17 = vpack.c.bf16 %v2200_v15, %v2199_v14  ;;  %v2170_v15 = vld [vmem:[%s16001_s2] sm:$0x1] }
 0x3b0   :  { %2139 = vmatpush1.bf16.msra.mxu1 %v11936_v18  ;;  %v2183_v18 = vld [vmem:[%s15998_s29 + $0x60] sm:$0xff] }
 0x3b1   :  { %2140 = vmatprep.subr.bf16.mxu1 %v11941_v19  ;;  %v2184_v19 = vld [vmem:[%s15998_s29 + $0x68] sm:$0xff] }
 0x3b4   :  { %2141 = vmatpush1.bf16.msra.mxu1 %v11939_v20  ;;  %v2201_v20 = vld [vmem:[%s15998_s29 + $0xf0] sm:$0xff] }
 0x3b5   :  { %2142 = vmatprep.subr.bf16.mxu1 %v11944_v21  ;;  %v2202_v21 = vld [vmem:[%s15998_s29 + $0xf8] sm:$0xff] }
 0x3b8   :  { %2143 = vmatpush1.bf16.msra.mxu1 %v11942_v22  ;;  %v13489_v22 = vpack.c.bf16 %v2184_v19, %v2183_v18 }
 0x3b9   :  { %2144 = vmatprep.subr.bf16.mxu1 %v11947_v26  ;;  %v13492_v26 = vpack.c.bf16 %v2202_v21, %v2201_v20 }
 0x3bc   :  { %2145 = vmatpush1.bf16.msra.mxu1 %v11945_v27  ;;  %v2185_v27 = vld [vmem:[%s15998_s29 + $0x70] sm:$0xff] }
 0x3bd   :  { %2146 = vmatprep.subr.bf16.mxu1 %v11950_v30  ;;  %v2186_v30 = vld [vmem:[%s15998_s29 + $0x78] sm:$0xff] }
 0x3c0   :  { %2147 = vmatpush1.bf16.msra.mxu1 %v11948_v31  ;;  %v11160_v31 = vpack.c.bf16 %v2186_v30, %v2185_v27 }
 0x3c1   :  { %2148 = vmatprep.subr.bf16.mxu1 %v11953_v32  ;;  %v2204_v32 = vld [vmem:[%s15999_s28 + $0x8] sm:$0xff] }
 0x3c4   :  { %2149 = vmatpush1.bf16.msra.mxu1 %v11951_v33  ;;  %v2206_v33 = vld [vmem:[%s15999_s28 + $0x18] sm:$0xff] }
 0x3c5   :  { %2150 = vmatprep.subr.bf16.mxu1 %v11956_v34  ;;  %v13508_v34 = vpack.c.bf16 %v2206_v33, %v2204_v32 }
 0x3c8   :  { %2151 = vmatpush1.bf16.msra.mxu1 %v11954_v35  ;;  %v2203_v35 = vld [vmem:[%s15999_s28] sm:$0xff] }
 0x3c9   :  { %2152 = vmatprep.subr.bf16.mxu1 %v11959_v36  ;;  %v2205_v36 = vld [vmem:[%s15999_s28 + $0x10] sm:$0xff] }
 0x3ca   :  { %v13517_v41 = vpack.c.bf16 %v2205_v36, %v2203_v35 }
 0x3cc   :  { %2153 = vmatpush1.bf16.msra.mxu1 %v11957_v37 }
 0x3cf   :  { %2155 = vmatmul.mubr.bf16.vlgmr.msra.gmra.mrb[20].mxu1 %v1927_v29 }
 0x3d0   :  { %3380 = vmatprep.mubr.bf16.mxu1 %v15980_v25 }
 0x4a2   :  { %v13347_v39 = vpop.f32.mrb[20].mxu1 }
 0x4a3   :  { %v13349_v40 = vpop.f32.mrb[21].mxu1 }
 0x4a4   :  { %v13357_v43 = vpop.f32.mrb[22].mxu1 }
 0x4a5   :  { %v11128_v24 = vpack.c.bf16 %v13357_v43, %v13347_v39  ;;  %v13361_v28 = vpop.f32.mrb[23].mxu1 }
 0x4a6   :  { %v11126_v29 = vpack.c.bf16 %v13361_v28, %v13349_v40 }
 0x4a8   :  { %11127 = vmatprep.subr.bf16.mxu0 %v11126_v29  ;;  %v2210_v29 = vld [vmem:[%s15999_s28 + $0x38] sm:$0xff] }
 0x4a9   :  { %11129 = vmatpush1.bf16.msra.mxu0 %v11128_v24  ;;  %v2208_v24 = vld [vmem:[%s15999_s28 + $0x28] sm:$0xff] }
 0x4aa   :  { %11131 = vmatprep.subr.bf16.mxu0 %v13365_v44  ;;  %v13527_v45 = vpack.c.bf16 %v2210_v29, %v2208_v24 }
 0x4ac   :  { %9344 = vmatmul.mubr.msk.f32.vlgmr.msra.gmra.mrb[20].mxu0 %vm2211_vm11, %v12536_v58 }
 0x4ad   :  { %11133 = vmatpush3.bf16.msra.mxu0 %v13379_v52 }
 0x4ae   :  { %11135 = vmatprep.subr.bf16.mxu0 %v13382_v53 }
 0x4b1   :  { %11137 = vmatpush3.bf16.msra.mxu0 %v13399_v59 }
 0x4b2   :  { %11139 = vmatprep.subr.bf16.mxu0 %v13402_v60 }
 0x4b5   :  { %11141 = vmatpush3.bf16.msra.mxu0 %v13417_v1 }
 0x4b6   :  { %11143 = vmatprep.subr.bf16.mxu0 %v13420_v2 }
 0x4b9   :  { %11145 = vmatpush3.bf16.msra.mxu0 %v13435_v7 }
 0x4ba   :  { %11147 = vmatprep.subr.bf16.mxu0 %v13438_v8 }
 0x4bd   :  { %11149 = vmatpush3.bf16.msra.mxu0 %v13453_v10 }
 0x4be   :  { %11151 = vmatprep.subr.bf16.mxu0 %v13456_v11 }
 0x4c1   :  { %11153 = vmatpush3.bf16.msra.mxu0 %v13471_v16 }
 0x4c2   :  { %11155 = vmatprep.subr.bf16.mxu0 %v13474_v17 }
 0x4c5   :  { %11157 = vmatpush3.bf16.msra.mxu0 %v13489_v22 }
 0x4c6   :  { %11159 = vmatprep.subr.bf16.mxu0 %v13492_v26 }
 0x4c9   :  { %11161 = vmatpush3.bf16.msra.mxu0 %v11160_v31 }
 0x4ca   :  { %11163 = vmatprep.subr.bf16.mxu0 %v13508_v34 }
 0x57f   :  { %v2281_v37 = vpop.f32.mrb[20].mxu0 }
 0x580   :  { %v2283_v42 = vpop.f32.mrb[21].mxu0 }
 0x581   :  { %2350 = vmatprep.mubr.f32.mxu0 %v2283_v42 }
 0x582   :  { %2351 = vmatmul.mubr.f32.vlgmr.msra.gmra.mrb[22].mxu0 %v2281_v37 }
 0x583   :  { %11165 = vmatpush1.bf16.msra.mxu0 %v13517_v41  ;;  %2424 = vmatprep.mubr.f32.mxu0 %v12535_v38 }
 0x584   :  { %11167 = vmatprep.subr.bf16.mxu0 %v13527_v45 }
 0x587   :  { %11169 = vmatpush1.bf16.msra.mxu0 %v13535_v51 }
 0x655   :  { %v10302_v54 = vpop.f32.mrb[22].mxu0 }
 0x656   :  { %v10303_v55 = vpop.f32.mrb[23].mxu0 }
 0x657   :  { %v10304_v56 = vadd.f32 %v10303_v55, %v10302_v54  ;;  %v11962_v54 = vld [vmem:[%s15958_s11 + $0x104] ss:$8 sps:$4 sm:$0xff]  }
 0x658   :  { %v9350_v55 = vld [vmem:[%s15957_s10 + $0x4] sm:$0xf] }
 0x659   :  { %v2356_v57 = vmul.f32 0.0078125, %v10304_v56  ;;  %v11960_v56 = vld [vmem:[%s15958_s11 + $0x100] ss:$8 sps:$4 sm:$0xff]  }
 0x65b   :  { %9345 = vmatmul.mubr.msk.f32.vlgmr.msra.gmra.mrb[24].mxu0 %vm1001_vm10, %v2356_v57 }
 0x65c   :  { %2511 = vmatprep.mubr.f32.mxu0 %v12535_v38 }
 0x72e   :  { %v2426_v61 = vpop.f32.mrb[24].mxu0 }
 0x72f   :  { %v2434_v62 = vrot.slane %v2426_v61, %v12892_v23  ;;  %v2428_v63 = vpop.f32.mrb[25].mxu0  ;;  %v11965_v61 = vld [vmem:[%s15958_s11 + $0x114] ss:$8 sps:$4 sm:$0xff]  }
 0x730   :  { %v2438_v0 = vrot.slane %v2428_v63, %v12892_v23  ;;  %v11968_v63 = vld [vmem:[%s15958_s11 + $0x124] ss:$8 sps:$4 sm:$0xff]  }
 0x731   :  { %v2439_v3 = vsub.f32 %v13347_v39, %v2434_v62  ;;  %v2441_v4 = vsub.f32 %v13357_v43, %v2434_v62  ;;  %v11963_v62 = vld [vmem:[%s15958_s11 + $0x110] ss:$8 sps:$4 sm:$0xff]  }
 0x732   :  { %v2440_v5 = vsub.f32 %v13349_v40, %v2438_v0  ;;  %v2442_v6 = vsub.f32 %v13361_v28, %v2438_v0  ;;  %v11966_v0 = vld [vmem:[%s15958_s11 + $0x120] ss:$8 sps:$4 sm:$0xff]  }
 0x733   :  { %v2443_v46 = vmul.f32 %v2439_v3, %v2439_v3  ;;  %v2445_v48 = vmul.f32 %v2441_v4, %v2441_v4  ;;  %v11971_v3 = vld [vmem:[%s15958_s11 + $0x134] ss:$8 sps:$4 sm:$0xff]   ;;  %v11969_v4 = vld [vmem:[%s15958_s11 + $0x130] ss:$8 sps:$4 sm:$0xff]  }
 0x734   :  { %v2444_v49 = vmul.f32 %v2440_v5, %v2440_v5  ;;  %v2446_v9 = vmul.f32 %v2442_v6, %v2442_v6  ;;  %v11974_v5 = vld [vmem:[%s15958_s11 + $0x144] ss:$8 sps:$4 sm:$0xff]   ;;  %v11972_v6 = vld [vmem:[%s15958_s11 + $0x140] ss:$8 sps:$4 sm:$0xff]  }
 0x735   :  { %v11172_v12 = vpack.c.bf16 %v2445_v48, %v2443_v46  ;;  %v11977_v46 = vld [vmem:[%s15958_s11 + $0x154] ss:$8 sps:$4 sm:$0xff]   ;;  %v11975_v48 = vld [vmem:[%s15958_s11 + $0x150] ss:$8 sps:$4 sm:$0xff]  }
 0x736   :  { %v11170_v13 = vpack.c.bf16 %v2446_v9, %v2444_v49  ;;  %v11980_v49 = vld [vmem:[%s15958_s11 + $0x164] ss:$8 sps:$4 sm:$0xff]   ;;  %v11978_v9 = vld [vmem:[%s15958_s11 + $0x160] ss:$8 sps:$4 sm:$0xff]  }
 0x738   :  { %11171 = vmatprep.subr.bf16.mxu0 %v11170_v13  ;;  %v11981_v13 = vld [vmem:[%s15958_s11 + $0x170] ss:$8 sps:$4 sm:$0xff]  }
 0x739   :  { %11173 = vmatpush1.bf16.msra.mxu0 %v11172_v12  ;;  %v11983_v12 = vld [vmem:[%s15958_s11 + $0x174] ss:$8 sps:$4 sm:$0xff]  }
 0x73a   :  { %11175 = vmatprep.subr.bf16.mxu0 %v13365_v44 }
 0x73c   :  { %9346 = vmatmul.mubr.msk.f32.vlgmr.msra.gmra.mrb[26].mxu0 %vm2211_vm11, %v12536_v58 }
 0x73d   :  { %11177 = vmatpush3.bf16.msra.mxu0 %v13379_v52 }
 0x73e   :  { %11179 = vmatprep.subr.bf16.mxu0 %v13382_v53 }
 0x741   :  { %11181 = vmatpush3.bf16.msra.mxu0 %v13399_v59 }
 0x742   :  { %11183 = vmatprep.subr.bf16.mxu0 %v13402_v60 }
 0x745   :  { %11185 = vmatpush3.bf16.msra.mxu0 %v13417_v1 }
 0x746   :  { %11187 = vmatprep.subr.bf16.mxu0 %v13420_v2 }
 0x749   :  { %11189 = vmatpush3.bf16.msra.mxu0 %v13435_v7 }
 0x74a   :  { %11191 = vmatprep.subr.bf16.mxu0 %v13438_v8  ;;  %v2169_v8 = vld [vmem:[%s16000_s27] sm:$0x1] }
 0x74d   :  { %11193 = vmatpush3.bf16.msra.mxu0 %v13453_v10 }
 0x74e   :  { %11195 = vmatprep.subr.bf16.mxu0 %v13456_v11 }
 0x751   :  { %11197 = vmatpush3.bf16.msra.mxu0 %v13471_v16 }
 0x752   :  { %11199 = vmatprep.subr.bf16.mxu0 %v13474_v17 }
 0x755   :  { %11201 = vmatpush3.bf16.msra.mxu0 %v13489_v22 }
 0x756   :  { %11203 = vmatprep.subr.bf16.mxu0 %v13492_v26 }
 0x759   :  { %11205 = vmatpush3.bf16.msra.mxu0 %v11160_v31 }
 0x75a   :  { %11207 = vmatprep.subr.bf16.mxu0 %v13508_v34 }
 0x80f   :  { %v2513_v44 = vpop.f32.mrb[26].mxu0 }
 0x810   :  { %v2515_v52 = vpop.f32.mrb[27].mxu0 }
 0x811   :  { %2582 = vmatprep.mubr.f32.mxu0 %v2515_v52  ;;  %v11984_v52 = vld [vmem:[%s15958_s11 + $0x180] ss:$8 sps:$4 sm:$0xff]  }
 0x812   :  { %2583 = vmatmul.mubr.f32.vlgmr.msra.gmra.mrb[28].mxu0 %v2513_v44  ;;  %v11986_v44 = vld [vmem:[%s15958_s11 + $0x184] ss:$8 sps:$4 sm:$0xff]  }
 0x813   :  { %11209 = vmatpush1.bf16.msra.mxu0 %v13517_v41  ;;  %2662 = vmatprep.mubr.f32.mxu0 %v12535_v38 }
 0x814   :  { %11211 = vmatprep.subr.bf16.mxu0 %v13527_v45 }
 0x817   :  { %11213 = vmatpush1.bf16.msra.mxu0 %v13535_v51 }
 0x818   :  { %11215 = vmatprep.subr.bf16.mxu0 %v13508_v34 }
 0x8e5   :  { %v10337_v53 = vpop.f32.mrb[28].mxu0 }
 0x8e6   :  { %v10338_v59 = vpop.f32.mrb[29].mxu0 }
 0x8e7   :  { %v10339_v60 = vadd.f32 %v10338_v59, %v10337_v53  ;;  %v11989_v53 = vld [vmem:[%s15958_s11 + $0x194] ss:$8 sps:$4 sm:$0xff]   ;;  %v11987_v59 = vld [vmem:[%s15958_s11 + $0x190] ss:$8 sps:$4 sm:$0xff]  }
 0x8e9   :  { %v2588_v1 = vmul.f32 0.0078125, %v10339_v60  ;;  %v11992_v60 = vld [vmem:[%s15958_s11 + $0x1a4] ss:$8 sps:$4 sm:$0xff]  }
 0x8eb   :  { %v2589_v2 = vmax.f32 %v2588_v1, 0.0  ;;  %v11990_v1 = vld [vmem:[%s15958_s11 + $0x1a0] ss:$8 sps:$4 sm:$0xff]  }
 0x8ed   :  { %v2590_v7 = vadd.f32 1e-05, %v2589_v2  ;;  %v11995_v2 = vld [vmem:[%s15958_s11 + $0x1b4] ss:$8 sps:$4 sm:$0xff]  }
 0x8ef   :  { %12504 = vrsqrt.f32 %v2590_v7  ;;  %v11993_v7 = vld [vmem:[%s15958_s11 + $0x1b0] ss:$8 sps:$4 sm:$0xff]  }
 0x8f9   :  { %v12505_v10 = vpop.eup %12504 }
 0x8fa   :  { %v2592_v11 = vmul.f32 %v12505_v10, %v2169_v8  ;;  %v11998_v8 = vld [vmem:[%s15958_s11 + $0x1c4] ss:$8 sps:$4 sm:$0xff]   ;;  %v11996_v10 = vld [vmem:[%s15958_s11 + $0x1c0] ss:$8 sps:$4 sm:$0xff]  }
 0x8fc   :  { %9347 = vmatmul.mubr.msk.f32.vlgmr.msra.gmra.mrb[30].mxu0 %vm1001_vm10, %v2592_v11  ;;  %v2593_v14 = vmul.f32 %v2592_v11, %v2356_v57  ;;  %v9514_v57 = vld [vmem:[%s15957_s10 + $0xc] sm:$0xf]  ;;  %v12001_v11 = vld [vmem:[%s15958_s11 + $0x1d4] ss:$8 sps:$4 sm:$0xff]  }
 0x8fd   :  { %11217 = vmatpush1.bf16.msra.mxu0 %v13517_v41  ;;  %2748 = vmatprep.mubr.f32.mxu0 %v12535_v38 }
 0x8fe   :  { %11219 = vmatprep.subr.bf16.mxu0 %v13527_v45  ;;  %v2594_v16 = vsub.f32 %v2170_v15, %v2593_v14  ;;  %v11999_v14 = vld [vmem:[%s15958_s11 + $0x1d0] ss:$8 sps:$4 sm:$0xff]   ;;  %v12004_v15 = vld [vmem:[%s15958_s11 + $0x1e4] ss:$8 sps:$4 sm:$0xff]  }
 0x901   :  { %11221 = vmatpush1.bf16.msra.mxu0 %v13535_v51  ;;  %v9448_v51 = vld [vmem:[%s15957_s10 + $0x8] sm:$0xf] }
 0x904   :  { %9348 = vmatmul.mubr.msk.f32.vlgmr.msra.gmra.mrb[32].mxu0 %vm1001_vm10, %v2594_v16  ;;  %v12002_v16 = vld [vmem:[%s15958_s11 + $0x1e0] ss:$8 sps:$4 sm:$0xff]   ;;  %vm7504_vm10 = vcmask 1042432  }
 0x905   :  { %2817 = vmatprep.mubr.bf16.mxu0 %v15980_v25 }
 0x9cf   :  { %v2664_v17 = vpop.f32.mrb[30].mxu0 }
 0x9d0   :  { %v2672_v18 = vrot.slane %v2664_v17, %v12892_v23  ;;  %v2666_v19 = vpop.f32.mrb[31].mxu0  ;;  %v12007_v17 = vld [vmem:[%s15958_s11 + $0x1f4] ss:$8 sps:$4 sm:$0xff]  }
 0x9d1   :  { %v2676_v20 = vrot.slane %v2666_v19, %v12892_v23  ;;  %v12010_v19 = vld [vmem:[%s15958_s11 + $0x4] ss:$8 sps:$4 sm:$0xff]  }
 0x9d2   :  { %v2677_v21 = vmul.f32 %v2672_v18, %v13347_v39  ;;  %v2679_v22 = vmul.f32 %v2672_v18, %v13357_v43  ;;  %v12005_v18 = vld [vmem:[%s15958_s11 + $0x1f0] ss:$8 sps:$4 sm:$0xff]  }
 0x9d3   :  { %v2678_v26 = vmul.f32 %v2676_v20, %v13349_v40  ;;  %v2680_v27 = vmul.f32 %v2676_v20, %v13361_v28 }
 0x9d7   :  { %v2750_v30 = vpop.f32.mrb[32].mxu0 }
 0x9d8   :  { %v2758_v31 = vrot.slane %v2750_v30, %v12892_v23  ;;  %v2752_v32 = vpop.f32.mrb[33].mxu0 }
 0x9d9   :  { %v2762_v33 = vrot.slane %v2752_v32, %v12892_v23 }
 0x9da   :  { %v2763_v34 = vadd.f32 %v2758_v31, %v2677_v21  ;;  %v2765_v35 = vadd.f32 %v2758_v31, %v2679_v22 }
 0x9db   :  { %v2764_v36 = vadd.f32 %v2762_v33, %v2678_v26  ;;  %v2766_v37 = vadd.f32 %v2762_v33, %v2680_v27 }
 0x9dc   :  { %vm2767_vm12 = vcmp.gt.f32.partialorder %v2763_v34, 0.0  ;;  %vm2769_vm13 = vcmp.gt.f32.partialorder %v2765_v35, 0.0  ;;  %v2771_v41 = vmul.f32 0.2, %v2763_v34  ;;  %v2773_v39 = vmul.f32 0.2, %v2765_v35 }
 0x9dd   :  { %vm2768_vm14 = vcmp.gt.f32.partialorder %v2764_v36, 0.0  ;;  %vm2770_vm15 = vcmp.gt.f32.partialorder %v2766_v37, 0.0  ;;  %v2772_v43 = vmul.f32 0.2, %v2764_v36  ;;  %v2774_v40 = vmul.f32 0.2, %v2766_v37 }
 0x9de   :  { %v2775_v42 = vsel %vm2767_vm12, %v2763_v34, %v2771_v41  ;;  %v2777_v28 = vsel %vm2769_vm13, %v2765_v35, %v2773_v39 }
 0x9df   :  { %v2776_v24 = vsel %vm2768_vm14, %v2764_v36, %v2772_v43  ;;  %v2778_v29 = vsel %vm2770_vm15, %v2766_v37, %v2774_v40  ;;  %v2779_v45 = vpack.c.bf16 %v2777_v28, %v2775_v42  ;;  %v12008_v37 = vld [vmem:[%s15958_s11] ss:$8 sps:$4 sm:$0xff]   ;;  %v12013_v43 = vld [vmem:[%s15958_s11 + $0x14] ss:$8 sps:$4 sm:$0xff]   ;;  %v12011_v42 = vld [vmem:[%s15958_s11 + $0x10] ss:$8 sps:$4 sm:$0xff]  }
 0x9e0   :  { %v2780_v47 = vpack.c.bf16 %v2778_v29, %v2776_v24  ;;  %v12016_v28 = vld [vmem:[%s15958_s11 + $0x24] ss:$8 sps:$4 sm:$0xff]   ;;  %v12014_v24 = vld [vmem:[%s15958_s11 + $0x20] ss:$8 sps:$4 sm:$0xff]   ;;  %v12019_v29 = vld [vmem:[%s15958_s11 + $0x34] ss:$8 sps:$4 sm:$0xff]  }
 0x9e2   :  { %2785 = vmatprep.subr.bf16.mxu0 %v2780_v47  ;;  %3348 = vmatprep.subr.bf16.mxu1 %v2780_v47 }
 0x9e3   :  { %2786 = vmatpush1.bf16.msra.mxu0 %v2779_v45  ;;  %3349 = vmatpush1.bf16.msra.mxu1 %v2779_v45 }
 0x9e4   :  { %2865 = vmatprep.subr.bf16.mxu0 %v2780_v47  ;;  %3632 = vmatprep.subr.bf16.mxu1 %v2780_v47  ;;  %v12022_v47 = vld [vmem:[%s15958_s11 + $0x44] ss:$8 sps:$4 sm:$0xff]  }
 0x9e6   :  { %9349 = vmatmul.mubr.msk.bf16.vlgmr.msra.gmra.mrb[36].mxu0 %vm2211_vm11, %v2781_v50  ;;  %9449 = vmatmul.mubr.msk.bf16.vlgmr.msra.gmra.mrb[24].mxu1 %vm2211_vm11, %v9448_v51  ;;  %v12020_v50 = vld [vmem:[%s15958_s11 + $0x40] ss:$8 sps:$4 sm:$0xff]   ;;  %v12025_v51 = vld [vmem:[%s15958_s11 + $0x54] ss:$8 sps:$4 sm:$0xff]  }
 0x9e7   :  { %2866 = vmatpush1.bf16.msra.mxu0 %v2779_v45  ;;  %3633 = vmatpush1.bf16.msra.mxu1 %v2779_v45  ;;  %v12017_v45 = vld [vmem:[%s15958_s11 + $0x30] ss:$8 sps:$4 sm:$0xff]  }
 0x9e8   :  { %2897 = vmatprep.mubr.bf16.mxu0 %v15980_v25  ;;  %3101 = vmatprep.subr.bf16.mxu0 %v11962_v54  ;;  %v12023_v54 = vld [vmem:[%s15958_s11 + $0x50] ss:$8 sps:$4 sm:$0xff]  }
 0x9e9   :  { %3664 = vmatprep.mubr.bf16.mxu1 %v15980_v25 }
 0x9ee   :  { %9351 = vmatmul.mubr.msk.bf16.vlgmr.msra.gmra.mrb[40].mxu0 %vm2211_vm11, %v9350_v55  ;;  %9515 = vmatmul.mubr.msk.bf16.vlgmr.msra.gmra.mrb[28].mxu1 %vm2211_vm11, %v9514_v57  ;;  %v12028_v55 = vld [vmem:[%s15958_s11 + $0x64] ss:$8 sps:$4 sm:$0xff]   ;;  %v12031_v57 = vld [vmem:[%s15958_s11 + $0x74] ss:$8 sps:$4 sm:$0xff]   ;;  %vm8966_vm11 = vcmask 11264  }
 0x9ef   :  { %3102 = vmatpush1.bf16.msra.mxu0 %v11960_v56  ;;  %4028 = vmatprep.mubr.f32.mxu1 %v12535_v38  ;;  %v12026_v56 = vld [vmem:[%s15958_s11 + $0x60] ss:$8 sps:$4 sm:$0xff]  }
 0x9f0   :  { %3103 = vmatprep.subr.bf16.mxu0 %v11965_v61  ;;  %v12029_v61 = vld [vmem:[%s15958_s11 + $0x70] ss:$8 sps:$4 sm:$0xff]  }
 0x9f3   :  { %3104 = vmatpush1.bf16.msra.mxu0 %v11963_v62  ;;  %v12034_v62 = vld [vmem:[%s15958_s11 + $0x84] ss:$8 sps:$4 sm:$0xff]  }
 0x9f4   :  { %3105 = vmatprep.subr.bf16.mxu0 %v11968_v63  ;;  %v12032_v63 = vld [vmem:[%s15958_s11 + $0x80] ss:$8 sps:$4 sm:$0xff]  }
 0x9f7   :  { %3106 = vmatpush1.bf16.msra.mxu0 %v11966_v0  ;;  %v12037_v0 = vld [vmem:[%s15958_s11 + $0x94] ss:$8 sps:$4 sm:$0xff]  }
 0x9f8   :  { %3107 = vmatprep.subr.bf16.mxu0 %v11971_v3  ;;  %v12035_v3 = vld [vmem:[%s15958_s11 + $0x90] ss:$8 sps:$4 sm:$0xff]  }
 0x9fb   :  { %3108 = vmatpush1.bf16.msra.mxu0 %v11969_v4  ;;  %v12040_v4 = vld [vmem:[%s15958_s11 + $0xa4] ss:$8 sps:$4 sm:$0xff]  }
 0x9fc   :  { %3109 = vmatprep.subr.bf16.mxu0 %v11974_v5  ;;  %v12038_v5 = vld [vmem:[%s15958_s11 + $0xa0] ss:$8 sps:$4 sm:$0xff]  }
 0x9ff   :  { %3110 = vmatpush1.bf16.msra.mxu0 %v11972_v6  ;;  %v12043_v6 = vld [vmem:[%s15958_s11 + $0xb4] ss:$8 sps:$4 sm:$0xff]  }
 0xa00   :  { %3111 = vmatprep.subr.bf16.mxu0 %v11977_v46  ;;  %v12041_v46 = vld [vmem:[%s15958_s11 + $0xb0] ss:$8 sps:$4 sm:$0xff]  }
 0xa03   :  { %3112 = vmatpush1.bf16.msra.mxu0 %v11975_v48  ;;  %v12046_v48 = vld [vmem:[%s15958_s11 + $0xc4] ss:$8 sps:$4 sm:$0xff]  }
 0xa04   :  { %3113 = vmatprep.subr.bf16.mxu0 %v11980_v49  ;;  %v12044_v49 = vld [vmem:[%s15958_s11 + $0xc0] ss:$8 sps:$4 sm:$0xff]  }
 0xa07   :  { %3114 = vmatpush1.bf16.msra.mxu0 %v11978_v9  ;;  %v12049_v9 = vld [vmem:[%s15958_s11 + $0xd4] ss:$8 sps:$4 sm:$0xff]  }
 0xa08   :  { %3115 = vmatprep.subr.bf16.mxu0 %v11983_v12  ;;  %v12047_v12 = vld [vmem:[%s15958_s11 + $0xd0] ss:$8 sps:$4 sm:$0xff]  }
 0xa0b   :  { %3116 = vmatpush1.bf16.msra.mxu0 %v11981_v13  ;;  %v12052_v13 = vld [vmem:[%s15958_s11 + $0xe4] ss:$8 sps:$4 sm:$0xff]  }
 0xa0c   :  { %3117 = vmatprep.subr.bf16.mxu0 %v11986_v44  ;;  %v12050_v44 = vld [vmem:[%s15958_s11 + $0xe0] ss:$8 sps:$4 sm:$0xff]  }
 0xa0f   :  { %3118 = vmatpush1.bf16.msra.mxu0 %v11984_v52 }
 0xa10   :  { %3119 = vmatprep.subr.bf16.mxu0 %v11989_v53  ;;  %v12055_v53 = vld [vmem:[%s15958_s11 + $0xf4] ss:$8 sps:$4 sm:$0xff]  }
 0xa13   :  { %3120 = vmatpush1.bf16.msra.mxu0 %v11987_v59 }
 0xa14   :  { %3121 = vmatprep.subr.bf16.mxu0 %v11992_v60 }
 0xa17   :  { %3122 = vmatpush1.bf16.msra.mxu0 %v11990_v1 }
 0xa18   :  { %3123 = vmatprep.subr.bf16.mxu0 %v11995_v2  ;;  %v12053_v2 = vld [vmem:[%s15958_s11 + $0xf0] ss:$8 sps:$4 sm:$0xff]  }
 0xa1b   :  { %3124 = vmatpush1.bf16.msra.mxu0 %v11993_v7  ;;  %v12058_v7 = vld [vmem:[%s15958_s11 + $0x204] ss:$8 sps:$4 sm:$0xff]  }
 0xa1c   :  { %3125 = vmatprep.subr.bf16.mxu0 %v11998_v8  ;;  %v12056_v8 = vld [vmem:[%s15958_s11 + $0x200] ss:$8 sps:$4 sm:$0xff]  }
 0xa1f   :  { %3126 = vmatpush1.bf16.msra.mxu0 %v11996_v10 }
 0xa20   :  { %3127 = vmatprep.subr.bf16.mxu0 %v12001_v11 }
 0xa23   :  { %3128 = vmatpush1.bf16.msra.mxu0 %v11999_v14  ;;  %v12061_v14 = vld [vmem:[%s15958_s11 + $0x214] ss:$8 sps:$4 sm:$0xff]  }
 0xa24   :  { %3129 = vmatprep.subr.bf16.mxu0 %v12004_v15  ;;  %v12059_v15 = vld [vmem:[%s15958_s11 + $0x210] ss:$8 sps:$4 sm:$0xff]  }
 0xa27   :  { %3130 = vmatpush1.bf16.msra.mxu0 %v12002_v16  ;;  %v12064_v16 = vld [vmem:[%s15958_s11 + $0x224] ss:$8 sps:$4 sm:$0xff]  }
 0xa28   :  { %3131 = vmatprep.subr.bf16.mxu0 %v12007_v17  ;;  %v12062_v17 = vld [vmem:[%s15958_s11 + $0x220] ss:$8 sps:$4 sm:$0xff]  }
 0xa2b   :  { %3132 = vmatpush1.bf16.msra.mxu0 %v12005_v18  ;;  %v12067_v18 = vld [vmem:[%s15958_s11 + $0x234] ss:$8 sps:$4 sm:$0xff]  }
 0xa2c   :  { %3302 = vmatprep.subr.bf16.mxu0 %v12010_v19  ;;  %v12065_v19 = vld [vmem:[%s15958_s11 + $0x230] ss:$8 sps:$4 sm:$0xff]  }
 0xab9   :  { %v13709_v20 = vpop.f32.mrb[36].mxu0  ;;  %v13711_v27 = vpop.f32.mrb[24].mxu1 }
 0xaba   :  { %v2821_v21 = vpop.f32.mrb[37].mxu0  ;;  %v13713_v30 = vpop.f32.mrb[25].mxu1  ;;  %v2826_v11 = vpack.c.bf16 %v13709_v20, %v13709_v20  ;;  %v12070_v20 = vld [vmem:[%s15958_s11 + $0x244] ss:$8 sps:$4 sm:$0xff]  }
 0xabb   :  { %v2823_v22 = vpop.f32.mrb[38].mxu0  ;;  %v3386_v31 = vpop.f32.mrb[26].mxu1  ;;  %v2827_v40 = vpack.c.bf16 %v2821_v21, %v2821_v21  ;;  %v3390_v10 = vpack.c.bf16 %v13713_v30, %v13713_v30  ;;  %v12068_v21 = vld [vmem:[%s15958_s11 + $0x240] ss:$8 sps:$4 sm:$0xff]   ;;  %v12076_v30 = vld [vmem:[%s15958_s11 + $0x264] ss:$8 sps:$4 sm:$0xff]  }
 0xabc   :  { %v2824_v26 = vpop.f32.mrb[39].mxu0  ;;  %v3387_v33 = vpop.f32.mrb[27].mxu1  ;;  %v12073_v22 = vld [vmem:[%s15958_s11 + $0x254] ss:$8 sps:$4 sm:$0xff]   ;;  %v12074_v31 = vld [vmem:[%s15958_s11 + $0x260] ss:$8 sps:$4 sm:$0xff]  }
 0xabd   :  { %v12071_v26 = vld [vmem:[%s15958_s11 + $0x250] ss:$8 sps:$4 sm:$0xff]  }
 0xabe   :  { %v12077_v33 = vld [vmem:[%s15958_s11 + $0x270] ss:$8 sps:$4 sm:$0xff]  }
 0xac1   :  { %v2899_v32 = vpop.f32.mrb[40].mxu0  ;;  %v13802_v52 = vpop.f32.mrb[28].mxu1 }
 0xac2   :  { %v2901_v34 = vpop.f32.mrb[41].mxu0  ;;  %v2906_v41 = vpack.c.bf16 %v2899_v32, %v2899_v32  ;;  %v13807_v59 = vpop.f32.mrb[29].mxu1  ;;  %v12079_v32 = vld [vmem:[%s15958_s11 + $0x274] ss:$8 sps:$4 sm:$0xff]  }
 0xac3   :  { %v2907_v35 = vpack.c.bf16 %v2901_v34, %v2901_v34  ;;  %v2903_v36 = vpop.f32.mrb[42].mxu0  ;;  %v3670_v60 = vpop.f32.mrb[30].mxu1  ;;  %v12082_v34 = vld [vmem:[%s15958_s11 + $0x284] ss:$8 sps:$4 sm:$0xff]  }
 0xac4   :  { %v2904_v39 = vpop.f32.mrb[43].mxu0  ;;  %v3671_v1 = vpop.f32.mrb[31].mxu1  ;;  %v12085_v36 = vld [vmem:[%s15958_s11 + $0x294] ss:$8 sps:$4 sm:$0xff]   ;;  %v12136_v60 = vld [vmem:[%s15958_s11 + $0x3a4] ss:$8 sps:$4 sm:$0xff]  }
 0xac5   :  { %3133 = vmatprep.mubr.bf16.mxu0 %v2907_v35  ;;  %v12080_v35 = vld [vmem:[%s15958_s11 + $0x280] ss:$8 sps:$4 sm:$0xff]  }
 0xac6   :  { %3134 = vmatmul.mubr.bf16.vlgmr.msra.gmra.mrb[44].mxu0 %v2906_v41  ;;  %v12088_v41 = vld [vmem:[%s15958_s11 + $0x2a4] ss:$8 sps:$4 sm:$0xff]   ;;  %v12086_v39 = vld [vmem:[%s15958_s11 + $0x2a0] ss:$8 sps:$4 sm:$0xff]  }
 0xac7   :  { %3303 = vmatpush1.bf16.msra.mxu0 %v12008_v37  ;;  %3334 = vmatprep.mubr.bf16.mxu0 %v2827_v40  ;;  %v12083_v37 = vld [vmem:[%s15958_s11 + $0x290] ss:$8 sps:$4 sm:$0xff]   ;;  %v12134_v1 = vld [vmem:[%s15958_s11 + $0x3a0] ss:$8 sps:$4 sm:$0xff]  }
 0xac8   :  { %3304 = vmatprep.subr.bf16.mxu0 %v12013_v43  ;;  %v12091_v43 = vld [vmem:[%s15958_s11 + $0x2b4] ss:$8 sps:$4 sm:$0xff]   ;;  %v12089_v40 = vld [vmem:[%s15958_s11 + $0x2b0] ss:$8 sps:$4 sm:$0xff]  }
 0xacb   :  { %3305 = vmatpush1.bf16.msra.mxu0 %v12011_v42  ;;  %v12094_v42 = vld [vmem:[%s15958_s11 + $0x2c4] ss:$8 sps:$4 sm:$0xff]  }
 0xacc   :  { %3306 = vmatprep.subr.bf16.mxu0 %v12016_v28  ;;  %v12092_v28 = vld [vmem:[%s15958_s11 + $0x2c0] ss:$8 sps:$4 sm:$0xff]  }
 0xacf   :  { %3307 = vmatpush1.bf16.msra.mxu0 %v12014_v24  ;;  %v12097_v24 = vld [vmem:[%s15958_s11 + $0x2d4] ss:$8 sps:$4 sm:$0xff]  }
 0xad0   :  { %3308 = vmatprep.subr.bf16.mxu0 %v12019_v29  ;;  %v12095_v29 = vld [vmem:[%s15958_s11 + $0x2d0] ss:$8 sps:$4 sm:$0xff]  }
 0xad3   :  { %3309 = vmatpush1.bf16.msra.mxu0 %v12017_v45  ;;  %v12100_v45 = vld [vmem:[%s15958_s11 + $0x2e4] ss:$8 sps:$4 sm:$0xff]  }
 0xad4   :  { %3310 = vmatprep.subr.bf16.mxu0 %v12022_v47  ;;  %v12098_v47 = vld [vmem:[%s15958_s11 + $0x2e0] ss:$8 sps:$4 sm:$0xff]  }
 0xad7   :  { %3311 = vmatpush1.bf16.msra.mxu0 %v12020_v50  ;;  %v12103_v50 = vld [vmem:[%s15958_s11 + $0x2f4] ss:$8 sps:$4 sm:$0xff]  }
 0xad8   :  { %3312 = vmatprep.subr.bf16.mxu0 %v12025_v51  ;;  %v12101_v51 = vld [vmem:[%s15958_s11 + $0x2f0] ss:$8 sps:$4 sm:$0xff]  }
 0xadb   :  { %3313 = vmatpush1.bf16.msra.mxu0 %v12023_v54  ;;  %v12106_v54 = vld [vmem:[%s15958_s11 + $0x304] ss:$8 sps:$4 sm:$0xff]  }
 0xadc   :  { %3314 = vmatprep.subr.bf16.mxu0 %v12028_v55  ;;  %v3389_v55 = vpack.c.bf16 %v13711_v27, %v13711_v27  ;;  %v12112_v27 = vld [vmem:[%s15958_s11 + $0x324] ss:$8 sps:$4 sm:$0xff]  }
 0xadf   :  { %3315 = vmatpush1.bf16.msra.mxu0 %v12026_v56  ;;  %v12104_v56 = vld [vmem:[%s15958_s11 + $0x300] ss:$8 sps:$4 sm:$0xff]  }
 0xae0   :  { %3316 = vmatprep.subr.bf16.mxu0 %v12031_v57  ;;  %v3674_v57 = vpack.c.bf16 %v13807_v59, %v13807_v59  ;;  %v12131_v59 = vld [vmem:[%s15958_s11 + $0x390] ss:$8 sps:$4 sm:$0xff]  }
 0xae3   :  { %3317 = vmatpush1.bf16.msra.mxu0 %v12029_v61  ;;  %v12109_v61 = vld [vmem:[%s15958_s11 + $0x314] ss:$8 sps:$4 sm:$0xff]  }
 0xae4   :  { %3318 = vmatprep.subr.bf16.mxu0 %v12034_v62  ;;  %v12107_v62 = vld [vmem:[%s15958_s11 + $0x310] ss:$8 sps:$4 sm:$0xff]  }
 0xae7   :  { %3319 = vmatpush1.bf16.msra.mxu0 %v12032_v63  ;;  %v12110_v63 = vld [vmem:[%s15958_s11 + $0x320] ss:$8 sps:$4 sm:$0xff]  }
 0xae8   :  { %3320 = vmatprep.subr.bf16.mxu0 %v12037_v0  ;;  %v12115_v0 = vld [vmem:[%s15958_s11 + $0x334] ss:$8 sps:$4 sm:$0xff]  }
 0xaeb   :  { %3321 = vmatpush1.bf16.msra.mxu0 %v12035_v3  ;;  %v12113_v3 = vld [vmem:[%s15958_s11 + $0x330] ss:$8 sps:$4 sm:$0xff]  }
 0xaec   :  { %3322 = vmatprep.subr.bf16.mxu0 %v12040_v4  ;;  %v12118_v4 = vld [vmem:[%s15958_s11 + $0x344] ss:$8 sps:$4 sm:$0xff]  }
 0xaef   :  { %3323 = vmatpush1.bf16.msra.mxu0 %v12038_v5  ;;  %v12116_v5 = vld [vmem:[%s15958_s11 + $0x340] ss:$8 sps:$4 sm:$0xff]  }
 0xaf0   :  { %3324 = vmatprep.subr.bf16.mxu0 %v12043_v6  ;;  %v12121_v6 = vld [vmem:[%s15958_s11 + $0x354] ss:$8 sps:$4 sm:$0xff]  }
 0xaf3   :  { %3325 = vmatpush1.bf16.msra.mxu0 %v12041_v46  ;;  %v12119_v46 = vld [vmem:[%s15958_s11 + $0x350] ss:$8 sps:$4 sm:$0xff]  }
 0xaf4   :  { %3326 = vmatprep.subr.bf16.mxu0 %v12046_v48  ;;  %v12124_v48 = vld [vmem:[%s15958_s11 + $0x364] ss:$8 sps:$4 sm:$0xff]  }
 0xaf7   :  { %3327 = vmatpush1.bf16.msra.mxu0 %v12044_v49  ;;  %v12122_v49 = vld [vmem:[%s15958_s11 + $0x360] ss:$8 sps:$4 sm:$0xff]  }
 0xaf8   :  { %3328 = vmatprep.subr.bf16.mxu0 %v12049_v9  ;;  %v12127_v9 = vld [vmem:[%s15958_s11 + $0x374] ss:$8 sps:$4 sm:$0xff]  }
 0xafb   :  { %3329 = vmatpush1.bf16.msra.mxu0 %v12047_v12  ;;  %v12125_v12 = vld [vmem:[%s15958_s11 + $0x370] ss:$8 sps:$4 sm:$0xff]  }
 0xafc   :  { %3330 = vmatprep.subr.bf16.mxu0 %v12052_v13  ;;  %v12130_v13 = vld [vmem:[%s15958_s11 + $0x384] ss:$8 sps:$4 sm:$0xff]  }
 0xaff   :  { %3331 = vmatpush1.bf16.msra.mxu0 %v12050_v44  ;;  %v12128_v44 = vld [vmem:[%s15958_s11 + $0x380] ss:$8 sps:$4 sm:$0xff]  }
 0xb00   :  { %3332 = vmatprep.subr.bf16.mxu0 %v12055_v53  ;;  %v12133_v53 = vld [vmem:[%s15958_s11 + $0x394] ss:$8 sps:$4 sm:$0xff]  }
 0xb03   :  { %3333 = vmatpush1.bf16.msra.mxu0 %v12053_v2  ;;  %v12139_v2 = vld [vmem:[%s15958_s11 + $0x3b4] ss:$8 sps:$4 sm:$0xff]  }
 0xb04   :  { %3584 = vmatprep.subr.bf16.mxu0 %v12058_v7  ;;  %v12137_v7 = vld [vmem:[%s15958_s11 + $0x3b0] ss:$8 sps:$4 sm:$0xff]  }
 0xb06   :  { %3335 = vmatmul.mubr.bf16.vlgmr.msra.gmra.mrb[44].mxu0 %v2826_v11  ;;  %v12145_v11 = vld [vmem:[%s15958_s11 + $0x3d4] ss:$8 sps:$4 sm:$0xff]  }
 0xb07   :  { %3585 = vmatpush1.bf16.msra.mxu0 %v12056_v8  ;;  %3616 = vmatprep.mubr.bf16.mxu0 %v3390_v10  ;;  %v12142_v8 = vld [vmem:[%s15958_s11 + $0x3c4] ss:$8 sps:$4 sm:$0xff]   ;;  %v12140_v10 = vld [vmem:[%s15958_s11 + $0x3c0] ss:$8 sps:$4 sm:$0xff]  }
 0xb08   :  { %3586 = vmatprep.subr.bf16.mxu0 %v12061_v14  ;;  %v12143_v14 = vld [vmem:[%s15958_s11 + $0x3d0] ss:$8 sps:$4 sm:$0xff]  }
 0xb0b   :  { %3587 = vmatpush1.bf16.msra.mxu0 %v12059_v15  ;;  %v12148_v15 = vld [vmem:[%s15958_s11 + $0x3e4] ss:$8 sps:$4 sm:$0xff]  }
 0xb0c   :  { %3588 = vmatprep.subr.bf16.mxu0 %v12064_v16  ;;  %v12146_v16 = vld [vmem:[%s15958_s11 + $0x3e0] ss:$8 sps:$4 sm:$0xff]  }
 0xb0f   :  { %3589 = vmatpush1.bf16.msra.mxu0 %v12062_v17  ;;  %v12151_v17 = vld [vmem:[%s15958_s11 + $0x3f4] ss:$8 sps:$4 sm:$0xff]  }
 0xb10   :  { %3590 = vmatprep.subr.bf16.mxu0 %v12067_v18  ;;  %v12149_v18 = vld [vmem:[%s15958_s11 + $0x3f0] ss:$8 sps:$4 sm:$0xff]  }
 0xb13   :  { %3591 = vmatpush1.bf16.msra.mxu0 %v12065_v19  ;;  %v3673_v19 = vpack.c.bf16 %v13802_v52, %v13802_v52  ;;  %v3931_v52 = vld [vmem:[%s15961_s14 + $0x90] sm:$0xff] }
 0xb14   :  { %3592 = vmatprep.subr.bf16.mxu0 %v12070_v20  ;;  %v3929_v20 = vld [vmem:[%s15961_s14 + $0x80] sm:$0xff] }
 0xb17   :  { %3593 = vmatpush1.bf16.msra.mxu0 %v12068_v21  ;;  %v3930_v21 = vld [vmem:[%s15961_s14 + $0x88] sm:$0xff] }
 0xb18   :  { %3594 = vmatprep.subr.bf16.mxu0 %v12073_v22  ;;  %v3913_v22 = vld [vmem:[%s15961_s14] sm:$0xff] }
 0xb1b   :  { %3595 = vmatpush1.bf16.msra.mxu0 %v12071_v26  ;;  %v3914_v26 = vld [vmem:[%s15961_s14 + $0x8] sm:$0xff] }
 0xb1c   :  { %3596 = vmatprep.subr.bf16.mxu0 %v12076_v30  ;;  %v3932_v30 = vld [vmem:[%s15961_s14 + $0x98] sm:$0xff] }
 0xb1f   :  { %3597 = vmatpush1.bf16.msra.mxu0 %v12074_v31 }
 0xb20   :  { %3598 = vmatprep.subr.bf16.mxu0 %v12079_v32  ;;  %v14034_v32 = vpack.c.bf16 %v3930_v21, %v3929_v20 }
 0xb23   :  { %3599 = vmatpush1.bf16.msra.mxu0 %v12077_v33 }
 0xb24   :  { %3600 = vmatprep.subr.bf16.mxu0 %v12082_v34  ;;  %v14038_v34 = vpack.c.bf16 %v3914_v26, %v3913_v22  ;;  %v3949_v26 = vld [vmem:[%s15962_s15 + $0x20] sm:$0xff] }
 0xb27   :  { %3601 = vmatpush1.bf16.msra.mxu0 %v12080_v35 }
 0xb28   :  { %3602 = vmatprep.subr.bf16.mxu0 %v12085_v36  ;;  %v14041_v36 = vpack.c.bf16 %v3932_v30, %v3931_v52  ;;  %v3951_v52 = vld [vmem:[%s15962_s15 + $0x30] sm:$0xff]  ;;  %v3954_v30 = vld [vmem:[%s15962_s15 + $0x48] sm:$0xff] }
 0xb2b   :  { %3603 = vmatpush1.bf16.msra.mxu0 %v12083_v37  ;;  %v3915_v37 = vld [vmem:[%s15961_s14 + $0x10] sm:$0xff] }
 0xb2c   :  { %3604 = vmatprep.subr.bf16.mxu0 %v12088_v41  ;;  %v3916_v41 = vld [vmem:[%s15961_s14 + $0x18] sm:$0xff] }
 0xb2f   :  { %3605 = vmatpush1.bf16.msra.mxu0 %v12086_v39 }
 0xb30   :  { %3606 = vmatprep.subr.bf16.mxu0 %v12091_v43  ;;  %v3933_v43 = vld [vmem:[%s15961_s14 + $0xa0] sm:$0xff] }
 0xb33   :  { %3607 = vmatpush1.bf16.msra.mxu0 %v12089_v40  ;;  %v3934_v40 = vld [vmem:[%s15961_s14 + $0xa8] sm:$0xff] }
 0xb34   :  { %3608 = vmatprep.subr.bf16.mxu0 %v12094_v42  ;;  %v14060_v42 = vpack.c.bf16 %v3916_v41, %v3915_v37  ;;  %v14204_v37 = vpack.c.bf16 %v3951_v52, %v3949_v26 }
 0xb37   :  { %3609 = vmatpush1.bf16.msra.mxu0 %v12092_v28  ;;  %v14063_v28 = vpack.c.bf16 %v3934_v40, %v3933_v43  ;;  %v3955_v43 = vld [vmem:[%s15962_s15 + $0x50] sm:$0xff] }
 0xb38   :  { %3610 = vmatprep.subr.bf16.mxu0 %v12097_v24  ;;  %v3917_v24 = vld [vmem:[%s15961_s14 + $0x20] sm:$0xff] }
 0xb3b   :  { %3611 = vmatpush1.bf16.msra.mxu0 %v12095_v29  ;;  %v3918_v29 = vld [vmem:[%s15961_s14 + $0x28] sm:$0xff] }
 0xb3c   :  { %3612 = vmatprep.subr.bf16.mxu0 %v12100_v45  ;;  %v3935_v45 = vld [vmem:[%s15961_s14 + $0xb0] sm:$0xff] }
 0xb3f   :  { %3613 = vmatpush1.bf16.msra.mxu0 %v12098_v47  ;;  %v3936_v47 = vld [vmem:[%s15961_s14 + $0xb8] sm:$0xff] }
 0xb40   :  { %3614 = vmatprep.subr.bf16.mxu0 %v12103_v50  ;;  %v14078_v50 = vpack.c.bf16 %v3918_v29, %v3917_v24  ;;  %v3958_v24 = vld [vmem:[%s15962_s15 + $0x68] sm:$0xff]  ;;  %v3960_v29 = vld [vmem:[%s15962_s15 + $0x78] sm:$0xff] }
 0xb43   :  { %3615 = vmatpush1.bf16.msra.mxu0 %v12101_v51  ;;  %v14081_v51 = vpack.c.bf16 %v3936_v47, %v3935_v45  ;;  %v14227_v45 = vpack.c.bf16 %v3960_v29, %v3958_v24  ;;  %v3957_v47 = vld [vmem:[%s15962_s15 + $0x60] sm:$0xff] }
 0xb44   :  { %3868 = vmatprep.subr.bf16.mxu0 %v12106_v54  ;;  %v3919_v54 = vld [vmem:[%s15961_s14 + $0x30] sm:$0xff] }
 0xb46   :  { %3617 = vmatmul.mubr.bf16.vlgmr.msra.gmra.mrb[44].mxu0 %v3389_v55  ;;  %v3920_v55 = vld [vmem:[%s15961_s14 + $0x38] sm:$0xff] }
 0xb47   :  { %3869 = vmatpush1.bf16.msra.mxu0 %v12104_v56  ;;  %3900 = vmatprep.mubr.bf16.mxu0 %v3674_v57  ;;  %v3937_v56 = vld [vmem:[%s15961_s14 + $0xc0] sm:$0xff]  ;;  %v3938_v57 = vld [vmem:[%s15961_s14 + $0xc8] sm:$0xff] }
 0xb48   :  { %3870 = vmatprep.subr.bf16.mxu0 %v12109_v61  ;;  %v14096_v61 = vpack.c.bf16 %v3920_v55, %v3919_v54  ;;  %v3959_v54 = vld [vmem:[%s15962_s15 + $0x70] sm:$0xff] }
 0xb49   :  { %v14235_v55 = vpack.c.bf16 %v3959_v54, %v3957_v47  ;;  %v9587_v47 = vld [vmem:[%s15963_s16 + $0x4] sm:$0x7]  ;;  %v12152_v54 = vld [vmem:[%s15964_s17 + $0x180] ss:$12 sps:$4 sm:$0xff]  }
 0xb4b   :  { %3871 = vmatpush1.bf16.msra.mxu0 %v12107_v62  ;;  %v14099_v62 = vpack.c.bf16 %v3938_v57, %v3937_v56 }
 0xb4c   :  { %3872 = vmatprep.subr.bf16.mxu0 %v12112_v27  ;;  %v3921_v27 = vld [vmem:[%s15961_s14 + $0x40] sm:$0xff] }
 0xb4f   :  { %3873 = vmatpush1.bf16.msra.mxu0 %v12110_v63  ;;  %v3922_v63 = vld [vmem:[%s15961_s14 + $0x48] sm:$0xff] }
 0xb50   :  { %3874 = vmatprep.subr.bf16.mxu0 %v12115_v0  ;;  %v3939_v0 = vld [vmem:[%s15961_s14 + $0xd0] sm:$0xff] }
 0xb53   :  { %3875 = vmatpush1.bf16.msra.mxu0 %v12113_v3  ;;  %v3940_v3 = vld [vmem:[%s15961_s14 + $0xd8] sm:$0xff] }
 0xb54   :  { %3876 = vmatprep.subr.bf16.mxu0 %v12118_v4  ;;  %v14114_v4 = vpack.c.bf16 %v3922_v63, %v3921_v27 }
 0xb57   :  { %3877 = vmatpush1.bf16.msra.mxu0 %v12116_v5  ;;  %v14117_v5 = vpack.c.bf16 %v3940_v3, %v3939_v0 }
 0xb58   :  { %3878 = vmatprep.subr.bf16.mxu0 %v12121_v6  ;;  %v3923_v6 = vld [vmem:[%s15961_s14 + $0x50] sm:$0xff] }
 0xb5b   :  { %3879 = vmatpush1.bf16.msra.mxu0 %v12119_v46  ;;  %v3924_v46 = vld [vmem:[%s15961_s14 + $0x58] sm:$0xff] }
 0xb5c   :  { %3880 = vmatprep.subr.bf16.mxu0 %v12124_v48  ;;  %v3941_v48 = vld [vmem:[%s15961_s14 + $0xe0] sm:$0xff] }
 0xb5f   :  { %3881 = vmatpush1.bf16.msra.mxu0 %v12122_v49  ;;  %v3942_v49 = vld [vmem:[%s15961_s14 + $0xe8] sm:$0xff] }
 0xb60   :  { %3882 = vmatprep.subr.bf16.mxu0 %v12127_v9  ;;  %v14132_v9 = vpack.c.bf16 %v3924_v46, %v3923_v6 }
 0xb63   :  { %3883 = vmatpush1.bf16.msra.mxu0 %v12125_v12  ;;  %v14135_v12 = vpack.c.bf16 %v3942_v49, %v3941_v48 }
 0xb64   :  { %3884 = vmatprep.subr.bf16.mxu0 %v12130_v13  ;;  %v3925_v13 = vld [vmem:[%s15961_s14 + $0x60] sm:$0xff] }
 0xb67   :  { %3885 = vmatpush1.bf16.msra.mxu0 %v12128_v44  ;;  %v3926_v44 = vld [vmem:[%s15961_s14 + $0x68] sm:$0xff] }
 0xb68   :  { %3886 = vmatprep.subr.bf16.mxu0 %v12133_v53  ;;  %v3943_v53 = vld [vmem:[%s15961_s14 + $0xf0] sm:$0xff] }
 0xb6b   :  { %3887 = vmatpush1.bf16.msra.mxu0 %v12131_v59  ;;  %v3944_v59 = vld [vmem:[%s15961_s14 + $0xf8] sm:$0xff] }
 0xb6c   :  { %3888 = vmatprep.subr.bf16.mxu0 %v12136_v60  ;;  %v14150_v60 = vpack.c.bf16 %v3926_v44, %v3925_v13 }
 0xb6f   :  { %3889 = vmatpush1.bf16.msra.mxu0 %v12134_v1  ;;  %v14153_v1 = vpack.c.bf16 %v3944_v59, %v3943_v53  ;;  %v12179_v59 = vld [vmem:[%s15964_s17 + $0x248] ss:$12 sps:$4 sm:$0xff]  }
 0xb70   :  { %3890 = vmatprep.subr.bf16.mxu0 %v12139_v2  ;;  %v3927_v2 = vld [vmem:[%s15961_s14 + $0x70] sm:$0xff] }
 0xb73   :  { %3891 = vmatpush1.bf16.msra.mxu0 %v12137_v7  ;;  %v3928_v7 = vld [vmem:[%s15961_s14 + $0x78] sm:$0xff] }
 0xb74   :  { %3892 = vmatprep.subr.bf16.mxu0 %v12142_v8  ;;  %v14163_v8 = vpack.c.bf16 %v3928_v7, %v3927_v2  ;;  %v12185_v2 = vld [vmem:[%s15964_s17 + $0x1a0] ss:$12 sps:$4 sm:$0xff]   ;;  %v12189_v7 = vld [vmem:[%s15964_s17 + $0x278] ss:$12 sps:$4 sm:$0xff]  }
 0xb77   :  { %3893 = vmatpush1.bf16.msra.mxu0 %v12140_v10  ;;  %v3946_v10 = vld [vmem:[%s15962_s15 + $0x8] sm:$0xff] }
 0xb78   :  { %3894 = vmatprep.subr.bf16.mxu0 %v12145_v11  ;;  %v3948_v11 = vld [vmem:[%s15962_s15 + $0x18] sm:$0xff] }
 0xb7b   :  { %3895 = vmatpush1.bf16.msra.mxu0 %v12143_v14  ;;  %v14172_v14 = vpack.c.bf16 %v3948_v11, %v3946_v10  ;;  %v12194_v10 = vld [vmem:[%s15964_s17 + $0x290] ss:$12 sps:$4 sm:$0xff]  }
 0xb7c   :  { %3896 = vmatprep.subr.bf16.mxu0 %v12148_v15  ;;  %v3945_v15 = vld [vmem:[%s15962_s15] sm:$0xff]  ;;  %v12195_v11 = vld [vmem:[%s15964_s17 + $0x1d0] ss:$12 sps:$4 sm:$0xff]  }
 0xb7f   :  { %3897 = vmatpush1.bf16.msra.mxu0 %v12146_v16  ;;  %v3947_v16 = vld [vmem:[%s15962_s15 + $0x10] sm:$0xff] }
 0xb80   :  { %3898 = vmatprep.subr.bf16.mxu0 %v12151_v17  ;;  %v3950_v17 = vld [vmem:[%s15962_s15 + $0x28] sm:$0xff]  ;;  %v14187_v20 = vpack.c.bf16 %v3947_v16, %v3945_v15 }
 0xb81   :  { %v12200_v15 = vld [vmem:[%s15964_s17 + $0x1e8] ss:$12 sps:$4 sm:$0xff]  }
 0xb83   :  { %3899 = vmatpush1.bf16.msra.mxu0 %v12149_v18  ;;  %v3952_v18 = vld [vmem:[%s15962_s15 + $0x38] sm:$0xff] }
 0xb84   :  { %v14189_v22 = vpack.c.bf16 %v3952_v18, %v3950_v17  ;;  %10410 = vmatprep.subr.bf16.mxu0 %v12179_v59  ;;  %v12205_v59 = vld [vmem:[%s15964_s17 + $0x200] ss:$12 sps:$4 sm:$0xff]  }
 0xb86   :  { %3901 = vmatmul.mubr.bf16.vlgmr.msra.gmra.mrb[44].mxu0 %v3673_v19 }
 0xc59   :  { %v14032_v31 = vpop.f32.mrb[44].mxu0 }
 0xc5a   :  { %v14036_v33 = vpop.f32.mrb[45].mxu0 }
 0xc5b   :  { %v3906_v35 = vpop.f32.mrb[46].mxu0  ;;  %3964 = vmatprep.subr.mxu1 %v14036_v33 }
 0xc5c   :  { %v3907_v39 = vpop.f32.mrb[47].mxu0  ;;  %3965 = vmatpush1.msra.mxu1 %v14032_v31  ;;  %v3956_v35 = vld [vmem:[%s15962_s15 + $0x58] sm:$0xff] }
 0xc5d   :  { %9580 = vmatmul.mubr.msk.f32.vlgmr.msra.gmra.mrb[32].mxu1 %vm3961_vm1, %v12536_v58  ;;  %11223 = vmatprep.subr.bf16.mxu1 %v14034_v32  ;;  %v14208_v41 = vpack.c.bf16 %v3956_v35, %v3954_v30  ;;  %v3953_v39 = vld [vmem:[%s15962_s15 + $0x40] sm:$0xff] }
 0xc5e   :  { %11225 = vmatpush3.bf16.msra.mxu1 %v14038_v34  ;;  %v14217_v40 = vpack.c.bf16 %v3955_v43, %v3953_v39 }
 0xc5f   :  { %11227 = vmatprep.subr.bf16.mxu1 %v14041_v36 }
 0xc62   :  { %11229 = vmatpush3.bf16.msra.mxu1 %v14060_v42 }
 0xc63   :  { %11231 = vmatprep.subr.bf16.mxu1 %v14063_v28 }
 0xc66   :  { %11233 = vmatpush3.bf16.msra.mxu1 %v14078_v50 }
 0xc67   :  { %11235 = vmatprep.subr.bf16.mxu1 %v14081_v51 }
 0xc6a   :  { %11237 = vmatpush3.bf16.msra.mxu1 %v14096_v61 }
 0xc6b   :  { %11239 = vmatprep.subr.bf16.mxu1 %v14099_v62 }
 0xc6e   :  { %11241 = vmatpush3.bf16.msra.mxu1 %v14114_v4 }
 0xc6f   :  { %11243 = vmatprep.subr.bf16.mxu1 %v14117_v5 }
 0xc72   :  { %11245 = vmatpush3.bf16.msra.mxu1 %v14132_v9 }
 0xc73   :  { %11247 = vmatprep.subr.bf16.mxu1 %v14135_v12 }
 0xc76   :  { %11249 = vmatpush3.bf16.msra.mxu1 %v14150_v60 }
 0xc77   :  { %11251 = vmatprep.subr.bf16.mxu1 %v14153_v1 }
 0xc7a   :  { %11253 = vmatpush3.bf16.msra.mxu1 %v14163_v8 }
 0xc7b   :  { %11255 = vmatprep.subr.bf16.mxu1 %v14172_v14 }
 0xd30   :  { %v4030_v19 = vpop.f32.mrb[32].mxu1 }
 0xd31   :  { %v4032_v21 = vpop.f32.mrb[33].mxu1 }
 0xd32   :  { %4099 = vmatprep.mubr.f32.mxu1 %v4032_v21 }
 0xd33   :  { %4100 = vmatmul.mubr.f32.vlgmr.msra.gmra.mrb[34].mxu1 %v4030_v19 }
 0xd34   :  { %11257 = vmatpush1.bf16.msra.mxu1 %v14187_v20  ;;  %4173 = vmatprep.mubr.f32.mxu1 %v12535_v38 }
 0xd35   :  { %11259 = vmatprep.subr.bf16.mxu1 %v14189_v22 }
 0xd38   :  { %11261 = vmatpush1.bf16.msra.mxu1 %v14204_v37 }
 0xd39   :  { %11263 = vmatprep.subr.bf16.mxu1 %v14208_v41 }
 0xd3c   :  { %11265 = vmatpush1.bf16.msra.mxu1 %v14217_v40 }
 0xd3d   :  { %11267 = vmatprep.subr.bf16.mxu1 %v14227_v45 }
 0xd40   :  { %11269 = vmatpush1.bf16.msra.mxu1 %v14235_v55 }
 0xe06   :  { %v10372_v56 = vpop.f32.mrb[34].mxu1 }
 0xe07   :  { %v10373_v57 = vpop.f32.mrb[35].mxu1 }
 0xe08   :  { %v10374_v27 = vadd.f32 %v10373_v57, %v10372_v56  ;;  %v12155_v56 = vld [vmem:[%s15964_s17 + $0x198] ss:$12 sps:$4 sm:$0xff]   ;;  %v12160_v57 = vld [vmem:[%s15964_s17 + $0x1b4] ss:$12 sps:$4 sm:$0xff]  }
 0xe0a   :  { %v4105_v63 = vmul.f32 0.03125, %v10374_v27  ;;  %v12158_v27 = vld [vmem:[%s15964_s17 + $0x1b0] ss:$12 sps:$4 sm:$0xff]  }
 0xe0c   :  { %9581 = vmatmul.mubr.msk.f32.vlgmr.msra.gmra.mrb[36].mxu1 %vm128_vm0, %v4105_v63 }
 0xe0d   :  { %4256 = vmatprep.mubr.f32.mxu1 %v12535_v38 }
 0xedf   :  { %v4175_v0 = vpop.f32.mrb[36].mxu1 }
 0xee0   :  { %v4183_v3 = vrot.slane %v4175_v0, %v12892_v23  ;;  %v4177_v6 = vpop.f32.mrb[37].mxu1  ;;  %v12161_v0 = vld [vmem:[%s15964_s17 + $0x1c8] ss:$12 sps:$4 sm:$0xff]  }
 0xee1   :  { %v4187_v46 = vrot.slane %v4177_v6, %v12892_v23  ;;  %v12164_v6 = vld [vmem:[%s15964_s17 + $0x1e0] ss:$12 sps:$4 sm:$0xff]  }
 0xee2   :  { %v4188_v48 = vsub.f32 %v14032_v31, %v4183_v3  ;;  %v12166_v3 = vld [vmem:[%s15964_s17 + $0x1e4] ss:$12 sps:$4 sm:$0xff]  }
 0xee3   :  { %v4189_v49 = vsub.f32 %v14036_v33, %v4187_v46  ;;  %v12169_v46 = vld [vmem:[%s15964_s17 + $0x1fc] ss:$12 sps:$4 sm:$0xff]  }
 0xee4   :  { %v4190_v44 = vmul.f32 %v4188_v48, %v4188_v48  ;;  %v12167_v48 = vld [vmem:[%s15964_s17 + $0x1f8] ss:$12 sps:$4 sm:$0xff]  }
 0xee5   :  { %v4191_v13 = vmul.f32 %v4189_v49, %v4189_v49  ;;  %v12172_v49 = vld [vmem:[%s15964_s17 + $0x214] ss:$12 sps:$4 sm:$0xff]  }
 0xee7   :  { %4192 = vmatprep.subr.mxu1 %v4191_v13  ;;  %v12170_v13 = vld [vmem:[%s15964_s17 + $0x210] ss:$12 sps:$4 sm:$0xff]  }
 0xee8   :  { %4193 = vmatpush1.msra.mxu1 %v4190_v44  ;;  %v12175_v44 = vld [vmem:[%s15964_s17 + $0x22c] ss:$12 sps:$4 sm:$0xff]  }
 0xee9   :  { %9582 = vmatmul.mubr.msk.f32.vlgmr.msra.gmra.mrb[38].mxu1 %vm3961_vm1, %v12536_v58  ;;  %11271 = vmatprep.subr.bf16.mxu1 %v14034_v32 }
 0xeea   :  { %11273 = vmatpush3.bf16.msra.mxu1 %v14038_v34 }
 0xeeb   :  { %11275 = vmatprep.subr.bf16.mxu1 %v14041_v36 }
 0xeee   :  { %11277 = vmatpush3.bf16.msra.mxu1 %v14060_v42 }
 0xeef   :  { %11279 = vmatprep.subr.bf16.mxu1 %v14063_v28 }
 0xef2   :  { %11281 = vmatpush3.bf16.msra.mxu1 %v14078_v50 }
 0xef3   :  { %11283 = vmatprep.subr.bf16.mxu1 %v14081_v51 }
 0xef6   :  { %11285 = vmatpush3.bf16.msra.mxu1 %v14096_v61 }
 0xef7   :  { %11287 = vmatprep.subr.bf16.mxu1 %v14099_v62  ;;  %v3911_v62 = vld [vmem:[%s15959_s12] sm:$0x1] }
 0xefa   :  { %11289 = vmatpush3.bf16.msra.mxu1 %v14114_v4 }
 0xefb   :  { %11291 = vmatprep.subr.bf16.mxu1 %v14117_v5 }
 0xefe   :  { %11293 = vmatpush3.bf16.msra.mxu1 %v14132_v9 }
 0xeff   :  { %11295 = vmatprep.subr.bf16.mxu1 %v14135_v12  ;;  %v3912_v12 = vld [vmem:[%s15960_s13] sm:$0x1] }
 0xf02   :  { %11297 = vmatpush3.bf16.msra.mxu1 %v14150_v60  ;;  %v12180_v60 = vld [vmem:[%s15964_s17 + $0x188] ss:$12 sps:$4 sm:$0xff]  }
 0xf03   :  { %11299 = vmatprep.subr.bf16.mxu1 %v14153_v1  ;;  %v12184_v1 = vld [vmem:[%s15964_s17 + $0x260] ss:$12 sps:$4 sm:$0xff]   ;;  %10411 = vmatpush3.bf16.msra.mxu0 %v12180_v60 }
 0xf04   :  { %10412 = vmatprep.subr.bf16.mxu0 %v12184_v1  ;;  %v12208_v60 = vld [vmem:[%s15964_s17 + $0x2d4] ss:$12 sps:$4 sm:$0xff]   ;;  %v12209_v1 = vld [vmem:[%s15964_s17 + $0x2d8] ss:$12 sps:$4 sm:$0xff]  }
 0xf06   :  { %11301 = vmatpush3.bf16.msra.mxu1 %v14163_v8  ;;  %v12190_v8 = vld [vmem:[%s15964_s17 + $0x1b8] ss:$12 sps:$4 sm:$0xff]  }
 0xf07   :  { %11303 = vmatprep.subr.bf16.mxu1 %v14172_v14  ;;  %10413 = vmatpush3.bf16.msra.mxu0 %v12185_v2  ;;  %v12206_v2 = vld [vmem:[%s15964_s17 + $0x2d0] ss:$12 sps:$4 sm:$0xff]  }
 0xf08   :  { %10414 = vmatprep.subr.bf16.mxu0 %v12189_v7  ;;  %v12210_v7 = vld [vmem:[%s15964_s17 + $0x218] ss:$12 sps:$4 sm:$0xff]  }
 0xf0b   :  { %10415 = vmatpush3.bf16.msra.mxu0 %v12190_v8  ;;  %v12213_v8 = vld [vmem:[%s15964_s17 + $0x2ec] ss:$12 sps:$4 sm:$0xff]  }
 0xf0c   :  { %10416 = vmatprep.subr.bf16.mxu0 %v12194_v10  ;;  %v12214_v10 = vld [vmem:[%s15964_s17 + $0x2f0] ss:$12 sps:$4 sm:$0xff]  }
 0xf0f   :  { %10417 = vmatpush3.bf16.msra.mxu0 %v12195_v11  ;;  %v12211_v11 = vld [vmem:[%s15964_s17 + $0x2e8] ss:$12 sps:$4 sm:$0xff]  }
 0xfbc   :  { %v4258_v32 = vpop.f32.mrb[38].mxu1 }
 0xfbd   :  { %v4260_v34 = vpop.f32.mrb[39].mxu1 }
 0xfbe   :  { %4327 = vmatprep.mubr.f32.mxu1 %v4260_v34  ;;  %v12178_v34 = vld [vmem:[%s15964_s17 + $0x244] ss:$12 sps:$4 sm:$0xff]  }
 0xfbf   :  { %4328 = vmatmul.mubr.f32.vlgmr.msra.gmra.mrb[40].mxu1 %v4258_v32  ;;  %v12173_v32 = vld [vmem:[%s15964_s17 + $0x228] ss:$12 sps:$4 sm:$0xff]  }
 0xfc0   :  { %11305 = vmatpush1.bf16.msra.mxu1 %v14187_v20  ;;  %4407 = vmatprep.mubr.f32.mxu1 %v12535_v38 }
 0xfc1   :  { %11307 = vmatprep.subr.bf16.mxu1 %v14189_v22 }
 0xfc4   :  { %11309 = vmatpush1.bf16.msra.mxu1 %v14204_v37 }
 0xfc5   :  { %11311 = vmatprep.subr.bf16.mxu1 %v14208_v41 }
 0xfc8   :  { %11313 = vmatpush1.bf16.msra.mxu1 %v14217_v40 }
 0xfc9   :  { %11315 = vmatprep.subr.bf16.mxu1 %v14227_v45 }
 0xfcc   :  { %11317 = vmatpush1.bf16.msra.mxu1 %v14235_v55 }
 0xfcd   :  { %11319 = vmatprep.subr.bf16.mxu1 %v14172_v14  ;;  %v12199_v14 = vld [vmem:[%s15964_s17 + $0x2a8] ss:$12 sps:$4 sm:$0xff]  }
 0xfce   :  { %10418 = vmatprep.subr.bf16.mxu0 %v12199_v14  ;;  %v12215_v14 = vld [vmem:[%s15964_s17 + $0x230] ss:$12 sps:$4 sm:$0xff]  }
 0xfcf   :  { %10419 = vmatpush3.bf16.msra.mxu0 %v12200_v15  ;;  %v12218_v15 = vld [vmem:[%s15964_s17 + $0x4] ss:$12 sps:$4 sm:$0xff]  }
0x1092   :  { %v10407_v36 = vpop.f32.mrb[40].mxu1 }
0x1093   :  { %v10408_v42 = vpop.f32.mrb[41].mxu1 }
0x1094   :  { %v10409_v28 = vadd.f32 %v10408_v42, %v10407_v36  ;;  %v12176_v36 = vld [vmem:[%s15964_s17 + $0x240] ss:$12 sps:$4 sm:$0xff]   ;;  %v12183_v42 = vld [vmem:[%s15964_s17 + $0x25c] ss:$12 sps:$4 sm:$0xff]  }
0x1096   :  { %v4333_v50 = vmul.f32 0.03125, %v10409_v28  ;;  %v12181_v28 = vld [vmem:[%s15964_s17 + $0x258] ss:$12 sps:$4 sm:$0xff]  }
0x1098   :  { %v4334_v51 = vmax.f32 %v4333_v50, 0.0  ;;  %v12188_v50 = vld [vmem:[%s15964_s17 + $0x274] ss:$12 sps:$4 sm:$0xff]  }
0x109a   :  { %v4335_v61 = vadd.f32 1e-05, %v4334_v51  ;;  %v12186_v51 = vld [vmem:[%s15964_s17 + $0x270] ss:$12 sps:$4 sm:$0xff]  }
0x109c   :  { %12506 = vrsqrt.f32 %v4335_v61  ;;  %v12193_v61 = vld [vmem:[%s15964_s17 + $0x28c] ss:$12 sps:$4 sm:$0xff]  }
0x10a6   :  { %v12507_v4 = vpop.eup %12506 }
0x10a7   :  { %v4337_v5 = vmul.f32 %v12507_v4, %v3911_v62  ;;  %v12191_v62 = vld [vmem:[%s15964_s17 + $0x288] ss:$12 sps:$4 sm:$0xff]   ;;  %v12198_v4 = vld [vmem:[%s15964_s17 + $0x2a4] ss:$12 sps:$4 sm:$0xff]  }
0x10a9   :  { %9583 = vmatmul.mubr.msk.f32.vlgmr.msra.gmra.mrb[42].mxu1 %vm128_vm0, %v4337_v5  ;;  %v4338_v9 = vmul.f32 %v4337_v5, %v4105_v63  ;;  %v12163_v63 = vld [vmem:[%s15964_s17 + $0x1cc] ss:$12 sps:$4 sm:$0xff]  }
0x10aa   :  { %11321 = vmatpush1.bf16.msra.mxu1 %v14187_v20  ;;  %4491 = vmatprep.mubr.f32.mxu1 %v12535_v38  ;;  %v12196_v5 = vld [vmem:[%s15964_s17 + $0x2a0] ss:$12 sps:$4 sm:$0xff]  }
0x10ab   :  { %11323 = vmatprep.subr.bf16.mxu1 %v14189_v22  ;;  %v4339_v53 = vsub.f32 %v3912_v12, %v4338_v9  ;;  %v12203_v9 = vld [vmem:[%s15964_s17 + $0x2bc] ss:$12 sps:$4 sm:$0xff]   ;;  %v12204_v12 = vld [vmem:[%s15964_s17 + $0x2c0] ss:$12 sps:$4 sm:$0xff]  }
0x10ac   :  { %10420 = vmatprep.subr.bf16.mxu0 %v12204_v12  ;;  %v12262_v12 = vld [vmem:[%s15964_s17 + $0x3c8] ss:$12 sps:$4 sm:$0xff]  }
0x10ad   :  { %10421 = vmatpush3.bf16.msra.mxu0 %v12205_v59  ;;  %v12265_v59 = vld [vmem:[%s15964_s17 + $0xf4] ss:$12 sps:$4 sm:$0xff]  }
0x10ae   :  { %11325 = vmatpush1.bf16.msra.mxu1 %v14204_v37  ;;  %10422 = vmatprep.subr.bf16.mxu0 %v12209_v1  ;;  %v9750_v1 = vld [vmem:[%s15963_s16 + $0x8] sm:$0x7] }
0x10af   :  { %11327 = vmatprep.subr.bf16.mxu1 %v14208_v41 }
0x10b1   :  { %10423 = vmatpush3.bf16.msra.mxu0 %v12210_v7  ;;  %v12267_v7 = vld [vmem:[%s15964_s17 + $0x3e0] ss:$12 sps:$4 sm:$0xff]  }
0x10b2   :  { %11329 = vmatpush1.bf16.msra.mxu1 %v14217_v40  ;;  %10424 = vmatprep.subr.bf16.mxu0 %v12214_v10  ;;  %v12268_v10 = vld [vmem:[%s15964_s17 + $0x108] ss:$12 sps:$4 sm:$0xff]  }
0x10b3   :  { %11331 = vmatprep.subr.bf16.mxu1 %v14227_v45  ;;  %v12154_v45 = vld [vmem:[%s15964_s17 + $0x184] ss:$12 sps:$4 sm:$0xff]  }
0x10b5   :  { %10425 = vmatpush3.bf16.msra.mxu0 %v12215_v14  ;;  %v12272_v14 = vld [vmem:[%s15964_s17 + $0x3f8] ss:$12 sps:$4 sm:$0xff]  }
0x10b6   :  { %11333 = vmatpush1.bf16.msra.mxu1 %v14235_v55  ;;  %v12157_v55 = vld [vmem:[%s15964_s17 + $0x19c] ss:$12 sps:$4 sm:$0xff]  }
0x10b9   :  { %9584 = vmatmul.mubr.msk.f32.vlgmr.msra.gmra.mrb[44].mxu1 %vm128_vm0, %v4339_v53  ;;  %v12201_v53 = vld [vmem:[%s15964_s17 + $0x2b8] ss:$12 sps:$4 sm:$0xff]  }
0x10ba   :  { %4559 = vmatprep.mubr.bf16.mxu1 %v15980_v25 }
0x117c   :  { %v4409_v16 = vpop.f32.mrb[42].mxu1 }
0x117d   :  { %v4417_v17 = vrot.slane %v4409_v16, %v12892_v23  ;;  %v4411_v18 = vpop.f32.mrb[43].mxu1  ;;  %v12219_v16 = vld [vmem:[%s15964_s17 + $0xc8] ss:$12 sps:$4 sm:$0xff]  }
0x117e   :  { %v4421_v19 = vrot.slane %v4411_v18, %v12892_v23  ;;  %10432 = vmatprep.subr.bf16.mxu0 %v12219_v16  ;;  %v12273_v16 = vld [vmem:[%s15964_s17 + $0x120] ss:$12 sps:$4 sm:$0xff]  }
0x117f   :  { %v4422_v20 = vmul.f32 %v4417_v17, %v14032_v31 }
0x1180   :  { %v4423_v21 = vmul.f32 %v4421_v19, %v14036_v33  ;;  %v4516_v33 = vld [vmem:[%s15963_s16] sm:$0x7] }
0x118c   :  { %v4493_v22 = vpop.f32.mrb[44].mxu1 }
0x118d   :  { %v4501_v26 = vrot.slane %v4493_v22, %v12892_v23  ;;  %v4495_v52 = vpop.f32.mrb[45].mxu1 }
0x118e   :  { %v4505_v30 = vrot.slane %v4495_v52, %v12892_v23 }
0x118f   :  { %v4506_v35 = vadd.f32 %v4501_v26, %v4422_v20 }
0x1190   :  { %v4507_v37 = vadd.f32 %v4505_v30, %v4423_v21  ;;  %v12216_v30 = vld [vmem:[%s15964_s17] ss:$12 sps:$4 sm:$0xff]  }
0x1191   :  { %vm4508_vm0 = vcmp.gt.f32.partialorder %v4506_v35, 0.0  ;;  %v4510_v41 = vmul.f32 0.2, %v4506_v35 }
0x1192   :  { %vm4509_vm2 = vcmp.gt.f32.partialorder %v4507_v37, 0.0  ;;  %v4511_v39 = vmul.f32 0.2, %v4507_v37 }
0x1193   :  { %v4512_v43 = vsel %vm4508_vm0, %v4506_v35, %v4510_v41  ;;  %v12220_v35 = vld [vmem:[%s15964_s17 + $0x8] ss:$12 sps:$4 sm:$0xff]  }
0x1194   :  { %v4513_v40 = vsel %vm4509_vm2, %v4507_v37, %v4511_v39  ;;  %v4514_v24 = vpack.c.bf16 %v4512_v43, %v4512_v43  ;;  %v12223_v39 = vld [vmem:[%s15964_s17 + $0x1c] ss:$12 sps:$4 sm:$0xff]   ;;  %v12224_v43 = vld [vmem:[%s15964_s17 + $0xe0] ss:$12 sps:$4 sm:$0xff]  }
0x1195   :  { %v14326_v29 = vpack.c.bf16 %v4513_v40, %v4513_v40 }
0x1196   :  { %v14329_v31 = vsel %vm4520_vm3, %v4514_v24, 0  ;;  %v12221_v24 = vld [vmem:[%s15964_s17 + $0x18] ss:$12 sps:$4 sm:$0xff]  }
0x1197   :  { %9585 = vmatprep.subr.msk.bf16.mxu1 %vm4520_vm3, %v14326_v29 }
0x1198   :  { %4528 = vmatpush1.bf16.msra.mxu1 %v14329_v31 }
0x1199   :  { %9588 = vmatprep.subr.msk.bf16.mxu1 %vm4520_vm3, %v14326_v29 }
0x119b   :  { %9586 = vmatmul.mubr.msk.bf16.vlgmr.msra.gmra.mrb[48].mxu1 %vm3961_vm1, %v4516_v33  ;;  %v12225_v33 = vld [vmem:[%s15964_s17 + $0x20] ss:$12 sps:$4 sm:$0xff]  }
0x119c   :  { %4640 = vmatpush1.bf16.msra.mxu1 %v14329_v31  ;;  %4671 = vmatprep.mubr.bf16.mxu1 %v15980_v25 }
0x119d   :  { %5003 = vmatprep.subr.bf16.mxu1 %v12154_v45  ;;  %v12228_v45 = vld [vmem:[%s15964_s17 + $0x34] ss:$12 sps:$4 sm:$0xff]  }
0x11a3   :  { %9589 = vmatmul.mubr.msk.bf16.vlgmr.msra.gmra.mrb[52].mxu1 %vm3961_vm1, %v9587_v47  ;;  %v12229_v47 = vld [vmem:[%s15964_s17 + $0xf8] ss:$12 sps:$4 sm:$0xff]  }
0x11a4   :  { %5004 = vmatpush1.bf16.msra.mxu1 %v12152_v54  ;;  %v12226_v54 = vld [vmem:[%s15964_s17 + $0x30] ss:$12 sps:$4 sm:$0xff]  }
0x11a5   :  { %5005 = vmatprep.subr.bf16.mxu1 %v12157_v55  ;;  %v12230_v55 = vld [vmem:[%s15964_s17 + $0x38] ss:$12 sps:$4 sm:$0xff]  }
0x11a8   :  { %5006 = vmatpush1.bf16.msra.mxu1 %v12155_v56  ;;  %v12233_v56 = vld [vmem:[%s15964_s17 + $0x4c] ss:$12 sps:$4 sm:$0xff]  }
0x11a9   :  { %5007 = vmatprep.subr.bf16.mxu1 %v12160_v57  ;;  %v12234_v57 = vld [vmem:[%s15964_s17 + $0x110] ss:$12 sps:$4 sm:$0xff]  }
0x11ac   :  { %5008 = vmatpush1.bf16.msra.mxu1 %v12158_v27  ;;  %v12231_v27 = vld [vmem:[%s15964_s17 + $0x48] ss:$12 sps:$4 sm:$0xff]  }
0x11ad   :  { %5009 = vmatprep.subr.bf16.mxu1 %v12163_v63  ;;  %v12235_v63 = vld [vmem:[%s15964_s17 + $0x50] ss:$12 sps:$4 sm:$0xff]  }
0x11b0   :  { %5010 = vmatpush1.bf16.msra.mxu1 %v12161_v0  ;;  %v12238_v0 = vld [vmem:[%s15964_s17 + $0x64] ss:$12 sps:$4 sm:$0xff]  }
0x11b1   :  { %5011 = vmatprep.subr.bf16.mxu1 %v12166_v3  ;;  %v12239_v3 = vld [vmem:[%s15964_s17 + $0x128] ss:$12 sps:$4 sm:$0xff]  }
0x11b4   :  { %5012 = vmatpush1.bf16.msra.mxu1 %v12164_v6  ;;  %v12236_v6 = vld [vmem:[%s15964_s17 + $0x60] ss:$12 sps:$4 sm:$0xff]  }
0x11b5   :  { %5013 = vmatprep.subr.bf16.mxu1 %v12169_v46  ;;  %v12240_v46 = vld [vmem:[%s15964_s17 + $0x68] ss:$12 sps:$4 sm:$0xff]  }
0x11b8   :  { %5014 = vmatpush1.bf16.msra.mxu1 %v12167_v48  ;;  %v12243_v48 = vld [vmem:[%s15964_s17 + $0x7c] ss:$12 sps:$4 sm:$0xff]  }
0x11b9   :  { %5015 = vmatprep.subr.bf16.mxu1 %v12172_v49  ;;  %v12244_v49 = vld [vmem:[%s15964_s17 + $0x140] ss:$12 sps:$4 sm:$0xff]  }
0x11bc   :  { %5016 = vmatpush1.bf16.msra.mxu1 %v12170_v13  ;;  %v12241_v13 = vld [vmem:[%s15964_s17 + $0x78] ss:$12 sps:$4 sm:$0xff]  }
0x11bd   :  { %5017 = vmatprep.subr.bf16.mxu1 %v12175_v44  ;;  %v12245_v44 = vld [vmem:[%s15964_s17 + $0x80] ss:$12 sps:$4 sm:$0xff]  }
0x11c0   :  { %5018 = vmatpush1.bf16.msra.mxu1 %v12173_v32  ;;  %v12248_v32 = vld [vmem:[%s15964_s17 + $0x94] ss:$12 sps:$4 sm:$0xff]  }
0x11c1   :  { %5019 = vmatprep.subr.bf16.mxu1 %v12178_v34  ;;  %v12249_v34 = vld [vmem:[%s15964_s17 + $0x158] ss:$12 sps:$4 sm:$0xff]  }
0x11c4   :  { %5020 = vmatpush1.bf16.msra.mxu1 %v12176_v36  ;;  %v12246_v36 = vld [vmem:[%s15964_s17 + $0x90] ss:$12 sps:$4 sm:$0xff]  }
0x11c5   :  { %5021 = vmatprep.subr.bf16.mxu1 %v12183_v42  ;;  %v12250_v42 = vld [vmem:[%s15964_s17 + $0x98] ss:$12 sps:$4 sm:$0xff]  }
0x11c8   :  { %5022 = vmatpush1.bf16.msra.mxu1 %v12181_v28  ;;  %v12253_v28 = vld [vmem:[%s15964_s17 + $0xac] ss:$12 sps:$4 sm:$0xff]  }
0x11c9   :  { %5023 = vmatprep.subr.bf16.mxu1 %v12188_v50  ;;  %v12254_v50 = vld [vmem:[%s15964_s17 + $0x170] ss:$12 sps:$4 sm:$0xff]  }
0x11cc   :  { %5024 = vmatpush1.bf16.msra.mxu1 %v12186_v51  ;;  %v12251_v51 = vld [vmem:[%s15964_s17 + $0xa8] ss:$12 sps:$4 sm:$0xff]  }
0x11cd   :  { %5025 = vmatprep.subr.bf16.mxu1 %v12193_v61  ;;  %v12255_v61 = vld [vmem:[%s15964_s17 + $0xb0] ss:$12 sps:$4 sm:$0xff]  }
0x11d0   :  { %5026 = vmatpush1.bf16.msra.mxu1 %v12191_v62  ;;  %v12258_v62 = vld [vmem:[%s15964_s17 + $0xc4] ss:$12 sps:$4 sm:$0xff]  }
0x11d1   :  { %5027 = vmatprep.subr.bf16.mxu1 %v12198_v4  ;;  %v12256_v4 = vld [vmem:[%s15964_s17 + $0xc0] ss:$12 sps:$4 sm:$0xff]  }
0x11d4   :  { %5028 = vmatpush1.bf16.msra.mxu1 %v12196_v5 }
0x11d5   :  { %5029 = vmatprep.subr.bf16.mxu1 %v12203_v9  ;;  %v12261_v9 = vld [vmem:[%s15964_s17 + $0xdc] ss:$12 sps:$4 sm:$0xff]  }
0x11d8   :  { %5030 = vmatpush1.bf16.msra.mxu1 %v12201_v53  ;;  %v12259_v53 = vld [vmem:[%s15964_s17 + $0xd8] ss:$12 sps:$4 sm:$0xff]  }
0x11d9   :  { %5031 = vmatprep.subr.bf16.mxu1 %v12208_v60  ;;  %v12263_v60 = vld [vmem:[%s15964_s17 + $0xf0] ss:$12 sps:$4 sm:$0xff]  }
0x11dc   :  { %5032 = vmatpush1.bf16.msra.mxu1 %v12206_v2  ;;  %v12266_v2 = vld [vmem:[%s15964_s17 + $0x308] ss:$12 sps:$4 sm:$0xff]  }
0x11dd   :  { %5033 = vmatprep.subr.bf16.mxu1 %v12213_v8  ;;  %v12270_v8 = vld [vmem:[%s15964_s17 + $0x10c] ss:$12 sps:$4 sm:$0xff]  }
0x11e0   :  { %5034 = vmatpush1.bf16.msra.mxu1 %v12211_v11  ;;  %v12271_v11 = vld [vmem:[%s15964_s17 + $0x320] ss:$12 sps:$4 sm:$0xff]  }
0x11e1   :  { %5340 = vmatprep.subr.bf16.mxu1 %v12218_v15  ;;  %v12275_v15 = vld [vmem:[%s15964_s17 + $0x124] ss:$12 sps:$4 sm:$0xff]  }
0x126e   :  { %v14466_v17 = vpop.f32.mrb[48].mxu1 }
0x126f   :  { %v4563_v18 = vpop.f32.mrb[49].mxu1  ;;  %v14566_v5 = vpack.c.bf16 %v14466_v17, %v14466_v17  ;;  %v12276_v17 = vld [vmem:[%s15964_s17 + $0x338] ss:$12 sps:$4 sm:$0xff]  }
0x1270   :  { %v4565_v19 = vpop.f32.mrb[50].mxu1  ;;  %v4569_v40 = vpack.c.bf16 %v4563_v18, %v4563_v18  ;;  %v12277_v18 = vld [vmem:[%s15964_s17 + $0x410] ss:$12 sps:$4 sm:$0xff]  }
0x1271   :  { %v4566_v20 = vpop.f32.mrb[51].mxu1  ;;  %v12280_v19 = vld [vmem:[%s15964_s17 + $0x13c] ss:$12 sps:$4 sm:$0xff]  }
0x1272   :  { %v12278_v20 = vld [vmem:[%s15964_s17 + $0x138] ss:$12 sps:$4 sm:$0xff]  }
0x1276   :  { %v4673_v21 = vpop.f32.mrb[52].mxu1 }
0x1277   :  { %v4675_v22 = vpop.f32.mrb[53].mxu1  ;;  %v4680_v37 = vpack.c.bf16 %v4673_v21, %v4673_v21  ;;  %v12281_v21 = vld [vmem:[%s15964_s17 + $0x350] ss:$12 sps:$4 sm:$0xff]  }
0x1278   :  { %v4681_v26 = vpack.c.bf16 %v4675_v22, %v4675_v22  ;;  %v4677_v52 = vpop.f32.mrb[54].mxu1  ;;  %v12282_v22 = vld [vmem:[%s15964_s17 + $0x428] ss:$12 sps:$4 sm:$0xff]  }
0x1279   :  { %v4678_v41 = vpop.f32.mrb[55].mxu1  ;;  %v12283_v52 = vld [vmem:[%s15964_s17 + $0x150] ss:$12 sps:$4 sm:$0xff]  }
0x127a   :  { %5035 = vmatprep.mubr.bf16.mxu1 %v4681_v26  ;;  %5076 = vmatprep.mubr.bf16.mxu0 %v4681_v26  ;;  %v12285_v26 = vld [vmem:[%s15964_s17 + $0x154] ss:$12 sps:$4 sm:$0xff]  }
0x127b   :  { %5036 = vmatmul.mubr.bf16.vlgmr.msra.gmra.mrb[56].mxu1 %v4680_v37  ;;  %5077 = vmatmul.mubr.bf16.vlgmr.msra.gmra.mrb[48].mxu0 %v4680_v37  ;;  %v12290_v37 = vld [vmem:[%s15964_s17 + $0x16c] ss:$12 sps:$4 sm:$0xff]   ;;  %v12288_v41 = vld [vmem:[%s15964_s17 + $0x168] ss:$12 sps:$4 sm:$0xff]  }
0x127c   :  { %5341 = vmatpush1.bf16.msra.mxu1 %v12216_v30  ;;  %10433 = vmatpush3.bf16.msra.mxu0 %v12220_v35  ;;  %v12286_v30 = vld [vmem:[%s15964_s17 + $0x368] ss:$12 sps:$4 sm:$0xff]   ;;  %v12287_v35 = vld [vmem:[%s15964_s17 + $0x440] ss:$12 sps:$4 sm:$0xff]  }
0x127d   :  { %5372 = vmatprep.mubr.bf16.mxu1 %v4569_v40  ;;  %5413 = vmatprep.mubr.bf16.mxu0 %v4569_v40  ;;  %v12298_v40 = vld [vmem:[%s15964_s17 + $0x304] ss:$12 sps:$4 sm:$0xff]  }
0x127e   :  { %5342 = vmatprep.subr.bf16.mxu1 %v12223_v39  ;;  %10434 = vmatprep.subr.bf16.mxu0 %v12224_v43  ;;  %v12291_v39 = vld [vmem:[%s15964_s17 + $0x380] ss:$12 sps:$4 sm:$0xff]   ;;  %v12292_v43 = vld [vmem:[%s15964_s17 + $0x458] ss:$12 sps:$4 sm:$0xff]  }
0x1280   :  { %5343 = vmatpush1.bf16.msra.mxu1 %v12221_v24  ;;  %10435 = vmatpush3.bf16.msra.mxu0 %v12225_v33  ;;  %v12293_v24 = vld [vmem:[%s15964_s17 + $0x398] ss:$12 sps:$4 sm:$0xff]   ;;  %v12296_v33 = vld [vmem:[%s15964_s17 + $0x300] ss:$12 sps:$4 sm:$0xff]  }
0x1281   :  { %5344 = vmatprep.subr.bf16.mxu1 %v12228_v45  ;;  %10436 = vmatprep.subr.bf16.mxu0 %v12229_v47  ;;  %v12294_v45 = vld [vmem:[%s15964_s17 + $0x470] ss:$12 sps:$4 sm:$0xff]  }
0x1282   :  { %v12301_v47 = vld [vmem:[%s15964_s17 + $0x31c] ss:$12 sps:$4 sm:$0xff]  }
0x1284   :  { %5345 = vmatpush1.bf16.msra.mxu1 %v12226_v54  ;;  %10437 = vmatpush3.bf16.msra.mxu0 %v12230_v55  ;;  %v12295_v54 = vld [vmem:[%s15964_s17 + $0x3b0] ss:$12 sps:$4 sm:$0xff]   ;;  %v12299_v55 = vld [vmem:[%s15964_s17 + $0x318] ss:$12 sps:$4 sm:$0xff]  }
0x1285   :  { %5346 = vmatprep.subr.bf16.mxu1 %v12233_v56  ;;  %10438 = vmatprep.subr.bf16.mxu0 %v12234_v57  ;;  %v12304_v56 = vld [vmem:[%s15964_s17 + $0x334] ss:$12 sps:$4 sm:$0xff]   ;;  %v12302_v57 = vld [vmem:[%s15964_s17 + $0x330] ss:$12 sps:$4 sm:$0xff]  }
0x1288   :  { %5347 = vmatpush1.bf16.msra.mxu1 %v12231_v27  ;;  %10439 = vmatpush3.bf16.msra.mxu0 %v12235_v63  ;;  %v12307_v27 = vld [vmem:[%s15964_s17 + $0x34c] ss:$12 sps:$4 sm:$0xff]   ;;  %v12305_v63 = vld [vmem:[%s15964_s17 + $0x348] ss:$12 sps:$4 sm:$0xff]  }
0x1289   :  { %5348 = vmatprep.subr.bf16.mxu1 %v12238_v0  ;;  %10440 = vmatprep.subr.bf16.mxu0 %v12239_v3  ;;  %v12310_v0 = vld [vmem:[%s15964_s17 + $0x364] ss:$12 sps:$4 sm:$0xff]  }
0x128a   :  { %v12311_v3 = vld [vmem:[%s15964_s17 + $0x378] ss:$12 sps:$4 sm:$0xff]  }
0x128c   :  { %5349 = vmatpush1.bf16.msra.mxu1 %v12236_v6  ;;  %10441 = vmatpush3.bf16.msra.mxu0 %v12240_v46  ;;  %v12313_v6 = vld [vmem:[%s15964_s17 + $0x37c] ss:$12 sps:$4 sm:$0xff]  }
0x128d   :  { %5350 = vmatprep.subr.bf16.mxu1 %v12243_v48  ;;  %10442 = vmatprep.subr.bf16.mxu0 %v12244_v49  ;;  %v12314_v46 = vld [vmem:[%s15964_s17 + $0x390] ss:$12 sps:$4 sm:$0xff]   ;;  %v12316_v48 = vld [vmem:[%s15964_s17 + $0x394] ss:$12 sps:$4 sm:$0xff]   ;;  %v12319_v49 = vld [vmem:[%s15964_s17 + $0x3ac] ss:$12 sps:$4 sm:$0xff]  }
0x1290   :  { %5351 = vmatpush1.bf16.msra.mxu1 %v12241_v13  ;;  %10443 = vmatpush3.bf16.msra.mxu0 %v12245_v44  ;;  %v12317_v13 = vld [vmem:[%s15964_s17 + $0x3a8] ss:$12 sps:$4 sm:$0xff]   ;;  %v12322_v44 = vld [vmem:[%s15964_s17 + $0x3c4] ss:$12 sps:$4 sm:$0xff]  }
0x1291   :  { %5352 = vmatprep.subr.bf16.mxu1 %v12248_v32  ;;  %10444 = vmatprep.subr.bf16.mxu0 %v12249_v34  ;;  %v12320_v32 = vld [vmem:[%s15964_s17 + $0x3c0] ss:$12 sps:$4 sm:$0xff]   ;;  %v12325_v34 = vld [vmem:[%s15964_s17 + $0x3dc] ss:$12 sps:$4 sm:$0xff]  }
0x1294   :  { %5353 = vmatpush1.bf16.msra.mxu1 %v12246_v36  ;;  %10445 = vmatpush3.bf16.msra.mxu0 %v12250_v42  ;;  %v12323_v36 = vld [vmem:[%s15964_s17 + $0x3d8] ss:$12 sps:$4 sm:$0xff]   ;;  %v12328_v42 = vld [vmem:[%s15964_s17 + $0x3f4] ss:$12 sps:$4 sm:$0xff]  }
0x1295   :  { %5354 = vmatprep.subr.bf16.mxu1 %v12253_v28  ;;  %10446 = vmatprep.subr.bf16.mxu0 %v12254_v50  ;;  %v12326_v28 = vld [vmem:[%s15964_s17 + $0x3f0] ss:$12 sps:$4 sm:$0xff]   ;;  %v12331_v50 = vld [vmem:[%s15964_s17 + $0x40c] ss:$12 sps:$4 sm:$0xff]  }
0x1298   :  { %5355 = vmatpush1.bf16.msra.mxu1 %v12251_v51  ;;  %10447 = vmatpush3.bf16.msra.mxu0 %v12255_v61  ;;  %v12329_v51 = vld [vmem:[%s15964_s17 + $0x408] ss:$12 sps:$4 sm:$0xff]   ;;  %v12334_v61 = vld [vmem:[%s15964_s17 + $0x424] ss:$12 sps:$4 sm:$0xff]  }
0x1299   :  { %9751 = vmatprep.subr.msk.bf16.mxu0 %vm4520_vm3, %v14326_v29  ;;  %5356 = vmatprep.subr.bf16.mxu1 %v12258_v62  ;;  %v12332_v62 = vld [vmem:[%s15964_s17 + $0x420] ss:$12 sps:$4 sm:$0xff]  }
0x129b   :  { %5414 = vmatmul.mubr.bf16.vlgmr.msra.gmra.mrb[52].mxu0 %v14566_v5 }
0x129c   :  { %5357 = vmatpush1.bf16.msra.mxu1 %v12256_v4  ;;  %5427 = vmatpush1.bf16.msra.mxu0 %v14329_v31  ;;  %v12337_v4 = vld [vmem:[%s15964_s17 + $0x43c] ss:$12 sps:$4 sm:$0xff]  }
0x129d   :  { %5358 = vmatprep.subr.bf16.mxu1 %v12261_v9  ;;  %5458 = vmatprep.mubr.bf16.mxu0 %v15980_v25  ;;  %v12338_v9 = vld [vmem:[%s15964_s17 + $0x450] ss:$12 sps:$4 sm:$0xff]  }
0x129e   :  { %10454 = vmatprep.subr.bf16.mxu0 %v12262_v12  ;;  %v12340_v12 = vld [vmem:[%s15964_s17 + $0x454] ss:$12 sps:$4 sm:$0xff]  }
0x12a0   :  { %5359 = vmatpush1.bf16.msra.mxu1 %v12259_v53  ;;  %v12343_v53 = vld [vmem:[%s15964_s17 + $0x46c] ss:$12 sps:$4 sm:$0xff]  }
0x12a1   :  { %5360 = vmatprep.subr.bf16.mxu1 %v12265_v59  ;;  %v12341_v59 = vld [vmem:[%s15964_s17 + $0x468] ss:$12 sps:$4 sm:$0xff]  }
0x12a3   :  { %9752 = vmatmul.mubr.msk.bf16.vlgmr.msra.gmra.mrb[56].mxu0 %vm3961_vm1, %v9750_v1 }
0x12a4   :  { %10455 = vmatpush3.bf16.msra.mxu0 %v12266_v2  ;;  %5361 = vmatpush1.bf16.msra.mxu1 %v12263_v60  ;;  %v12346_v60 = vld [vmem:[%s15964_s17 + $0x484] ss:$12 sps:$4 sm:$0xff]  }
0x12a5   :  { %10456 = vmatprep.subr.bf16.mxu0 %v12267_v7  ;;  %5362 = vmatprep.subr.bf16.mxu1 %v12270_v8 }
0x12a8   :  { %10457 = vmatpush3.bf16.msra.mxu0 %v12271_v11  ;;  %5363 = vmatpush1.bf16.msra.mxu1 %v12268_v10 }
0x12a9   :  { %10458 = vmatprep.subr.bf16.mxu0 %v12272_v14  ;;  %5364 = vmatprep.subr.bf16.mxu1 %v12275_v15 }
0x12ac   :  { %10459 = vmatpush3.bf16.msra.mxu0 %v12276_v17  ;;  %5365 = vmatpush1.bf16.msra.mxu1 %v12273_v16 }
0x12ad   :  { %10460 = vmatprep.subr.bf16.mxu0 %v12277_v18  ;;  %5366 = vmatprep.subr.bf16.mxu1 %v12280_v19 }
0x12b0   :  { %10461 = vmatpush3.bf16.msra.mxu0 %v12281_v21  ;;  %5367 = vmatpush1.bf16.msra.mxu1 %v12278_v20 }
0x12b1   :  { %10462 = vmatprep.subr.bf16.mxu0 %v12282_v22  ;;  %5368 = vmatprep.subr.bf16.mxu1 %v12285_v26 }
0x12b4   :  { %10463 = vmatpush3.bf16.msra.mxu0 %v12286_v30  ;;  %5369 = vmatpush1.bf16.msra.mxu1 %v12283_v52  ;;  %v12344_v30 = vld [vmem:[%s15964_s17 + $0x480] ss:$12 sps:$4 sm:$0xff]  }
0x12b5   :  { %10464 = vmatprep.subr.bf16.mxu0 %v12287_v35  ;;  %5370 = vmatprep.subr.bf16.mxu1 %v12290_v37  ;;  %v12371_v35 = vld [vmem:[%s15964_s17 + $0x548] ss:$12 sps:$4 sm:$0xff]  }
0x12b6   :  { %v12349_v37 = vld [vmem:[%s15964_s17 + $0x49c] ss:$12 sps:$4 sm:$0xff]  }
0x12b8   :  { %10465 = vmatpush3.bf16.msra.mxu0 %v12291_v39  ;;  %5371 = vmatpush1.bf16.msra.mxu1 %v12288_v41  ;;  %v12347_v41 = vld [vmem:[%s15964_s17 + $0x498] ss:$12 sps:$4 sm:$0xff]   ;;  %v12352_v39 = vld [vmem:[%s15964_s17 + $0x4b4] ss:$12 sps:$4 sm:$0xff]  }
0x12b9   :  { %10466 = vmatprep.subr.bf16.mxu0 %v12292_v43  ;;  %5790 = vmatprep.subr.bf16.mxu1 %v12298_v40  ;;  %v9865_v43 = vld [vmem:[%s15963_s16 + $0xc] sm:$0x7]  ;;  %v12350_v40 = vld [vmem:[%s15964_s17 + $0x4b0] ss:$12 sps:$4 sm:$0xff]  }
0x12bb   :  { %5373 = vmatmul.mubr.bf16.vlgmr.msra.gmra.mrb[56].mxu1 %v14566_v5  ;;  %v12335_v5 = vld [vmem:[%s15964_s17 + $0x438] ss:$12 sps:$4 sm:$0xff]  }
0x12bc   :  { %10467 = vmatpush3.bf16.msra.mxu0 %v12293_v24  ;;  %5791 = vmatpush1.bf16.msra.mxu1 %v12296_v33  ;;  %v12376_v24 = vld [vmem:[%s15964_s17 + $0x560] ss:$12 sps:$4 sm:$0xff]  }
0x12bd   :  { %10468 = vmatprep.subr.bf16.mxu0 %v12294_v45  ;;  %5792 = vmatprep.subr.bf16.mxu1 %v12301_v47  ;;  %v12355_v33 = vld [vmem:[%s15964_s17 + $0x4cc] ss:$12 sps:$4 sm:$0xff]   ;;  %v12353_v47 = vld [vmem:[%s15964_s17 + $0x4c8] ss:$12 sps:$4 sm:$0xff]  }
0x12be   :  { %v12377_v45 = vld [vmem:[%s15964_s17 + $0x4a0] ss:$12 sps:$4 sm:$0xff]  }
0x12c0   :  { %10469 = vmatpush3.bf16.msra.mxu0 %v12295_v54  ;;  %5793 = vmatpush1.bf16.msra.mxu1 %v12299_v55  ;;  %v12381_v54 = vld [vmem:[%s15964_s17 + $0x578] ss:$12 sps:$4 sm:$0xff]  }
0x12c1   :  { %9866 = vmatprep.subr.msk.bf16.mxu0 %vm4520_vm3, %v14326_v29  ;;  %5794 = vmatprep.subr.bf16.mxu1 %v12304_v56  ;;  %v12308_v29 = vld [vmem:[%s15964_s17 + $0x360] ss:$12 sps:$4 sm:$0xff]   ;;  %v12358_v55 = vld [vmem:[%s15964_s17 + $0x4e4] ss:$12 sps:$4 sm:$0xff]  }
0x12c2   :  { %v12382_v56 = vld [vmem:[%s15964_s17 + $0x4b8] ss:$12 sps:$4 sm:$0xff]  }
0x12c4   :  { %5795 = vmatpush1.bf16.msra.mxu1 %v12302_v57  ;;  %v12356_v57 = vld [vmem:[%s15964_s17 + $0x4e0] ss:$12 sps:$4 sm:$0xff]  }
0x12c5   :  { %5796 = vmatprep.subr.bf16.mxu1 %v12307_v27  ;;  %v12386_v27 = vld [vmem:[%s15964_s17 + $0x590] ss:$12 sps:$4 sm:$0xff]  }
0x12c8   :  { %5797 = vmatpush1.bf16.msra.mxu1 %v12305_v63  ;;  %v12361_v63 = vld [vmem:[%s15964_s17 + $0x4fc] ss:$12 sps:$4 sm:$0xff]  }
0x12c9   :  { %5798 = vmatprep.subr.bf16.mxu1 %v12310_v0  ;;  %v12387_v0 = vld [vmem:[%s15964_s17 + $0x4d0] ss:$12 sps:$4 sm:$0xff]  }
0x12cc   :  { %5799 = vmatpush1.bf16.msra.mxu1 %v12308_v29  ;;  %v12359_v29 = vld [vmem:[%s15964_s17 + $0x4f8] ss:$12 sps:$4 sm:$0xff]  }
0x12cd   :  { %5800 = vmatprep.subr.bf16.mxu1 %v12313_v6  ;;  %v12364_v6 = vld [vmem:[%s15964_s17 + $0x514] ss:$12 sps:$4 sm:$0xff]  }
0x12d0   :  { %5801 = vmatpush1.bf16.msra.mxu1 %v12311_v3  ;;  %v12391_v3 = vld [vmem:[%s15964_s17 + $0x5a8] ss:$12 sps:$4 sm:$0xff]  }
0x12d1   :  { %5802 = vmatprep.subr.bf16.mxu1 %v12316_v48  ;;  %v12362_v48 = vld [vmem:[%s15964_s17 + $0x510] ss:$12 sps:$4 sm:$0xff]  }
0x12d4   :  { %5803 = vmatpush1.bf16.msra.mxu1 %v12314_v46  ;;  %v12392_v46 = vld [vmem:[%s15964_s17 + $0x4e8] ss:$12 sps:$4 sm:$0xff]  }
0x12d5   :  { %5804 = vmatprep.subr.bf16.mxu1 %v12319_v49  ;;  %v12367_v49 = vld [vmem:[%s15964_s17 + $0x52c] ss:$12 sps:$4 sm:$0xff]  }
0x12d8   :  { %5805 = vmatpush1.bf16.msra.mxu1 %v12317_v13  ;;  %v12365_v13 = vld [vmem:[%s15964_s17 + $0x528] ss:$12 sps:$4 sm:$0xff]  }
0x12d9   :  { %5806 = vmatprep.subr.bf16.mxu1 %v12322_v44  ;;  %v12370_v44 = vld [vmem:[%s15964_s17 + $0x544] ss:$12 sps:$4 sm:$0xff]  }
0x12dc   :  { %5807 = vmatpush1.bf16.msra.mxu1 %v12320_v32  ;;  %v12368_v32 = vld [vmem:[%s15964_s17 + $0x540] ss:$12 sps:$4 sm:$0xff]  }
0x12dd   :  { %5808 = vmatprep.subr.bf16.mxu1 %v12325_v34  ;;  %v12375_v34 = vld [vmem:[%s15964_s17 + $0x55c] ss:$12 sps:$4 sm:$0xff]  }
0x12e0   :  { %5809 = vmatpush1.bf16.msra.mxu1 %v12323_v36  ;;  %v12373_v36 = vld [vmem:[%s15964_s17 + $0x558] ss:$12 sps:$4 sm:$0xff]  }
0x12e1   :  { %5810 = vmatprep.subr.bf16.mxu1 %v12328_v42  ;;  %v12380_v42 = vld [vmem:[%s15964_s17 + $0x574] ss:$12 sps:$4 sm:$0xff]  }
0x12e4   :  { %5811 = vmatpush1.bf16.msra.mxu1 %v12326_v28  ;;  %v12378_v28 = vld [vmem:[%s15964_s17 + $0x570] ss:$12 sps:$4 sm:$0xff]  }
0x12e5   :  { %5812 = vmatprep.subr.bf16.mxu1 %v12331_v50  ;;  %v12385_v50 = vld [vmem:[%s15964_s17 + $0x58c] ss:$12 sps:$4 sm:$0xff]  }
0x12e8   :  { %5813 = vmatpush1.bf16.msra.mxu1 %v12329_v51  ;;  %v12383_v51 = vld [vmem:[%s15964_s17 + $0x588] ss:$12 sps:$4 sm:$0xff]  }
0x12e9   :  { %5814 = vmatprep.subr.bf16.mxu1 %v12334_v61  ;;  %v12390_v61 = vld [vmem:[%s15964_s17 + $0x5a4] ss:$12 sps:$4 sm:$0xff]  }
0x12ec   :  { %5815 = vmatpush1.bf16.msra.mxu1 %v12332_v62  ;;  %v12388_v62 = vld [vmem:[%s15964_s17 + $0x5a0] ss:$12 sps:$4 sm:$0xff]  }
0x12ed   :  { %5816 = vmatprep.subr.bf16.mxu1 %v12337_v4  ;;  %v12395_v4 = vld [vmem:[%s15964_s17 + $0x5bc] ss:$12 sps:$4 sm:$0xff]  }
0x12f0   :  { %5817 = vmatpush1.bf16.msra.mxu1 %v12335_v5  ;;  %v12396_v5 = vld [vmem:[%s15964_s17 + $0x5c0] ss:$12 sps:$4 sm:$0xff]  }
0x12f1   :  { %5818 = vmatprep.subr.bf16.mxu1 %v12340_v12  ;;  %v12397_v12 = vld [vmem:[%s15964_s17 + $0x500] ss:$12 sps:$4 sm:$0xff]  }
0x12f4   :  { %5819 = vmatpush1.bf16.msra.mxu1 %v12338_v9  ;;  %v12393_v9 = vld [vmem:[%s15964_s17 + $0x5b8] ss:$12 sps:$4 sm:$0xff]  }
0x12f5   :  { %5820 = vmatprep.subr.bf16.mxu1 %v12343_v53  ;;  %v12398_v53 = vld [vmem:[%s15964_s17 + $0x5d0] ss:$12 sps:$4 sm:$0xff]  }
0x12f8   :  { %5821 = vmatpush1.bf16.msra.mxu1 %v12341_v59  ;;  %v12400_v59 = vld [vmem:[%s15964_s17 + $0x5d4] ss:$12 sps:$4 sm:$0xff]  }
0x12f9   :  { %6243 = vmatprep.subr.bf16.mxu1 %v12346_v60  ;;  %v12401_v60 = vld [vmem:[%s15964_s17 + $0x5d8] ss:$12 sps:$4 sm:$0xff]  }
0x134e   :  { %v10426_v1 = vpop.f32.mrb[48].mxu0 }
0x134f   :  { %v10427_v2 = vpop.f32.mrb[49].mxu0 }
0x1350   :  { %v10428_v7 = vadd.f32 %v10427_v2, %v10426_v1  ;;  %v10429_v8 = vpop.f32.mrb[50].mxu0  ;;  %v12402_v1 = vld [vmem:[%s15964_s17 + $0x518] ss:$12 sps:$4 sm:$0xff]  }
0x1351   :  { %v10430_v10 = vpop.f32.mrb[51].mxu0  ;;  %v12405_v2 = vld [vmem:[%s15964_s17 + $0x5ec] ss:$12 sps:$4 sm:$0xff]   ;;  %v12403_v8 = vld [vmem:[%s15964_s17 + $0x5e8] ss:$12 sps:$4 sm:$0xff]  }
0x1352   :  { %v12407_v10 = vld [vmem:[%s15964_s17 + $0x530] ss:$12 sps:$4 sm:$0xff]  }
0x136e   :  { %v10448_v11 = vpop.f32.mrb[52].mxu0 }
0x136f   :  { %v10449_v14 = vpop.f32.mrb[53].mxu0 }
0x1370   :  { %v10450_v15 = vadd.f32 %v10449_v14, %v10448_v11  ;;  %v10451_v16 = vpop.f32.mrb[54].mxu0 }
0x1371   :  { %v10452_v17 = vpop.f32.mrb[55].mxu0 }
0x1372   :  { %v14769_v18 = vadd.f32 %v10450_v15, %v10428_v7  ;;  %v12406_v7 = vld [vmem:[%s15964_s17 + $0x5f0] ss:$12 sps:$4 sm:$0xff]  }
0x1376   :  { %v5460_v19 = vpop.f32.mrb[56].mxu0 }
0x1377   :  { %v5462_v20 = vpop.f32.mrb[57].mxu0  ;;  %v5467_v26 = vpack.c.bf16 %v5460_v19, %v5460_v19 }
0x1378   :  { %v5468_v21 = vpack.c.bf16 %v5462_v20, %v5462_v20  ;;  %v5464_v22 = vpop.f32.mrb[58].mxu0 }
0x1379   :  { %v5465_v52 = vpop.f32.mrb[59].mxu0 }
0x137a   :  { %5822 = vmatprep.mubr.bf16.mxu1 %v5468_v21  ;;  %5863 = vmatprep.mubr.bf16.mxu0 %v5468_v21 }
0x137b   :  { %5823 = vmatmul.mubr.bf16.vlgmr.msra.gmra.mrb[56].mxu1 %v5467_v26  ;;  %5864 = vmatmul.mubr.bf16.vlgmr.msra.gmra.mrb[60].mxu0 %v5467_v26 }
0x137c   :  { %5880 = vmatpush1.bf16.msra.mxu0 %v14329_v31  ;;  %5911 = vmatprep.mubr.bf16.mxu0 %v15980_v25  ;;  %v12372_v31 = vld [vmem:[%s15964_s17 + $0x488] ss:$12 sps:$4 sm:$0xff]  }
0x137d   :  { %6244 = vmatpush1.bf16.msra.mxu1 %v12344_v30  ;;  %10476 = vmatprep.subr.bf16.mxu0 %v12371_v35 }
0x137e   :  { %6245 = vmatprep.subr.bf16.mxu1 %v12349_v37  ;;  %v6345_v37 = vld [vmem:[%s15967_s20 + $0x80] sm:$0xff] }
0x1381   :  { %6246 = vmatpush1.bf16.msra.mxu1 %v12347_v41  ;;  %v6346_v41 = vld [vmem:[%s15967_s20 + $0x88] sm:$0xff] }
0x1382   :  { %6247 = vmatprep.subr.bf16.mxu1 %v12352_v39 }
0x1383   :  { %9867 = vmatmul.mubr.msk.bf16.vlgmr.msra.gmra.mrb[64].mxu0 %vm3961_vm1, %v9865_v43 }
0x1384   :  { %10477 = vmatpush3.bf16.msra.mxu0 %v12372_v31 }
0x1385   :  { %6248 = vmatpush1.bf16.msra.mxu1 %v12350_v40  ;;  %10478 = vmatprep.subr.bf16.mxu0 %v12376_v24 }
0x1386   :  { %6249 = vmatprep.subr.bf16.mxu1 %v12355_v33  ;;  %v6329_v33 = vld [vmem:[%s15967_s20] sm:$0xff] }
0x1388   :  { %10479 = vmatpush3.bf16.msra.mxu0 %v12377_v45  ;;  %v6330_v45 = vld [vmem:[%s15967_s20 + $0x8] sm:$0xff] }
0x1389   :  { %6250 = vmatpush1.bf16.msra.mxu1 %v12353_v47  ;;  %10480 = vmatprep.subr.bf16.mxu0 %v12381_v54 }
0x138a   :  { %6251 = vmatprep.subr.bf16.mxu1 %v12358_v55  ;;  %v14942_v55 = vpack.c.bf16 %v6346_v41, %v6345_v37 }
0x138c   :  { %10481 = vmatpush3.bf16.msra.mxu0 %v12382_v56  ;;  %v6347_v56 = vld [vmem:[%s15967_s20 + $0x90] sm:$0xff] }
0x138d   :  { %6252 = vmatpush1.bf16.msra.mxu1 %v12356_v57  ;;  %10482 = vmatprep.subr.bf16.mxu0 %v12386_v27  ;;  %v6348_v57 = vld [vmem:[%s15967_s20 + $0x98] sm:$0xff] }
0x138e   :  { %6253 = vmatprep.subr.bf16.mxu1 %v12361_v63  ;;  %v14957_v63 = vpack.c.bf16 %v6330_v45, %v6329_v33  ;;  %v6365_v45 = vld [vmem:[%s15967_s20 + $0x120] sm:$0xff] }
0x1390   :  { %10483 = vmatpush3.bf16.msra.mxu0 %v12387_v0  ;;  %v14961_v0 = vpack.c.bf16 %v6348_v57, %v6347_v56  ;;  %v6367_v57 = vld [vmem:[%s15967_s20 + $0x130] sm:$0xff] }
0x1391   :  { %6254 = vmatpush1.bf16.msra.mxu1 %v12359_v29  ;;  %10484 = vmatprep.subr.bf16.mxu0 %v12391_v3  ;;  %v6331_v29 = vld [vmem:[%s15967_s20 + $0x10] sm:$0xff]  ;;  %v6332_v3 = vld [vmem:[%s15967_s20 + $0x18] sm:$0xff] }
0x1392   :  { %6255 = vmatprep.subr.bf16.mxu1 %v12364_v6  ;;  %v6349_v6 = vld [vmem:[%s15967_s20 + $0xa0] sm:$0xff] }
0x1394   :  { %10485 = vmatpush3.bf16.msra.mxu0 %v12392_v46  ;;  %v6350_v46 = vld [vmem:[%s15967_s20 + $0xa8] sm:$0xff] }
0x1395   :  { %6256 = vmatpush1.bf16.msra.mxu1 %v12362_v48  ;;  %10486 = vmatprep.subr.bf16.mxu0 %v12396_v5  ;;  %v14979_v48 = vpack.c.bf16 %v6332_v3, %v6331_v29  ;;  %v6337_v5 = vld [vmem:[%s15967_s20 + $0x40] sm:$0xff]  ;;  %v6368_v29 = vld [vmem:[%s15967_s20 + $0x138] sm:$0xff] }
0x1396   :  { %6257 = vmatprep.subr.bf16.mxu1 %v12367_v49  ;;  %v14982_v49 = vpack.c.bf16 %v6350_v46, %v6349_v6  ;;  %v15124_v3 = vpack.c.bf16 %v6368_v29, %v6367_v57  ;;  %v6369_v6 = vld [vmem:[%s15967_s20 + $0x140] sm:$0xff]  ;;  %v6370_v46 = vld [vmem:[%s15967_s20 + $0x148] sm:$0xff]  ;;  %v6392_v57 = vld [vmem:[%s15968_s21 + $0x78] sm:$0xff] }
0x1397   :  { %v6391_v29 = vld [vmem:[%s15968_s21 + $0x70] sm:$0xff] }
0x1398   :  { %10487 = vmatpush3.bf16.msra.mxu0 %v12397_v12  ;;  %v6355_v12 = vld [vmem:[%s15967_s20 + $0xd0] sm:$0xff] }
0x1399   :  { %6258 = vmatpush1.bf16.msra.mxu1 %v12365_v13  ;;  %10488 = vmatprep.subr.bf16.mxu0 %v12401_v60  ;;  %v6333_v13 = vld [vmem:[%s15967_s20 + $0x20] sm:$0xff] }
0x139a   :  { %6259 = vmatprep.subr.bf16.mxu1 %v12370_v44  ;;  %v6334_v44 = vld [vmem:[%s15967_s20 + $0x28] sm:$0xff] }
0x139c   :  { %10489 = vmatpush3.bf16.msra.mxu0 %v12402_v1  ;;  %v6339_v1 = vld [vmem:[%s15967_s20 + $0x50] sm:$0xff] }
0x139d   :  { %6260 = vmatpush1.bf16.msra.mxu1 %v12368_v32  ;;  %10490 = vmatprep.subr.bf16.mxu0 %v12406_v7  ;;  %v6351_v32 = vld [vmem:[%s15967_s20 + $0xb0] sm:$0xff]  ;;  %v6357_v7 = vld [vmem:[%s15967_s20 + $0xe0] sm:$0xff] }
0x139e   :  { %6261 = vmatprep.subr.bf16.mxu1 %v12375_v34  ;;  %v6352_v34 = vld [vmem:[%s15967_s20 + $0xb8] sm:$0xff] }
0x13a0   :  { %10491 = vmatpush3.bf16.msra.mxu0 %v12407_v10 }
0x13a1   :  { %6262 = vmatpush1.bf16.msra.mxu1 %v12373_v36  ;;  %v14997_v36 = vpack.c.bf16 %v6334_v44, %v6333_v13  ;;  %v15134_v13 = vpack.c.bf16 %v6370_v46, %v6369_v6  ;;  %v6371_v44 = vld [vmem:[%s15967_s20 + $0x150] sm:$0xff]  ;;  %v6394_v6 = vld [vmem:[%s15968_s21 + $0x88] sm:$0xff]  ;;  %v6396_v46 = vld [vmem:[%s15968_s21 + $0x98] sm:$0xff] }
0x13a2   :  { %6263 = vmatprep.subr.bf16.mxu1 %v12380_v42  ;;  %v15000_v42 = vpack.c.bf16 %v6352_v34, %v6351_v32  ;;  %v6372_v32 = vld [vmem:[%s15967_s20 + $0x158] sm:$0xff] }
0x13a3   :  { %v15144_v34 = vpack.c.bf16 %v6372_v32, %v6371_v44  ;;  %v6399_v44 = vld [vmem:[%s15968_s21 + $0xb0] sm:$0xff] }
0x13a5   :  { %6264 = vmatpush1.bf16.msra.mxu1 %v12378_v28  ;;  %v6335_v28 = vld [vmem:[%s15967_s20 + $0x30] sm:$0xff] }
0x13a6   :  { %6265 = vmatprep.subr.bf16.mxu1 %v12385_v50  ;;  %v6336_v50 = vld [vmem:[%s15967_s20 + $0x38] sm:$0xff] }
0x13a9   :  { %6266 = vmatpush1.bf16.msra.mxu1 %v12383_v51  ;;  %v6353_v51 = vld [vmem:[%s15967_s20 + $0xc0] sm:$0xff] }
0x13aa   :  { %6267 = vmatprep.subr.bf16.mxu1 %v12390_v61  ;;  %v6354_v61 = vld [vmem:[%s15967_s20 + $0xc8] sm:$0xff] }
0x13ad   :  { %6268 = vmatpush1.bf16.msra.mxu1 %v12388_v62  ;;  %v15015_v62 = vpack.c.bf16 %v6336_v50, %v6335_v28  ;;  %v6373_v28 = vld [vmem:[%s15967_s20 + $0x160] sm:$0xff]  ;;  %v6374_v50 = vld [vmem:[%s15967_s20 + $0x168] sm:$0xff] }
0x13ae   :  { %6269 = vmatprep.subr.bf16.mxu1 %v12395_v4  ;;  %v15018_v4 = vpack.c.bf16 %v6354_v61, %v6353_v51  ;;  %v15154_v51 = vpack.c.bf16 %v6374_v50, %v6373_v28  ;;  %v6375_v61 = vld [vmem:[%s15967_s20 + $0x170] sm:$0xff]  ;;  %v15252_v28 = vpack.c.bf16 %v6394_v6, %v6391_v29  ;;  %v6410_v6 = vld [vmem:[%s15968_s21 + $0x108] sm:$0xff] }
0x13af   :  { %v6395_v50 = vld [vmem:[%s15968_s21 + $0x90] sm:$0xff] }
0x13b1   :  { %6270 = vmatpush1.bf16.msra.mxu1 %v12393_v9  ;;  %v6338_v9 = vld [vmem:[%s15967_s20 + $0x48] sm:$0xff] }
0x13b2   :  { %6271 = vmatprep.subr.bf16.mxu1 %v12400_v59  ;;  %v15033_v59 = vpack.c.bf16 %v6338_v9, %v6337_v5  ;;  %v6376_v5 = vld [vmem:[%s15967_s20 + $0x178] sm:$0xff] }
0x13b3   :  { %v15164_v9 = vpack.c.bf16 %v6376_v5, %v6375_v61  ;;  %v15259_v61 = vpack.c.bf16 %v6399_v44, %v6396_v46  ;;  %v6398_v5 = vld [vmem:[%s15968_s21 + $0xa8] sm:$0xff]  ;;  %v6409_v46 = vld [vmem:[%s15968_s21 + $0x100] sm:$0xff]  ;;  %v6412_v44 = vld [vmem:[%s15968_s21 + $0x118] sm:$0xff] }
0x13b5   :  { %6272 = vmatpush1.bf16.msra.mxu1 %v12398_v53  ;;  %v6356_v53 = vld [vmem:[%s15967_s20 + $0xd8] sm:$0xff] }
0x13b6   :  { %6273 = vmatprep.subr.bf16.mxu1 %v12405_v2  ;;  %v15036_v60 = vpack.c.bf16 %v6356_v53, %v6355_v12  ;;  %v6340_v2 = vld [vmem:[%s15967_s20 + $0x58] sm:$0xff]  ;;  %v6378_v12 = vld [vmem:[%s15968_s21 + $0x8] sm:$0xff]  ;;  %v6381_v53 = vld [vmem:[%s15968_s21 + $0x20] sm:$0xff] }
0x13b7   :  { %v15051_v10 = vpack.c.bf16 %v6340_v2, %v6339_v1  ;;  %v6377_v1 = vld [vmem:[%s15968_s21] sm:$0xff]  ;;  %v15178_v2 = vpack.c.bf16 %v6381_v53, %v6378_v12  ;;  %v6400_v53 = vld [vmem:[%s15968_s21 + $0xb8] sm:$0xff] }
0x13b8   :  { %v6397_v12 = vld [vmem:[%s15968_s21 + $0xa0] sm:$0xff] }
0x13b9   :  { %6274 = vmatpush1.bf16.msra.mxu1 %v12403_v8  ;;  %v6358_v8 = vld [vmem:[%s15967_s20 + $0xe8] sm:$0xff] }
0x144e   :  { %v10470_v11 = vpop.f32.mrb[60].mxu0 }
0x144f   :  { %v10471_v14 = vpop.f32.mrb[61].mxu0 }
0x1450   :  { %v10472_v15 = vadd.f32 %v10471_v14, %v10470_v11  ;;  %v10473_v16 = vpop.f32.mrb[62].mxu0  ;;  %v15054_v11 = vpack.c.bf16 %v6358_v8, %v6357_v7  ;;  %v6341_v14 = vld [vmem:[%s15967_s20 + $0x60] sm:$0xff]  ;;  %v6380_v7 = vld [vmem:[%s15968_s21 + $0x18] sm:$0xff]  ;;  %v6379_v8 = vld [vmem:[%s15968_s21 + $0x10] sm:$0xff] }
0x1451   :  { %v10474_v17 = vpop.f32.mrb[63].mxu0  ;;  %v6359_v16 = vld [vmem:[%s15967_s20 + $0xf0] sm:$0xff] }
0x1452   :  { %v5873_v19 = vadd.f32 %v10472_v15, %v14769_v18  ;;  %v6342_v15 = vld [vmem:[%s15967_s20 + $0x68] sm:$0xff]  ;;  %v6360_v17 = vld [vmem:[%s15967_s20 + $0xf8] sm:$0xff] }
0x1456   :  { %v5913_v20 = vpop.f32.mrb[64].mxu0 }
0x1457   :  { %v5915_v21 = vpop.f32.mrb[65].mxu0  ;;  %v5920_v52 = vpack.c.bf16 %v5913_v20, %v5913_v20  ;;  %v15072_v20 = vpack.c.bf16 %v6360_v17, %v6359_v16  ;;  %v6384_v17 = vld [vmem:[%s15968_s21 + $0x38] sm:$0xff] }
0x1458   :  { %v5921_v22 = vpack.c.bf16 %v5915_v21, %v5915_v21  ;;  %v5917_v26 = vpop.f32.mrb[66].mxu0  ;;  %v6343_v21 = vld [vmem:[%s15967_s20 + $0x70] sm:$0xff] }
0x1459   :  { %v5918_v30 = vpop.f32.mrb[67].mxu0 }
0x145a   :  { %6275 = vmatprep.mubr.bf16.mxu1 %v5921_v22  ;;  %6316 = vmatprep.mubr.bf16.mxu0 %v5921_v22  ;;  %v6344_v22 = vld [vmem:[%s15967_s20 + $0x78] sm:$0xff]  ;;  %v6361_v30 = vld [vmem:[%s15967_s20 + $0x100] sm:$0xff] }
0x145b   :  { %6276 = vmatmul.mubr.bf16.vlgmr.msra.gmra.mrb[56].mxu1 %v5920_v52  ;;  %6317 = vmatmul.mubr.bf16.vlgmr.msra.gmra.mrb[68].mxu0 %v5920_v52  ;;  %v15081_v26 = vpack.c.bf16 %v6344_v22, %v6343_v21  ;;  %v12538_v52 = vmov 0.0|0.0   ;;  %v6387_v21 = vld [vmem:[%s15968_s21 + $0x50] sm:$0xff] }
0x145c   :  { %6502 = vmatprep.mubr.f32.mxu0 %v12535_v38  ;;  %10909 = vmatprep.mubr.msk.f32.mxu1 %vm12537_vm4, %v12535_v38  ;;  %v6383_v22 = vld [vmem:[%s15968_s21 + $0x30] sm:$0xff] }
0x145d   :  { %11422 = vmatprep.subr.bf16.mxu1 %v12538_v52 }
0x152e   :  { %v14922_v35 = vpop.f32.mrb[56].mxu1  ;;  %v10492_v18 = vpop.f32.mrb[68].mxu0 }
0x152f   :  { %v14930_v39 = vpop.f32.mrb[57].mxu1  ;;  %v10493_v43 = vpop.f32.mrb[69].mxu0 }
0x1530   :  { %v10494_v31 = vadd.f32 %v10493_v43, %v10492_v18  ;;  %v6281_v40 = vpop.f32.mrb[58].mxu1  ;;  %v10495_v24 = vpop.f32.mrb[70].mxu0  ;;  %9980 = vmatprep.subr.msk.mxu0 %vm6428_vm5, %v14930_v39  ;;  %v6362_v18 = vld [vmem:[%s15967_s20 + $0x108] sm:$0xff] }
0x1531   :  { %v6282_v47 = vpop.f32.mrb[59].mxu1  ;;  %v10496_v54 = vpop.f32.mrb[71].mxu0  ;;  %9981 = vmatpush1.msk.msra.mxu0 %vm6428_vm5, %v14922_v35  ;;  %v15093_v41 = vpack.c.bf16 %v6362_v18, %v6361_v30  ;;  %v6364_v40 = vld [vmem:[%s15967_s20 + $0x118] sm:$0xff]  ;;  %v15203_v30 = vpack.c.bf16 %v6387_v21, %v6384_v17  ;;  %v6386_v18 = vld [vmem:[%s15968_s21 + $0x48] sm:$0xff]  ;;  %v6401_v17 = vld [vmem:[%s15968_s21 + $0xc0] sm:$0xff] }
0x1532   :  { %v14950_v27 = vadd.f32 %v10494_v31, %v5873_v19  ;;  %9982 = vmatmul.mubr.msk.f32.vlgmr.msra.gmra.mrb[34].mxu0 %vm6425_vm6, %v12536_v58  ;;  %10837 = vmatprep.subr.mxu0 %v12535_v38  ;;  %v15069_v19 = vpack.c.bf16 %v6342_v15, %v6341_v14  ;;  %v6363_v31 = vld [vmem:[%s15967_s20 + $0x110] sm:$0xff]  ;;  %v6366_v47 = vld [vmem:[%s15967_s20 + $0x128] sm:$0xff]  ;;  %v15189_v15 = vpack.c.bf16 %v6380_v7, %v6377_v1  ;;  %v6405_v7 = vld [vmem:[%s15968_s21 + $0xe0] sm:$0xff] }
0x1533   :  { %10839 = vmatprep.mubr.msk.f32.mxu0 %vm12537_vm4, %v12535_v38  ;;  %v15102_v24 = vpack.c.bf16 %v6364_v40, %v6363_v31  ;;  %v15114_v56 = vpack.c.bf16 %v6366_v47, %v6365_v45  ;;  %v6382_v14 = vld [vmem:[%s15968_s21 + $0x28] sm:$0xff]  ;;  %v15216_v31 = vpack.c.bf16 %v6386_v18, %v6383_v22  ;;  %v6393_v45 = vld [vmem:[%s15968_s21 + $0x80] sm:$0xff]  ;;  %v6404_v22 = vld [vmem:[%s15968_s21 + $0xd8] sm:$0xff] }
0x1534   :  { %10838 = vmatpush3.msk.msra.mxu0 %vm6428_vm5, %v14950_v27  ;;  %v15191_v16 = vpack.c.bf16 %v6382_v14, %v6379_v8  ;;  %v6389_v47 = vld [vmem:[%s15968_s21 + $0x60] sm:$0xff]  ;;  %v6402_v1 = vld [vmem:[%s15968_s21 + $0xc8] sm:$0xff]  ;;  %v15278_v8 = vpack.c.bf16 %v6398_v5, %v6395_v50  ;;  %v15280_v14 = vpack.c.bf16 %v6400_v53, %v6397_v12  ;;  %v6403_v18 = vld [vmem:[%s15968_s21 + $0xd0] sm:$0xff]  ;;  %v15336_v53 = vpack.c.bf16 %v6412_v44, %v6409_v46 }
0x1535   :  { %11335 = vmatprep.subr.bf16.mxu0 %v14942_v55  ;;  %v15250_v32 = vpack.c.bf16 %v6392_v57, %v6389_v47  ;;  %v15287_v21 = vpack.c.bf16 %v6405_v7, %v6402_v1  ;;  %v6407_v57 = vld [vmem:[%s15968_s21 + $0xf0] sm:$0xff]  ;;  %v6414_v50 = vld [vmem:[%s15968_s21 + $0x128] sm:$0xff]  ;;  %v6417_v5 = vld [vmem:[%s15968_s21 + $0x140] sm:$0xff] }
0x1536   :  { %10840 = vmatmul.mubr.msk.f32.vlgmr.msra.gmra.mrb[72].mxu0 %vm6425_vm6, %v12536_v58  ;;  %11424 = vmatpush3.bf16.msra.mxu1 %v15191_v16  ;;  %v15334_v12 = vpack.c.bf16 %v6410_v6, %v6407_v57  ;;  %v6413_v1 = vld [vmem:[%s15968_s21 + $0x120] sm:$0xff]  ;;  %v15343_v7 = vpack.c.bf16 %v6417_v5, %v6414_v50  ;;  %v6423_v57 = vld [vmem:[%s15968_s21 + $0x170] sm:$0xff]  ;;  %v6422_v44 = vld [vmem:[%s15968_s21 + $0x168] sm:$0xff] }
0x1537   :  { %11337 = vmatpush3.bf16.msra.mxu0 %v14957_v63  ;;  %11425 = vmatprep.subr.bf16.mxu1 %v12538_v52  ;;  %v6419_v46 = vld [vmem:[%s15968_s21 + $0x150] sm:$0xff]  ;;  %v6421_v50 = vld [vmem:[%s15968_s21 + $0x160] sm:$0xff] }
0x1538   :  { %11339 = vmatprep.subr.bf16.mxu0 %v14961_v0  ;;  %v15382_v5 = vpack.c.bf16 %v6422_v44, %v6419_v46 }
0x153b   :  { %11341 = vmatpush3.bf16.msra.mxu0 %v14979_v48 }
0x153c   :  { %11343 = vmatprep.subr.bf16.mxu0 %v14982_v49 }
0x153f   :  { %11345 = vmatpush3.bf16.msra.mxu0 %v14997_v36 }
0x1540   :  { %11347 = vmatprep.subr.bf16.mxu0 %v15000_v42 }
0x1543   :  { %11349 = vmatpush3.bf16.msra.mxu0 %v15015_v62 }
0x1544   :  { %11351 = vmatprep.subr.bf16.mxu0 %v15018_v4 }
0x1547   :  { %11353 = vmatpush3.bf16.msra.mxu0 %v15033_v59 }
0x1548   :  { %11355 = vmatprep.subr.bf16.mxu0 %v15036_v60 }
0x154b   :  { %11357 = vmatpush3.bf16.msra.mxu0 %v15051_v10 }
0x154c   :  { %11359 = vmatprep.subr.bf16.mxu0 %v15054_v11 }
0x154f   :  { %11361 = vmatpush3.bf16.msra.mxu0 %v15069_v19 }
0x1550   :  { %11363 = vmatprep.subr.bf16.mxu0 %v15072_v20 }
0x1553   :  { %11365 = vmatpush3.bf16.msra.mxu0 %v15081_v26 }
0x1554   :  { %11366 = vmatprep.subr.bf16.mxu0 %v12538_v52 }
0x1605   :  { %v6504_v37 = vpop.f32.mrb[34].mxu0 }
0x1606   :  { %v6506_v43 = vpop.f32.mrb[35].mxu0 }
0x1607   :  { %6643 = vmatprep.mubr.f32.mxu0 %v6506_v43  ;;  %v6388_v43 = vld [vmem:[%s15968_s21 + $0x58] sm:$0xff] }
0x1608   :  { %6644 = vmatmul.mubr.f32.vlgmr.msra.gmra.mrb[74].mxu0 %v6504_v37  ;;  %v6385_v37 = vld [vmem:[%s15968_s21 + $0x40] sm:$0xff] }
0x1609   :  { %11368 = vmatpush3.bf16.msra.mxu0 %v15093_v41  ;;  %v6575_v33 = vpop.f32.mrb[72].mxu0  ;;  %10874 = vmatprep.mubr.msk.f32.mxu0 %vm12537_vm4, %v12535_v38  ;;  %v15218_v40 = vpack.c.bf16 %v6388_v43, %v6385_v37  ;;  %v6406_v37 = vld [vmem:[%s15968_s21 + $0xe8] sm:$0xff]  ;;  %v6408_v43 = vld [vmem:[%s15968_s21 + $0xf8] sm:$0xff] }
0x160a   :  { %11369 = vmatprep.subr.bf16.mxu0 %v12538_v52  ;;  %v10841_v54 = vpop.f32.mrb[73].mxu0  ;;  %v15308_v47 = vpack.c.bf16 %v6406_v37, %v6403_v18  ;;  %v6418_v18 = vld [vmem:[%s15968_s21 + $0x148] sm:$0xff] }
0x160b   :  { %11427 = vmatpush3.bf16.msra.mxu1 %v15218_v40 }
0x160c   :  { %11428 = vmatprep.subr.bf16.mxu1 %v12538_v52 }
0x160d   :  { %11371 = vmatpush3.bf16.msra.mxu0 %v15102_v24 }
0x160e   :  { %11372 = vmatprep.subr.bf16.mxu0 %v12538_v52 }
0x160f   :  { %11430 = vmatpush3.bf16.msra.mxu1 %v15252_v28 }
0x1610   :  { %11431 = vmatprep.subr.bf16.mxu1 %v12538_v52 }
0x1611   :  { %11374 = vmatpush3.bf16.msra.mxu0 %v15114_v56 }
0x1612   :  { %11375 = vmatprep.subr.bf16.mxu0 %v12538_v52 }
0x1613   :  { %11433 = vmatpush3.bf16.msra.mxu1 %v15280_v14 }
0x1614   :  { %11434 = vmatprep.subr.bf16.mxu1 %v12538_v52 }
0x1615   :  { %11377 = vmatpush3.bf16.msra.mxu0 %v15124_v3 }
0x1616   :  { %11378 = vmatprep.subr.bf16.mxu0 %v12538_v52 }
0x1617   :  { %11436 = vmatpush3.bf16.msra.mxu1 %v15308_v47 }
0x1618   :  { %11437 = vmatprep.subr.bf16.mxu1 %v12538_v52 }
0x1619   :  { %11380 = vmatpush3.bf16.msra.mxu0 %v15134_v13 }
0x161a   :  { %11381 = vmatprep.subr.bf16.mxu0 %v12538_v52 }
0x161b   :  { %11439 = vmatpush3.bf16.msra.mxu1 %v15336_v53 }
0x161c   :  { %11440 = vmatprep.subr.bf16.mxu1 %v12538_v52 }
0x161d   :  { %11383 = vmatpush3.bf16.msra.mxu0 %v15144_v34 }
0x161e   :  { %11384 = vmatprep.subr.bf16.mxu0 %v12538_v52 }
0x1621   :  { %11386 = vmatpush3.bf16.msra.mxu0 %v15154_v51 }
0x1622   :  { %11387 = vmatprep.subr.bf16.mxu0 %v12538_v52 }
0x1625   :  { %11389 = vmatpush3.bf16.msra.mxu0 %v15164_v9 }
0x1626   :  { %11391 = vmatprep.subr.bf16.mxu0 %v15178_v2 }
0x1628   :  { %10875 = vmatmul.mubr.f32.vlgmr.msra.gmra.mrb[76].mxu0 %v6575_v33  ;;  %v6390_v33 = vld [vmem:[%s15968_s21 + $0x68] sm:$0xff] }
0x1629   :  { %6784 = vmatprep.mubr.f32.mxu0 %v12535_v38  ;;  %11393 = vmatpush1.bf16.msra.mxu0 %v15189_v15  ;;  %v15231_v54 = vpack.c.bf16 %v6393_v45, %v6390_v33  ;;  %v6411_v33 = vld [vmem:[%s15968_s21 + $0x110] sm:$0xff]  ;;  %v15306_v45 = vpack.c.bf16 %v6404_v22, %v6401_v17  ;;  %v6416_v17 = vld [vmem:[%s15968_s21 + $0x138] sm:$0xff] }
0x162a   :  { %11395 = vmatprep.subr.bf16.mxu0 %v15203_v30  ;;  %v15315_v29 = vpack.c.bf16 %v6411_v33, %v6408_v43  ;;  %v6415_v22 = vld [vmem:[%s15968_s21 + $0x130] sm:$0xff]  ;;  %v15356_v37 = vpack.c.bf16 %v6416_v17, %v6413_v1  ;;  %v6420_v33 = vld [vmem:[%s15968_s21 + $0x158] sm:$0xff] }
0x162b   :  { %v15358_v43 = vpack.c.bf16 %v6418_v18, %v6415_v22  ;;  %v15370_v6 = vpack.c.bf16 %v6423_v57, %v6420_v33  ;;  %v6424_v1 = vld [vmem:[%s15968_s21 + $0x178] sm:$0xff] }
0x162c   :  { %v15388_v17 = vpack.c.bf16 %v6424_v1, %v6421_v50  ;;  %v6327_v1 = vld [vmem:[%s15965_s18] sm:$0x1] }
0x162d   :  { %11397 = vmatpush1.bf16.msra.mxu0 %v15216_v31  ;;  %11442 = vmatpush3.bf16.msra.mxu1 %v15358_v43 }
0x162e   :  { %11399 = vmatprep.subr.bf16.mxu0 %v15231_v54  ;;  %11443 = vmatprep.subr.bf16.mxu1 %v12538_v52 }
0x1631   :  { %11401 = vmatpush1.bf16.msra.mxu0 %v15250_v32  ;;  %11445 = vmatpush3.bf16.msra.mxu1 %v15388_v17 }
0x1632   :  { %11403 = vmatprep.subr.bf16.mxu0 %v15259_v61  ;;  %11447 = vmatprep.subr.bf16.mxu1 %v14942_v55 }
0x1635   :  { %11405 = vmatpush1.bf16.msra.mxu0 %v15278_v8 }
0x1636   :  { %11407 = vmatprep.subr.bf16.mxu0 %v15287_v21 }
0x1639   :  { %11409 = vmatpush1.bf16.msra.mxu0 %v15306_v45 }
0x163a   :  { %11411 = vmatprep.subr.bf16.mxu0 %v15315_v29 }
0x163d   :  { %11413 = vmatpush1.bf16.msra.mxu0 %v15334_v12 }
0x163e   :  { %11415 = vmatprep.subr.bf16.mxu0 %v15343_v7 }
0x1641   :  { %11417 = vmatpush1.bf16.msra.mxu0 %v15356_v37 }
0x1642   :  { %11419 = vmatprep.subr.bf16.mxu0 %v15370_v6 }
0x1645   :  { %11421 = vmatpush1.bf16.msra.mxu0 %v15382_v5 }
0x16db   :  { %v10532_v22 = vpop.f32.mrb[74].mxu0 }
0x16dc   :  { %v10533_v18 = vpop.f32.mrb[75].mxu0 }
0x16dd   :  { %v10534_v33 = vadd.f32 %v10533_v18, %v10532_v22 }
0x16fb   :  { %v6715_v57 = vpop.f32.mrb[76].mxu0 }
0x16fc   :  { %v6716_v46 = vadd.f32 %v10534_v33, %v6715_v57  ;;  %v10876_v44 = vpop.f32.mrb[77].mxu0 }
0x16fe   :  { %v15393_v25 = vmul.f32 0.055555556, %v6716_v46 }
0x1700   :  { %6785 = vmatmul.mubr.f32.vlgmr.msra.gmra.mrb[78].mxu0 %v15393_v25  ;;  %10910 = vmatmul.mubr.f32.vlgmr.msra.gmra.mrb[46].mxu1 %v15393_v25 }
0x1701   :  { %6952 = vmatprep.mubr.f32.mxu0 %v12535_v38  ;;  %11449 = vmatpush3.bf16.msra.mxu1 %v14957_v63 }
0x1702   :  { %11451 = vmatprep.subr.bf16.mxu1 %v14961_v0 }
0x1705   :  { %11453 = vmatpush3.bf16.msra.mxu1 %v14979_v48 }
0x1706   :  { %11455 = vmatprep.subr.bf16.mxu1 %v14982_v49 }
0x1709   :  { %11457 = vmatpush3.bf16.msra.mxu1 %v14997_v36 }
0x170a   :  { %11459 = vmatprep.subr.bf16.mxu1 %v15000_v42 }
0x170d   :  { %11461 = vmatpush3.bf16.msra.mxu1 %v15015_v62 }
0x170e   :  { %11463 = vmatprep.subr.bf16.mxu1 %v15018_v4 }
0x1711   :  { %11465 = vmatpush3.bf16.msra.mxu1 %v15033_v59 }
0x1712   :  { %11467 = vmatprep.subr.bf16.mxu1 %v15036_v60 }
0x1715   :  { %11469 = vmatpush3.bf16.msra.mxu1 %v15051_v10 }
0x1716   :  { %11471 = vmatprep.subr.bf16.mxu1 %v15054_v11 }
0x1719   :  { %11473 = vmatpush3.bf16.msra.mxu1 %v15069_v19 }
0x171a   :  { %11475 = vmatprep.subr.bf16.mxu1 %v15072_v20 }
0x171d   :  { %11477 = vmatpush3.bf16.msra.mxu1 %v15081_v26 }
0x171e   :  { %11503 = vmatprep.subr.bf16.mxu1 %v15178_v2 }
0x17d3   :  { %v6786_v55 = vpop.f32.mrb[78].mxu0  ;;  %v6857_v63 = vpop.f32.mrb[46].mxu1 }
0x17d4   :  { %v6864_v0 = vrot.slane %v6786_v55, %v12892_v23  ;;  %v6872_v48 = vrot.slane %v6857_v63, %v12892_v23  ;;  %v6788_v49 = vpop.f32.mrb[79].mxu0  ;;  %v10911_v36 = vpop.f32.mrb[47].mxu1  ;;  %v7500_v63 = vld [vmem:[%s15969_s22] sm:$0x3] }
0x17d5   :  { %v6868_v42 = vrot.slane %v6788_v49, %v12892_v23  ;;  %v12408_v49 = vld [vmem:[%s15970_s23 + $0x140] sm:$0xff]  }
0x17d6   :  { %v6873_v62 = vsub.f32 %v14922_v35, %v6864_v0  ;;  %v6875_v59 = vsub.f32 %v14950_v27, %v6872_v48  ;;  %v12409_v0 = vld [vmem:[%s15970_s23 + $0x100] sm:$0xff]  }
0x17d7   :  { %v6874_v4 = vsub.f32 %v14930_v39, %v6868_v42  ;;  %v9993_v48 = vld [vmem:[%s15969_s22 + $0x2] sm:$0x3]  ;;  %v12412_v42 = vld [vmem:[%s15970_s23 + $0x108] sm:$0xff]  }
0x17d8   :  { %v6876_v10 = vmul.f32 %v6873_v62, %v6873_v62  ;;  %v6878_v11 = vmul.f32 %v6875_v59, %v6875_v59  ;;  %v12410_v36 = vld [vmem:[%s15970_s23 + $0xc0] sm:$0xff]   ;;  %v12411_v62 = vld [vmem:[%s15970_s23 + $0x148] sm:$0xff]   ;;  %v12415_v59 = vld [vmem:[%s15970_s23 + $0x110] sm:$0xff]  }
0x17d9   :  { %v6877_v60 = vmul.f32 %v6874_v4, %v6874_v4  ;;  %v12413_v4 = vld [vmem:[%s15970_s23 + $0xc8] sm:$0xff]  }
0x17db   :  { %9985 = vmatprep.subr.msk.mxu0 %vm6428_vm5, %v6877_v60  ;;  %v12414_v60 = vld [vmem:[%s15970_s23 + $0x150] sm:$0xff]  }
0x17dc   :  { %9986 = vmatpush1.msk.msra.mxu0 %vm6428_vm5, %v6876_v10  ;;  %v12416_v10 = vld [vmem:[%s15970_s23 + $0xd0] sm:$0xff]  }
0x17dd   :  { %9987 = vmatmul.mubr.msk.f32.vlgmr.msra.gmra.mrb[80].mxu0 %vm6425_vm6, %v12536_v58  ;;  %10912 = vmatprep.subr.mxu0 %v12535_v38 }
0x17de   :  { %10913 = vmatpush3.msk.msra.mxu0 %vm6428_vm5, %v6878_v11  ;;  %10914 = vmatprep.mubr.msk.f32.mxu0 %vm12537_vm4, %v12535_v38  ;;  %v12418_v11 = vld [vmem:[%s15970_s23 + $0x118] sm:$0xff]  }
0x17df   :  { %11478 = vmatprep.subr.bf16.mxu0 %v12538_v52 }
0x17e1   :  { %10915 = vmatmul.mubr.msk.f32.vlgmr.msra.gmra.mrb[82].mxu0 %vm6425_vm6, %v12536_v58 }
0x17e2   :  { %11480 = vmatpush3.bf16.msra.mxu0 %v15093_v41  ;;  %10949 = vmatprep.mubr.msk.f32.mxu0 %vm12537_vm4, %v12535_v38 }
0x17e3   :  { %11481 = vmatprep.subr.bf16.mxu0 %v12538_v52 }
0x17e6   :  { %11483 = vmatpush3.bf16.msra.mxu0 %v15102_v24 }
0x17e7   :  { %11484 = vmatprep.subr.bf16.mxu0 %v12538_v52 }
0x17ea   :  { %11486 = vmatpush3.bf16.msra.mxu0 %v15114_v56 }
0x17eb   :  { %11487 = vmatprep.subr.bf16.mxu0 %v12538_v52 }
0x17ee   :  { %11489 = vmatpush3.bf16.msra.mxu0 %v15124_v3 }
0x17ef   :  { %11490 = vmatprep.subr.bf16.mxu0 %v12538_v52 }
0x17f2   :  { %11492 = vmatpush3.bf16.msra.mxu0 %v15134_v13 }
0x17f3   :  { %11493 = vmatprep.subr.bf16.mxu0 %v12538_v52 }
0x17f6   :  { %11495 = vmatpush3.bf16.msra.mxu0 %v15144_v34 }
0x17f7   :  { %11496 = vmatprep.subr.bf16.mxu0 %v12538_v52 }
0x17fa   :  { %11498 = vmatpush3.bf16.msra.mxu0 %v15154_v51 }
0x17fb   :  { %11499 = vmatprep.subr.bf16.mxu0 %v12538_v52 }
0x17fe   :  { %11501 = vmatpush3.bf16.msra.mxu0 %v15164_v9 }
0x17ff   :  { %11534 = vmatprep.subr.bf16.mxu0 %v12538_v52 }
0x18b0   :  { %v6954_v58 = vpop.f32.mrb[80].mxu0 }
0x18b1   :  { %v6956_v19 = vpop.f32.mrb[81].mxu0 }
0x18b2   :  { %7093 = vmatprep.mubr.f32.mxu1 %v6956_v19  ;;  %v12419_v19 = vld [vmem:[%s15970_s23 + $0xd8] sm:$0xff]  }
0x18b3   :  { %7094 = vmatmul.mubr.f32.vlgmr.msra.gmra.mrb[60].mxu1 %v6954_v58  ;;  %v12417_v58 = vld [vmem:[%s15970_s23 + $0x158] sm:$0xff]  }
0x18b4   :  { %v7025_v20 = vpop.f32.mrb[82].mxu0  ;;  %11505 = vmatpush1.bf16.msra.mxu1 %v15189_v15  ;;  %7240 = vmatprep.mubr.f32.mxu1 %v12535_v38 }
0x18b5   :  { %10950 = vmatmul.mubr.f32.vlgmr.msra.gmra.mrb[84].mxu0 %v7025_v20  ;;  %v10916_v26 = vpop.f32.mrb[83].mxu0  ;;  %11507 = vmatprep.subr.bf16.mxu1 %v15203_v30  ;;  %v12421_v20 = vld [vmem:[%s15970_s23 + $0x120] sm:$0xff]  }
0x18b6   :  { %11536 = vmatpush3.bf16.msra.mxu0 %v15191_v16  ;;  %10984 = vmatprep.mubr.msk.f32.mxu0 %vm12537_vm4, %v12535_v38  ;;  %v12420_v26 = vld [vmem:[%s15970_s23 + $0x160] sm:$0xff]  }
0x18b7   :  { %11537 = vmatprep.subr.bf16.mxu0 %v12538_v52 }
0x18b8   :  { %11509 = vmatpush1.bf16.msra.mxu1 %v15216_v31 }
0x18b9   :  { %11511 = vmatprep.subr.bf16.mxu1 %v15231_v54 }
0x18ba   :  { %11539 = vmatpush3.bf16.msra.mxu0 %v15218_v40 }
0x18bb   :  { %11540 = vmatprep.subr.bf16.mxu0 %v12538_v52 }
0x18bc   :  { %11513 = vmatpush1.bf16.msra.mxu1 %v15250_v32 }
0x18bd   :  { %11515 = vmatprep.subr.bf16.mxu1 %v15259_v61 }
0x18be   :  { %11542 = vmatpush3.bf16.msra.mxu0 %v15252_v28 }
0x18bf   :  { %11543 = vmatprep.subr.bf16.mxu0 %v12538_v52 }
0x18c0   :  { %11517 = vmatpush1.bf16.msra.mxu1 %v15278_v8 }
0x18c1   :  { %11519 = vmatprep.subr.bf16.mxu1 %v15287_v21 }
0x18c2   :  { %11545 = vmatpush3.bf16.msra.mxu0 %v15280_v14 }
0x18c3   :  { %11546 = vmatprep.subr.bf16.mxu0 %v12538_v52 }
0x18c4   :  { %11521 = vmatpush1.bf16.msra.mxu1 %v15306_v45 }
0x18c5   :  { %11523 = vmatprep.subr.bf16.mxu1 %v15315_v29 }
0x18c6   :  { %11548 = vmatpush3.bf16.msra.mxu0 %v15308_v47 }
0x18c7   :  { %11549 = vmatprep.subr.bf16.mxu0 %v12538_v52 }
0x18c8   :  { %11525 = vmatpush1.bf16.msra.mxu1 %v15334_v12 }
0x18c9   :  { %11527 = vmatprep.subr.bf16.mxu1 %v15343_v7 }
0x18ca   :  { %11551 = vmatpush3.bf16.msra.mxu0 %v15336_v53 }
0x18cb   :  { %11552 = vmatprep.subr.bf16.mxu0 %v12538_v52 }
0x18cc   :  { %11529 = vmatpush1.bf16.msra.mxu1 %v15356_v37 }
0x18cd   :  { %11531 = vmatprep.subr.bf16.mxu1 %v15370_v6 }
0x18ce   :  { %11554 = vmatpush3.bf16.msra.mxu0 %v15358_v43 }
0x18cf   :  { %11555 = vmatprep.subr.bf16.mxu0 %v12538_v52 }
0x18d0   :  { %11533 = vmatpush1.bf16.msra.mxu1 %v15382_v5 }
0x18d1   :  { %11559 = vmatprep.subr.bf16.mxu1 %v15178_v2 }
0x18d2   :  { %11557 = vmatpush3.bf16.msra.mxu0 %v15388_v17 }
0x18d3   :  { %11590 = vmatprep.subr.bf16.mxu0 %v12538_v52 }
0x1986   :  { %v10603_v41 = vpop.f32.mrb[60].mxu1 }
0x1987   :  { %v10604_v24 = vpop.f32.mrb[61].mxu1 }
0x1988   :  { %v10605_v56 = vadd.f32 %v10604_v24, %v10603_v41  ;;  %v7165_v3 = vpop.f32.mrb[84].mxu0  ;;  %v12422_v41 = vld [vmem:[%s15970_s23 + $0xe0] sm:$0xff]   ;;  %v12424_v24 = vld [vmem:[%s15970_s23 + $0x128] sm:$0xff]  }
0x1989   :  { %v10951_v13 = vpop.f32.mrb[85].mxu0 }
0x198a   :  { %v7166_v34 = vadd.f32 %v10605_v56, %v7165_v3  ;;  %v12423_v56 = vld [vmem:[%s15970_s23 + $0x168] sm:$0xff]   ;;  %v12426_v13 = vld [vmem:[%s15970_s23 + $0x170] sm:$0xff]  }
0x198b   :  { %v12425_v3 = vld [vmem:[%s15970_s23 + $0xe8] sm:$0xff]  }
0x198c   :  { %v7169_v51 = vmul.f32 0.055555556, %v7166_v34  ;;  %v12427_v34 = vld [vmem:[%s15970_s23 + $0x130] sm:$0xff]  }
0x198e   :  { %v7170_v9 = vmax.f32 %v7169_v51, 0.0  ;;  %v12428_v51 = vld [vmem:[%s15970_s23 + $0xf0] sm:$0xff]  }
0x1990   :  { %v7171_v50 = vadd.f32 1e-05, %v7170_v9  ;;  %v12429_v9 = vld [vmem:[%s15970_s23 + $0x178] sm:$0xff]  }
0x1992   :  { %12508 = vrsqrt.f32 %v7171_v50  ;;  %v12430_v50 = vld [vmem:[%s15970_s23 + $0x138] sm:$0xff]  }
0x199c   :  { %v12509_v22 = vpop.eup %12508 }
0x199d   :  { %v7173_v2 = vmul.f32 %v12509_v22, %v6327_v1  ;;  %v12431_v1 = vld [vmem:[%s15970_s23 + $0xf8] sm:$0xff]   ;;  %v12433_v22 = vld [vmem:[%s15970_s23 + $0x40] sm:$0xff]  }
0x199f   :  { %7241 = vmatmul.mubr.f32.vlgmr.msra.gmra.mrb[62].mxu1 %v7173_v2  ;;  %10985 = vmatmul.mubr.f32.vlgmr.msra.gmra.mrb[86].mxu0 %v7173_v2 }
0x19a0   :  { %11561 = vmatpush1.bf16.msra.mxu1 %v15189_v15  ;;  %11592 = vmatpush3.bf16.msra.mxu0 %v15191_v16  ;;  %v7174_v15 = vmul.f32 %v7173_v2, %v15393_v25  ;;  %v6328_v16 = vld [vmem:[%s15966_s19] sm:$0x1] }
0x19a1   :  { %11563 = vmatprep.subr.bf16.mxu1 %v15203_v30  ;;  %11593 = vmatprep.subr.bf16.mxu0 %v12538_v52 }
0x19a2   :  { %7396 = vmatprep.mubr.f32.mxu1 %v12535_v38  ;;  %11019 = vmatprep.mubr.msk.f32.mxu0 %vm12537_vm4, %v12535_v38  ;;  %v7175_v30 = vsub.f32 %v6328_v16, %v7174_v15 }
0x19a4   :  { %11565 = vmatpush1.bf16.msra.mxu1 %v15216_v31  ;;  %11595 = vmatpush3.bf16.msra.mxu0 %v15218_v40  ;;  %v16002_v31 = vmov 0  }
0x19a5   :  { %11567 = vmatprep.subr.bf16.mxu1 %v15231_v54  ;;  %11596 = vmatprep.subr.bf16.mxu0 %v12538_v52 }
0x19a8   :  { %11569 = vmatpush1.bf16.msra.mxu1 %v15250_v32  ;;  %11598 = vmatpush3.bf16.msra.mxu0 %v15252_v28 }
0x19a9   :  { %11571 = vmatprep.subr.bf16.mxu1 %v15259_v61  ;;  %11599 = vmatprep.subr.bf16.mxu0 %v12538_v52 }
0x19ac   :  { %11573 = vmatpush1.bf16.msra.mxu1 %v15278_v8  ;;  %11601 = vmatpush3.bf16.msra.mxu0 %v15280_v14 }
0x19ad   :  { %11575 = vmatprep.subr.bf16.mxu1 %v15287_v21  ;;  %11602 = vmatprep.subr.bf16.mxu0 %v12538_v52 }
0x19b0   :  { %11577 = vmatpush1.bf16.msra.mxu1 %v15306_v45  ;;  %11604 = vmatpush3.bf16.msra.mxu0 %v15308_v47 }
0x19b1   :  { %11579 = vmatprep.subr.bf16.mxu1 %v15315_v29  ;;  %11605 = vmatprep.subr.bf16.mxu0 %v12538_v52 }
0x19b4   :  { %11581 = vmatpush1.bf16.msra.mxu1 %v15334_v12  ;;  %11607 = vmatpush3.bf16.msra.mxu0 %v15336_v53 }
0x19b5   :  { %11583 = vmatprep.subr.bf16.mxu1 %v15343_v7  ;;  %11608 = vmatprep.subr.bf16.mxu0 %v12538_v52 }
0x19b8   :  { %11585 = vmatpush1.bf16.msra.mxu1 %v15356_v37  ;;  %11610 = vmatpush3.bf16.msra.mxu0 %v15358_v43 }
0x19b9   :  { %11587 = vmatprep.subr.bf16.mxu1 %v15370_v6  ;;  %11611 = vmatprep.subr.bf16.mxu0 %v12538_v52 }
0x19bc   :  { %11589 = vmatpush1.bf16.msra.mxu1 %v15382_v5  ;;  %11613 = vmatpush3.bf16.msra.mxu0 %v15388_v17 }
0x19bd   :  { %11022 = vmatprep.subr.bf16.mxu0 %v12535_v38 }
0x19bf   :  { %7397 = vmatmul.mubr.f32.vlgmr.msra.gmra.mrb[64].mxu1 %v7175_v30  ;;  %11020 = vmatmul.mubr.f32.vlgmr.msra.gmra.mrb[88].mxu0 %v7175_v30 }
0x19c0   :  { %11024 = vmatprep.mubr.msk.bf16.mxu0 %vm12537_vm4, %v12535_v38  ;;  %7546 = vmatprep.mubr.bf16.mxu1 %v16002_v31 }
0x1a72   :  { %v7242_v52 = vpop.f32.mrb[62].mxu1  ;;  %v7313_v25 = vpop.f32.mrb[86].mxu0 }
0x1a73   :  { %v7320_v40 = vrot.slane %v7242_v52, %v12892_v23  ;;  %v7244_v54 = vpop.f32.mrb[63].mxu1  ;;  %v10986_v32 = vpop.f32.mrb[87].mxu0  ;;  %v7328_v14 = vrot.slane %v7313_v25, %v12892_v23 }
0x1a74   :  { %v7324_v28 = vrot.slane %v7244_v54, %v12892_v23 }
0x1a75   :  { %v7329_v61 = vmul.f32 %v7320_v40, %v14922_v35  ;;  %v7331_v47 = vmul.f32 %v7328_v14, %v14950_v27 }
0x1a76   :  { %v7330_v8 = vmul.f32 %v7324_v28, %v14930_v39  ;;  %v12432_v28 = vld [vmem:[%s15970_s23 + $0x80] sm:$0xff]  }
0x1a92   :  { %v7398_v21 = vpop.f32.mrb[64].mxu1  ;;  %v7469_v45 = vpop.f32.mrb[88].mxu0 }
0x1a93   :  { %v7476_v29 = vrot.slane %v7398_v21, %v12892_v23  ;;  %v7484_v12 = vrot.slane %v7469_v45, %v12892_v23  ;;  %v7400_v53 = vpop.f32.mrb[65].mxu1  ;;  %v11021_v7 = vpop.f32.mrb[89].mxu0 }
0x1a94   :  { %v7480_v37 = vrot.slane %v7400_v53, %v12892_v23 }
0x1a95   :  { %v7485_v43 = vadd.f32 %v7476_v29, %v7329_v61  ;;  %v7487_v6 = vadd.f32 %v7484_v12, %v7331_v47  ;;  %v12434_v12 = vld [vmem:[%s15970_s23] sm:$0xff]  }
0x1a96   :  { %v7486_v5 = vadd.f32 %v7480_v37, %v7330_v8 }
0x1a97   :  { %vm7488_vm7 = vcmp.gt.f32.partialorder %v7485_v43, 0.0  ;;  %v7491_v35 = vmul.f32 0.2, %v7485_v43  ;;  %vm7490_vm8 = vcmp.gt.f32.partialorder %v7487_v6, 0.0  ;;  %v7493_v39 = vmul.f32 0.2, %v7487_v6 }
0x1a98   :  { %vm7489_vm9 = vcmp.gt.f32.partialorder %v7486_v5, 0.0  ;;  %v7492_v17 = vmul.f32 0.2, %v7486_v5 }
0x1a99   :  { %v7496_v18 = vsel %vm7490_vm8, %v7487_v6, %v7493_v39  ;;  %v7494_v27 = vsel %vm7488_vm7, %v7485_v43, %v7491_v35  ;;  %v12435_v43 = vld [vmem:[%s15970_s23 + $0x88] sm:$0xff]   ;;  %v12438_v39 = vld [vmem:[%s15970_s23 + $0x90] sm:$0xff]  }
0x1a9a   :  { %v7495_v33 = vsel %vm7489_vm9, %v7486_v5, %v7492_v17  ;;  %v7499_v57 = vpack.c.bf16 %v7496_v18, %v7496_v18  ;;  %v7497_v46 = vpack.c.bf16 %v7494_v27, %v7494_v27  ;;  %v12436_v6 = vld [vmem:[%s15970_s23 + $0x48] sm:$0xff]   ;;  %v12439_v17 = vld [vmem:[%s15970_s23 + $0x50] sm:$0xff]   ;;  %v12441_v27 = vld [vmem:[%s15970_s23 + $0x98] sm:$0xff]  }
0x1a9b   :  { %v15537_v44 = vpack.c.bf16 %v7495_v33, %v7495_v33  ;;  %v12437_v35 = vld [vmem:[%s15970_s23 + $0x8] sm:$0xff]   ;;  %v12440_v18 = vld [vmem:[%s15970_s23 + $0x10] sm:$0xff]   ;;  %v12442_v33 = vld [vmem:[%s15970_s23 + $0x58] sm:$0xff]  }
0x1a9c   :  { %v15540_v55 = vsel %vm7504_vm10, %v7499_v57, 0  ;;  %v15543_v23 = vsel %vm7504_vm10, %v7497_v46, 0  ;;  %v12443_v57 = vld [vmem:[%s15970_s23 + $0x18] sm:$0xff]   ;;  %v12444_v46 = vld [vmem:[%s15970_s23 + $0xa0] sm:$0xff]  }
0x1a9d   :  { %9990 = vmatprep.subr.msk.bf16.mxu1 %vm7504_vm10, %v15537_v44  ;;  %11023 = vmatpush3.bf16.msra.mxu0 %v15540_v55 }
0x1a9e   :  { %7515 = vmatpush1.bf16.msra.mxu1 %v15543_v23  ;;  %11028 = vmatprep.subr.bf16.mxu0 %v12535_v38 }
0x1a9f   :  { %9994 = vmatprep.subr.msk.bf16.mxu1 %vm7504_vm10, %v15537_v44 }
0x1aa0   :  { %11025 = vmatmul.mubr.msk.bf16.vlgmr.msra.gmra.mrb[92].mxu0 %vm6425_vm6, %v7500_v63 }
0x1aa1   :  { %9991 = vmatmul.mubr.msk.bf16.vlgmr.msra.gmra.mrb[68].mxu1 %vm6425_vm6, %v7500_v63  ;;  %11029 = vmatpush3.bf16.msra.mxu0 %v15540_v55  ;;  %v12445_v63 = vld [vmem:[%s15970_s23 + $0x60] sm:$0xff]  }
0x1aa2   :  { %7652 = vmatpush1.bf16.msra.mxu1 %v15543_v23  ;;  %11030 = vmatprep.mubr.msk.bf16.mxu0 %vm12537_vm4, %v12535_v38 }
0x1aa3   :  { %7683 = vmatprep.mubr.bf16.mxu1 %v16002_v31  ;;  %11034 = vmatprep.subr.bf16.mxu0 %v12535_v38 }
0x1aa4   :  { %10661 = vmatprep.subr.bf16.mxu1 %v12409_v0  ;;  %v12446_v0 = vld [vmem:[%s15970_s23 + $0x20] sm:$0xff]  }
0x1aa8   :  { %11031 = vmatmul.mubr.msk.bf16.vlgmr.msra.gmra.mrb[96].mxu0 %vm6425_vm6, %v9993_v48 }
0x1aa9   :  { %9995 = vmatmul.mubr.msk.bf16.vlgmr.msra.gmra.mrb[72].mxu1 %vm6425_vm6, %v9993_v48  ;;  %11035 = vmatpush3.bf16.msra.mxu0 %v12408_v49  ;;  %v12447_v48 = vld [vmem:[%s15970_s23 + $0xa8] sm:$0xff]  }
0x1aaa   :  { %10662 = vmatpush3.bf16.msra.mxu1 %v12410_v36  ;;  %11036 = vmatprep.subr.bf16.mxu0 %v12535_v38  ;;  %v12448_v49 = vld [vmem:[%s15970_s23 + $0x68] sm:$0xff]  }
0x1aab   :  { %10663 = vmatprep.subr.bf16.mxu1 %v12412_v42  ;;  %11050 = vmatprep.mubr.msk.bf16.mxu0 %vm12537_vm4, %v12535_v38  ;;  %v12449_v36 = vld [vmem:[%s15970_s23 + $0x28] sm:$0xff]   ;;  %v12450_v42 = vld [vmem:[%s15970_s23 + $0xb0] sm:$0xff]  }
0x1aad   :  { %11037 = vmatpush3.bf16.msra.mxu0 %v12411_v62  ;;  %v12451_v62 = vld [vmem:[%s15970_s23 + $0x70] sm:$0xff]  }
0x1aae   :  { %10664 = vmatpush3.bf16.msra.mxu1 %v12413_v4  ;;  %11038 = vmatprep.subr.bf16.mxu0 %v12535_v38  ;;  %v12452_v4 = vld [vmem:[%s15970_s23 + $0x30] sm:$0xff]  }
0x1aaf   :  { %10665 = vmatprep.subr.bf16.mxu1 %v12415_v59  ;;  %v12453_v59 = vld [vmem:[%s15970_s23 + $0xb8] sm:$0xff]  }
0x1ab1   :  { %11039 = vmatpush3.bf16.msra.mxu0 %v12414_v60  ;;  %v12454_v60 = vld [vmem:[%s15970_s23 + $0x78] sm:$0xff]  }
0x1ab2   :  { %10666 = vmatpush3.bf16.msra.mxu1 %v12416_v10  ;;  %11040 = vmatprep.subr.bf16.mxu0 %v12535_v38  ;;  %v12455_v10 = vld [vmem:[%s15970_s23 + $0x38] sm:$0xff]  }
0x1ab3   :  { %10667 = vmatprep.subr.bf16.mxu1 %v12418_v11 }
0x1ab5   :  { %11041 = vmatpush3.bf16.msra.mxu0 %v12417_v58 }
0x1ab6   :  { %10668 = vmatpush3.bf16.msra.mxu1 %v12419_v19  ;;  %11042 = vmatprep.subr.bf16.mxu0 %v12535_v38  ;;  %v12456_v19 = vld [vmem:[%s15970_s23 + $0x1c0] sm:$0xff]  }
0x1ab7   :  { %10669 = vmatprep.subr.bf16.mxu1 %v12421_v20  ;;  %v10093_v20 = vld [vmem:[%s15969_s22 + $0x4] sm:$0x3] }
0x1ab9   :  { %11043 = vmatpush3.bf16.msra.mxu0 %v12420_v26  ;;  %v12457_v26 = vld [vmem:[%s15970_s23 + $0x180] sm:$0xff]  }
0x1aba   :  { %10670 = vmatpush3.bf16.msra.mxu1 %v12422_v41  ;;  %11044 = vmatprep.subr.bf16.mxu0 %v12535_v38  ;;  %v12458_v41 = vld [vmem:[%s15970_s23 + $0x1c8] sm:$0xff]  }
0x1abb   :  { %10671 = vmatprep.subr.bf16.mxu1 %v12424_v24  ;;  %v12459_v24 = vld [vmem:[%s15970_s23 + $0x188] sm:$0xff]  }
0x1abd   :  { %11045 = vmatpush3.bf16.msra.mxu0 %v12423_v56  ;;  %v12460_v56 = vld [vmem:[%s15970_s23 + $0x1d0] sm:$0xff]  }
0x1abe   :  { %10672 = vmatpush3.bf16.msra.mxu1 %v12425_v3  ;;  %11046 = vmatprep.subr.bf16.mxu0 %v12535_v38  ;;  %v12461_v3 = vld [vmem:[%s15970_s23 + $0x190] sm:$0xff]  }
0x1abf   :  { %10673 = vmatprep.subr.bf16.mxu1 %v12427_v34  ;;  %v12463_v34 = vld [vmem:[%s15970_s23 + $0x198] sm:$0xff]  }
0x1ac1   :  { %11047 = vmatpush3.bf16.msra.mxu0 %v12426_v13  ;;  %v12462_v13 = vld [vmem:[%s15970_s23 + $0x1d8] sm:$0xff]  }
0x1ac2   :  { %11048 = vmatprep.subr.bf16.mxu0 %v12535_v38  ;;  %10674 = vmatpush3.bf16.msra.mxu1 %v12428_v51  ;;  %v12464_v51 = vld [vmem:[%s15970_s23 + $0x1e0] sm:$0xff]  }
0x1ac3   :  { %10675 = vmatprep.subr.bf16.mxu1 %v12430_v50  ;;  %v12466_v50 = vld [vmem:[%s15970_s23 + $0x1e8] sm:$0xff]  }
0x1ac5   :  { %11049 = vmatpush3.bf16.msra.mxu0 %v12429_v9  ;;  %v12465_v9 = vld [vmem:[%s15970_s23 + $0x1a0] sm:$0xff]  }
0x1ac6   :  { %11054 = vmatprep.subr.bf16.mxu0 %v12535_v38  ;;  %10676 = vmatpush3.bf16.msra.mxu1 %v12431_v1  ;;  %v12467_v1 = vld [vmem:[%s15970_s23 + $0x1a8] sm:$0xff]  }
0x1ac7   :  { %10692 = vmatprep.subr.bf16.mxu1 %v12433_v22  ;;  %v12468_v22 = vld [vmem:[%s15970_s23 + $0x1f0] sm:$0xff]  }
0x1b73   :  { %v15653_v2 = vpop.f32.mrb[92].mxu0 }
0x1b74   :  { %v15655_v15 = vpop.f32.mrb[68].mxu1  ;;  %v11026_v16 = vpop.f32.mrb[93].mxu0  ;;  %v7597_v11 = vpack.c.bf16 %v15653_v2, %v15653_v2  ;;  %v12469_v2 = vld [vmem:[%s15970_s23 + $0x1b0] sm:$0xff]  }
0x1b75   :  { %v7550_v30 = vpop.f32.mrb[69].mxu1  ;;  %v7592_v52 = vpop.f32.mrb[94].mxu0  ;;  %v7595_v58 = vpack.c.bf16 %v15655_v15, %v15655_v15  ;;  %v12470_v15 = vld [vmem:[%s15970_s23 + $0x1f8] sm:$0xff]  }
0x1b76   :  { %v7552_v25 = vpop.f32.mrb[70].mxu1  ;;  %v11027_v40 = vpop.f32.mrb[95].mxu0  ;;  %v7596_v5 = vpack.c.bf16 %v7550_v30, %v7550_v30  ;;  %v12471_v16 = vld [vmem:[%s15970_s23 + $0x1b8] sm:$0xff]   ;;  %v12472_v30 = vld [vmem:[%s15970_s23 + $0x200] sm:$0xff]   ;;  %v12473_v52 = vld [vmem:[%s15970_s23 + $0x208] sm:$0xff]  }
0x1b77   :  { %v7553_v54 = vpop.f32.mrb[71].mxu1  ;;  %v12474_v25 = vld [vmem:[%s15970_s23 + $0x210] sm:$0xff]   ;;  %v12476_v40 = vld [vmem:[%s15970_s23 + $0x220] sm:$0xff]  }
0x1b78   :  { %v12477_v54 = vld [vmem:[%s15970_s23 + $0x228] sm:$0xff]  }
0x1b7b   :  { %v7726_v32 = vpop.f32.mrb[96].mxu0 }
0x1b7c   :  { %v7734_v61 = vpack.c.bf16 %v7726_v32, %v7726_v32  ;;  %v7685_v8 = vpop.f32.mrb[72].mxu1  ;;  %v11032_v14 = vpop.f32.mrb[97].mxu0  ;;  %v12478_v32 = vld [vmem:[%s15970_s23 + $0x230] sm:$0xff]  }
0x1b7d   :  { %v7687_v21 = vpop.f32.mrb[73].mxu1  ;;  %v7729_v45 = vpop.f32.mrb[98].mxu0  ;;  %v7732_v7 = vpack.c.bf16 %v7685_v8, %v7685_v8 }
0x1b7e   :  { %v7733_v47 = vpack.c.bf16 %v7687_v21, %v7687_v21  ;;  %11051 = vmatmul.mubr.bf16.vlgmr.msra.gmra.mrb[100].mxu0 %v7734_v61  ;;  %v7689_v29 = vpop.f32.mrb[74].mxu1  ;;  %v11033_v53 = vpop.f32.mrb[99].mxu0 }
0x1b7f   :  { %11055 = vmatpush3.bf16.msra.mxu0 %v12432_v28  ;;  %v7690_v37 = vpop.f32.mrb[75].mxu1  ;;  %11070 = vmatprep.mubr.msk.bf16.mxu0 %vm12537_vm4, %v12535_v38  ;;  %v12479_v28 = vld [vmem:[%s15970_s23 + $0x238] sm:$0xff]  }
0x1b80   :  { %7960 = vmatprep.mubr.bf16.mxu1 %v7733_v47  ;;  %11056 = vmatprep.subr.bf16.mxu0 %v12535_v38 }
0x1b81   :  { %7961 = vmatmul.mubr.bf16.vlgmr.msra.gmra.mrb[76].mxu1 %v7732_v7 }
0x1b82   :  { %10693 = vmatpush3.bf16.msra.mxu1 %v12434_v12  ;;  %8184 = vmatprep.mubr.bf16.mxu1 %v7596_v5 }
0x1b83   :  { %11057 = vmatpush3.bf16.msra.mxu0 %v12435_v43  ;;  %10694 = vmatprep.subr.bf16.mxu1 %v12436_v6 }
0x1b84   :  { %11058 = vmatprep.subr.bf16.mxu0 %v12535_v38 }
0x1b86   :  { %10695 = vmatpush3.bf16.msra.mxu1 %v12437_v35 }
0x1b87   :  { %11059 = vmatpush3.bf16.msra.mxu0 %v12438_v39  ;;  %10696 = vmatprep.subr.bf16.mxu1 %v12439_v17 }
0x1b88   :  { %11060 = vmatprep.subr.bf16.mxu0 %v12535_v38 }
0x1b8a   :  { %10697 = vmatpush3.bf16.msra.mxu1 %v12440_v18 }
0x1b8b   :  { %11061 = vmatpush3.bf16.msra.mxu0 %v12441_v27  ;;  %10698 = vmatprep.subr.bf16.mxu1 %v12442_v33 }
0x1b8c   :  { %11062 = vmatprep.subr.bf16.mxu0 %v12535_v38 }
0x1b8e   :  { %10699 = vmatpush3.bf16.msra.mxu1 %v12443_v57 }
0x1b8f   :  { %11063 = vmatpush3.bf16.msra.mxu0 %v12444_v46  ;;  %10700 = vmatprep.subr.bf16.mxu1 %v12445_v63 }
0x1b90   :  { %11064 = vmatprep.subr.bf16.mxu0 %v12535_v38 }
0x1b92   :  { %10701 = vmatpush3.bf16.msra.mxu1 %v12446_v0 }
0x1b93   :  { %11065 = vmatpush3.bf16.msra.mxu0 %v12447_v48  ;;  %10702 = vmatprep.subr.bf16.mxu1 %v12448_v49 }
0x1b94   :  { %11066 = vmatprep.subr.bf16.mxu0 %v12535_v38 }
0x1b96   :  { %10703 = vmatpush3.bf16.msra.mxu1 %v12449_v36 }
0x1b97   :  { %11067 = vmatpush3.bf16.msra.mxu0 %v12450_v42  ;;  %10704 = vmatprep.subr.bf16.mxu1 %v12451_v62 }
0x1b98   :  { %11068 = vmatprep.subr.bf16.mxu0 %v12535_v38 }
0x1b9a   :  { %10705 = vmatpush3.bf16.msra.mxu1 %v12452_v4 }
0x1b9b   :  { %11069 = vmatpush3.bf16.msra.mxu0 %v12453_v59  ;;  %10706 = vmatprep.subr.bf16.mxu1 %v12454_v60 }
0x1b9c   :  { %11074 = vmatprep.subr.bf16.mxu0 %v12535_v38 }
0x1b9e   :  { %10707 = vmatpush3.bf16.msra.mxu1 %v12455_v10  ;;  %11071 = vmatmul.mubr.bf16.vlgmr.msra.gmra.mrb[104].mxu0 %v7597_v11  ;;  %v12480_v10 = vld [vmem:[%s15970_s23 + $0x280] sm:$0xff]  }
0x1b9f   :  { %10094 = vmatprep.subr.msk.bf16.mxu1 %vm7504_vm10, %v15537_v44  ;;  %11075 = vmatpush3.bf16.msra.mxu0 %v15540_v55  ;;  %v10169_v11 = vld [vmem:[%s15969_s22 + $0x6] sm:$0x3] }
0x1ba0   :  { %11076 = vmatprep.mubr.msk.bf16.mxu0 %vm12537_vm4, %v12535_v38  ;;  %11080 = vmatprep.subr.bf16.mxu0 %v12535_v38 }
0x1ba1   :  { %8185 = vmatmul.mubr.bf16.vlgmr.msra.gmra.mrb[80].mxu1 %v7595_v58  ;;  %v12486_v58 = vld [vmem:[%s15970_s23 + $0x2c8] sm:$0xff]  }
0x1ba2   :  { %8238 = vmatpush1.bf16.msra.mxu1 %v15543_v23  ;;  %8269 = vmatprep.mubr.bf16.mxu1 %v16002_v31 }
0x1ba3   :  { %10725 = vmatprep.subr.bf16.mxu1 %v12456_v19  ;;  %v12489_v19 = vld [vmem:[%s15970_s23 + $0x2d0] sm:$0xff]  }
0x1ba6   :  { %11077 = vmatmul.mubr.msk.bf16.vlgmr.msra.gmra.mrb[108].mxu0 %vm6425_vm6, %v10093_v20 }
0x1ba7   :  { %11096 = vmatprep.mubr.msk.bf16.mxu0 %vm12537_vm4, %v12535_v38  ;;  %11081 = vmatpush3.bf16.msra.mxu0 %v12472_v30  ;;  %v12502_v30 = vld [vmem:[%s15970_s23 + $0x278] sm:$0xff]  }
0x1ba8   :  { %11082 = vmatprep.subr.bf16.mxu0 %v12535_v38 }
0x1ba9   :  { %10095 = vmatmul.mubr.msk.bf16.vlgmr.msra.gmra.mrb[84].mxu1 %vm6425_vm6, %v10093_v20  ;;  %v12484_v20 = vld [vmem:[%s15970_s23 + $0x248] sm:$0xff]  }
0x1baa   :  { %10726 = vmatpush3.bf16.msra.mxu1 %v12457_v26  ;;  %v12485_v26 = vld [vmem:[%s15970_s23 + $0x290] sm:$0xff]  }
0x1bab   :  { %10727 = vmatprep.subr.bf16.mxu1 %v12458_v41  ;;  %11083 = vmatpush3.bf16.msra.mxu0 %v12473_v52  ;;  %v12492_v41 = vld [vmem:[%s15970_s23 + $0x2d8] sm:$0xff]  }
0x1bac   :  { %11084 = vmatprep.subr.bf16.mxu0 %v12535_v38  ;;  %v12503_v52 = vld [vmem:[%s15970_s23 + $0x2f8] sm:$0xff]  }
0x1bae   :  { %10728 = vmatpush3.bf16.msra.mxu1 %v12459_v24  ;;  %v12487_v24 = vld [vmem:[%s15970_s23 + $0x250] sm:$0xff]  }
0x1baf   :  { %10729 = vmatprep.subr.bf16.mxu1 %v12460_v56  ;;  %11085 = vmatpush3.bf16.msra.mxu0 %v12474_v25  ;;  %v12488_v56 = vld [vmem:[%s15970_s23 + $0x298] sm:$0xff]  }
0x1bb0   :  { %11086 = vmatprep.subr.bf16.mxu0 %v12535_v38 }
0x1bb2   :  { %10730 = vmatpush3.bf16.msra.mxu1 %v12461_v3  ;;  %v12490_v3 = vld [vmem:[%s15970_s23 + $0x258] sm:$0xff]  }
0x1bb3   :  { %10731 = vmatprep.subr.bf16.mxu1 %v12462_v13  ;;  %v12491_v13 = vld [vmem:[%s15970_s23 + $0x2a0] sm:$0xff]  }
0x1bb6   :  { %10732 = vmatpush3.bf16.msra.mxu1 %v12463_v34  ;;  %v12493_v34 = vld [vmem:[%s15970_s23 + $0x260] sm:$0xff]  }
0x1bb7   :  { %10733 = vmatprep.subr.bf16.mxu1 %v12464_v51  ;;  %v12495_v51 = vld [vmem:[%s15970_s23 + $0x2e0] sm:$0xff]  }
0x1bba   :  { %10734 = vmatpush3.bf16.msra.mxu1 %v12465_v9  ;;  %v12494_v9 = vld [vmem:[%s15970_s23 + $0x2a8] sm:$0xff]  }
0x1bbb   :  { %10735 = vmatprep.subr.bf16.mxu1 %v12466_v50  ;;  %v12496_v50 = vld [vmem:[%s15970_s23 + $0x268] sm:$0xff]  }
0x1bbe   :  { %10736 = vmatpush3.bf16.msra.mxu1 %v12467_v1  ;;  %v12498_v1 = vld [vmem:[%s15970_s23 + $0x2e8] sm:$0xff]  }
0x1bbf   :  { %10737 = vmatprep.subr.bf16.mxu1 %v12468_v22  ;;  %v12497_v22 = vld [vmem:[%s15970_s23 + $0x2b0] sm:$0xff]  }
0x1bc2   :  { %10738 = vmatpush3.bf16.msra.mxu1 %v12469_v2  ;;  %v12499_v2 = vld [vmem:[%s15970_s23 + $0x270] sm:$0xff]  }
0x1bc3   :  { %10739 = vmatprep.subr.bf16.mxu1 %v12470_v15  ;;  %v12501_v15 = vld [vmem:[%s15970_s23 + $0x2f0] sm:$0xff]  }
0x1bc6   :  { %10740 = vmatpush3.bf16.msra.mxu1 %v12471_v16  ;;  %v12500_v16 = vld [vmem:[%s15970_s23 + $0x2b8] sm:$0xff]  }
0x1bc7   :  { %10170 = vmatprep.subr.msk.bf16.mxu1 %vm7504_vm10, %v15537_v44  ;;  %v12475_v44 = vld [vmem:[%s15970_s23 + $0x218] sm:$0xff]  }
0x1bc8   :  { %11087 = vmatpush3.bf16.msra.mxu0 %v12475_v44 }
0x1bc9   :  { %11088 = vmatprep.subr.bf16.mxu0 %v12535_v38 }
0x1bcc   :  { %11089 = vmatpush3.bf16.msra.mxu0 %v12476_v40 }
0x1bcd   :  { %11090 = vmatprep.subr.bf16.mxu0 %v12535_v38 }
0x1bd0   :  { %11091 = vmatpush3.bf16.msra.mxu0 %v12477_v54 }
0x1bd1   :  { %11092 = vmatprep.subr.bf16.mxu0 %v12535_v38 }
0x1bd4   :  { %11093 = vmatpush3.bf16.msra.mxu0 %v12478_v32 }
0x1bd5   :  { %11094 = vmatprep.subr.bf16.mxu0 %v12535_v38 }
0x1bd8   :  { %11095 = vmatpush3.bf16.msra.mxu0 %v12479_v28 }
0x1bd9   :  { %11100 = vmatprep.subr.bf16.mxu0 %v12535_v38 }
0x1c51   :  { %v8002_v61 = vpop.f32.mrb[100].mxu0 }
0x1c52   :  { %v11052_v8 = vpop.f32.mrb[101].mxu0 }
0x1c53   :  { %v8005_v14 = vpop.f32.mrb[102].mxu0 }
0x1c54   :  { %v10677_v21 = vpop.f32.mrb[76].mxu1  ;;  %v11053_v45 = vpop.f32.mrb[103].mxu0 }
0x1c55   :  { %v10678_v47 = vpop.f32.mrb[77].mxu1 }
0x1c56   :  { %v10679_v29 = vadd.f32 %v10678_v47, %v10677_v21  ;;  %v10680_v12 = vpop.f32.mrb[78].mxu1 }
0x1c57   :  { %v10681_v53 = vpop.f32.mrb[79].mxu1 }
0x1c58   :  { %v8003_v7 = vadd.f32 %v10679_v29, %v8002_v61 }
0x1c71   :  { %v8226_v37 = vpop.f32.mrb[104].mxu0 }
0x1c72   :  { %v11072_v43 = vpop.f32.mrb[105].mxu0 }
0x1c73   :  { %v8229_v6 = vpop.f32.mrb[106].mxu0 }
0x1c74   :  { %v10708_v5 = vpop.f32.mrb[80].mxu1  ;;  %v11073_v35 = vpop.f32.mrb[107].mxu0 }
0x1c75   :  { %v10709_v39 = vpop.f32.mrb[81].mxu1 }
0x1c76   :  { %v10710_v17 = vadd.f32 %v10709_v39, %v10708_v5  ;;  %v10711_v18 = vpop.f32.mrb[82].mxu1 }
0x1c77   :  { %v10712_v27 = vpop.f32.mrb[83].mxu1 }
0x1c78   :  { %v8187_v33 = vadd.f32 %v10710_v17, %v8003_v7 }
0x1c79   :  { %v8312_v57 = vpop.f32.mrb[108].mxu0 }
0x1c7a   :  { %v8320_v46 = vpack.c.bf16 %v8312_v57, %v8312_v57  ;;  %v11078_v63 = vpop.f32.mrb[109].mxu0  ;;  %v15837_v0 = vadd.f32 %v8226_v37, %v8187_v33 }
0x1c7b   :  { %v8315_v48 = vpop.f32.mrb[110].mxu0 }
0x1c7c   :  { %v8271_v49 = vpop.f32.mrb[84].mxu1  ;;  %11097 = vmatmul.mubr.bf16.vlgmr.msra.gmra.mrb[112].mxu0 %v8320_v46  ;;  %v11079_v36 = vpop.f32.mrb[111].mxu0 }
0x1c7d   :  { %11101 = vmatpush3.bf16.msra.mxu0 %v15540_v55  ;;  %v8273_v42 = vpop.f32.mrb[85].mxu1  ;;  %11102 = vmatprep.mubr.msk.bf16.mxu0 %vm12537_vm4, %v12535_v38  ;;  %v8318_v59 = vpack.c.bf16 %v8271_v49, %v8271_v49  ;;  %v12483_v55 = vld [vmem:[%s15970_s23 + $0x2c0] sm:$0xff]  }
0x1c7e   :  { %v8319_v62 = vpack.c.bf16 %v8273_v42, %v8273_v42  ;;  %v8275_v4 = vpop.f32.mrb[86].mxu1  ;;  %11106 = vmatprep.subr.bf16.mxu0 %v12535_v38  ;;  %v10245_v49 = vld [vmem:[%s15971_s24] ss:$0 sm:$0xff] }
0x1c7f   :  { %v8276_v60 = vpop.f32.mrb[87].mxu1 }
0x1c80   :  { %8546 = vmatprep.mubr.bf16.mxu1 %v8319_v62 }
0x1c81   :  { %8547 = vmatmul.mubr.bf16.vlgmr.msra.gmra.mrb[88].mxu1 %v8318_v59 }
0x1c82   :  { %8601 = vmatpush1.bf16.msra.mxu1 %v15543_v23  ;;  %8632 = vmatprep.mubr.bf16.mxu1 %v16002_v31  ;;  %v12481_v23 = vld [vmem:[%s15970_s23 + $0x240] sm:$0xff]   ;;  %v12482_v31 = vld [vmem:[%s15970_s23 + $0x288] sm:$0xff]  }
0x1c83   :  { %10758 = vmatprep.subr.bf16.mxu1 %v12480_v10 }
0x1c84   :  { %11103 = vmatmul.mubr.msk.bf16.vlgmr.msra.gmra.mrb[116].mxu0 %vm6425_vm6, %v10169_v11 }
0x1c85   :  { %11107 = vmatpush3.bf16.msra.mxu0 %v12483_v55  ;;  %11122 = vmatprep.mubr.msk.bf16.mxu0 %vm12537_vm4, %v12535_v38 }
0x1c86   :  { %11108 = vmatprep.subr.bf16.mxu0 %v12535_v38 }
0x1c89   :  { %10171 = vmatmul.mubr.msk.bf16.vlgmr.msra.gmra.mrb[92].mxu1 %vm6425_vm6, %v10169_v11  ;;  %11109 = vmatpush3.bf16.msra.mxu0 %v12486_v58 }
0x1c8a   :  { %10759 = vmatpush3.bf16.msra.mxu1 %v12481_v23  ;;  %11110 = vmatprep.subr.bf16.mxu0 %v12535_v38 }
0x1c8b   :  { %10760 = vmatprep.subr.bf16.mxu1 %v12482_v31 }
0x1c8d   :  { %11111 = vmatpush3.bf16.msra.mxu0 %v12489_v19 }
0x1c8e   :  { %10761 = vmatpush3.bf16.msra.mxu1 %v12484_v20  ;;  %11112 = vmatprep.subr.bf16.mxu0 %v12535_v38 }
0x1c8f   :  { %10762 = vmatprep.subr.bf16.mxu1 %v12485_v26 }
0x1c91   :  { %11113 = vmatpush3.bf16.msra.mxu0 %v12492_v41 }
0x1c92   :  { %10763 = vmatpush3.bf16.msra.mxu1 %v12487_v24  ;;  %11114 = vmatprep.subr.bf16.mxu0 %v12535_v38 }
0x1c93   :  { %10764 = vmatprep.subr.bf16.mxu1 %v12488_v56 }
0x1c95   :  { %11115 = vmatpush3.bf16.msra.mxu0 %v12495_v51 }
0x1c96   :  { %10765 = vmatpush3.bf16.msra.mxu1 %v12490_v3  ;;  %11116 = vmatprep.subr.bf16.mxu0 %v12535_v38 }
0x1c97   :  { %10766 = vmatprep.subr.bf16.mxu1 %v12491_v13 }
0x1c99   :  { %11117 = vmatpush3.bf16.msra.mxu0 %v12498_v1 }
0x1c9a   :  { %10767 = vmatpush3.bf16.msra.mxu1 %v12493_v34  ;;  %11118 = vmatprep.subr.bf16.mxu0 %v12535_v38 }
0x1c9b   :  { %10768 = vmatprep.subr.bf16.mxu1 %v12494_v9 }
0x1c9d   :  { %11119 = vmatpush3.bf16.msra.mxu0 %v12501_v15 }
0x1c9e   :  { %10769 = vmatpush3.bf16.msra.mxu1 %v12496_v50  ;;  %11120 = vmatprep.subr.bf16.mxu0 %v12535_v38 }
0x1c9f   :  { %10770 = vmatprep.subr.bf16.mxu1 %v12497_v22 }
0x1ca1   :  { %11121 = vmatpush3.bf16.msra.mxu0 %v12503_v52 }
0x1ca2   :  { %10771 = vmatpush3.bf16.msra.mxu1 %v12499_v2 }
0x1ca3   :  { %10772 = vmatprep.subr.bf16.mxu1 %v12500_v16 }
0x1ca6   :  { %10773 = vmatpush3.bf16.msra.mxu1 %v12502_v30 }
0x1d4f   :  { %v8588_v25 = vpop.f32.mrb[112].mxu0 }
0x1d50   :  { %v11098_v44 = vpop.f32.mrb[113].mxu0 }
0x1d51   :  { %v8591_v40 = vpop.f32.mrb[114].mxu0 }
0x1d52   :  { %v11099_v54 = vpop.f32.mrb[115].mxu0 }
0x1d54   :  { %v10741_v32 = vpop.f32.mrb[88].mxu1 }
0x1d55   :  { %v10742_v28 = vpop.f32.mrb[89].mxu1 }
0x1d56   :  { %v10743_v61 = vadd.f32 %v10742_v28, %v10741_v32  ;;  %v10744_v8 = vpop.f32.mrb[90].mxu1 }
0x1d57   :  { %v10745_v38 = vpop.f32.mrb[91].mxu1  ;;  %v8675_v14 = vpop.f32.mrb[116].mxu0 }
0x1d58   :  { %v8589_v21 = vadd.f32 %v10743_v61, %v8588_v25  ;;  %v8683_v45 = vpack.c.bf16 %v8675_v14, %v8675_v14  ;;  %v11104_v47 = vpop.f32.mrb[117].mxu0 }
0x1d59   :  { %v8678_v29 = vpop.f32.mrb[118].mxu0 }
0x1d5a   :  { %v8594_v12 = vadd.f32 %v8589_v21, %v15837_v0  ;;  %11123 = vmatmul.mubr.bf16.vlgmr.msra.gmra.mrb[120].mxu0 %v8683_v45  ;;  %v11105_v53 = vpop.f32.mrb[119].mxu0 }
0x1d5c   :  { %v8634_v7 = vpop.f32.mrb[92].mxu1 }
0x1d5d   :  { %v8636_v37 = vpop.f32.mrb[93].mxu1  ;;  %v8681_v5 = vpack.c.bf16 %v8634_v7, %v8634_v7 }
0x1d5e   :  { %v8682_v43 = vpack.c.bf16 %v8636_v37, %v8636_v37  ;;  %v8638_v6 = vpop.f32.mrb[94].mxu1 }
0x1d5f   :  { %v8639_v35 = vpop.f32.mrb[95].mxu1 }
0x1d60   :  { %8909 = vmatprep.mubr.bf16.mxu1 %v8682_v43 }
0x1d61   :  { %8910 = vmatmul.mubr.bf16.vlgmr.msra.gmra.mrb[96].mxu1 %v8681_v5 }
0x1e2d   :  { %v8951_v39 = vpop.f32.mrb[120].mxu0 }
0x1e2e   :  { %v11124_v17 = vpop.f32.mrb[121].mxu0 }
0x1e2f   :  { %v8954_v18 = vpop.f32.mrb[122].mxu0 }
0x1e30   :  { %v11125_v27 = vpop.f32.mrb[123].mxu0 }
0x1e34   :  { %v10774_v33 = vpop.f32.mrb[96].mxu1 }
0x1e35   :  { %v10775_v57 = vpop.f32.mrb[97].mxu1 }
0x1e36   :  { %v10776_v46 = vadd.f32 %v10775_v57, %v10774_v33  ;;  %v10777_v63 = vpop.f32.mrb[98].mxu1 }
0x1e37   :  { %v10778_v48 = vpop.f32.mrb[99].mxu1 }
0x1e38   :  { %v8952_v0 = vadd.f32 %v10776_v46, %v8951_v39 }
0x1e3a   :  { %v8957_v36 = vadd.f32 %v8952_v0, %v8594_v12 }
0x1e3c   :  { %v8965_v42 = vadd.f32 %v10245_v49, %v8957_v36 }
0x1e3e   :  { %8967 = vst.msk [vmem:[#allocation2] sm:$0xf] %vm8966_vm11, %v8965_v42 }
0x1e3f   :  { %12521 = shalt.err (!%p12518_p4)
}
0x1e40   :  { %s12522_s13 = scalar_lea.hbm %s15972_s25, 64 }
0x1e41   :  { %p12523_p5 = scmp.ne.s32.totalorder %s15972_s25, %s12522_s13  ;;  %p12526_p6 = scmp.lt.u32.totalorder %s12522_s13, %s15972_s25 }
0x1e43   :  { %p12528_p7 = pnand %p12526_p6, %p12523_p5 }
0x1e45   :  { %12531 = shalt.err (!%p12528_p7)
}
0x1e46   :  { %8977 = dma.vmem_to_hbm [thread:$0]  %s8975_s3, 64, %s15972_s25, [#allocation3]  }
0x1e47   :  { %12532 = dma.done.wait [#allocation3], 64  }
0x1e48   :  { %12533 = vsyncadd [#allocation3], 4294967232 }
0x1e49   :  { %8981 = vsyncpa [#allocation3], 1 }

</bundles_post_ra>
